<compile_context>
chip_gen: v7x
topology: tpu7x:2x2x1
jax: 0.10.0
libtpu: 0.0.40
codegen_flags: <defaults>
</compile_context>

<pallas_src>
import functools

import jax
import jax.numpy as jnp
import numpy as np
from jax.experimental import pallas as pl
from jax.experimental.pallas import tpu as pltpu

K = 5          # kernel size
PAD = 2        # padding
BN_EPS = 1e-5


def _shift_lanes(a, s):
    """Circular left shift along the lane axis: result[:, i] = a[:, (i + s) % n].

    Static slices + concat (np.roll(-s) semantics, lowers to cheap lane shuffles).
    """
    if s == 0:
        return a
    return jnp.concatenate([a[:, s:], a[:, :s]], axis=1)


def _fused_vnet_block_kernel(*refs, wp, n_valid):
    """Fused (conv5x5 -> BN(batch stats) -> PReLU) x num_layers.

    refs = [x, mask, (wmat, b, gamma, beta, alpha) * num_layers, out]
      x    : (Cin0, N*Pp)  padded-frame activations (zeros in the pad ring / tail)
      mask : (1, N*Pp)     1.0 at valid output ("corner frame") positions
      wmat : (Cout, K*K*Cin_l)   im2col weights, row order (kh, kw, ci)
      b, gamma, beta, alpha : (Cout, 1)
      out  : (Cout, N*Pp)  conv-block output in the corner frame (lane dense)
    """
    x_ref, mask_ref = refs[0], refs[1]
    out_ref = refs[-1]
    param_refs = refs[2:-1]
    num_layers = len(param_refs) // 5

    npx = x_ref.shape[1]                    # N * Pp (flattened lane extent)
    mask = mask_ref[...]                    # (1, N*Pp)
    inv_count = jnp.float32(1.0 / n_valid)
    repad_shift = PAD * wp + PAD            # corner frame -> padded frame offset

    a = x_ref[...].astype(jnp.float32)      # (C, N*Pp)

    for layer in range(num_layers):
        w_ref, b_ref, g_ref, be_ref, al_ref = param_refs[5 * layer: 5 * layer + 5]

        if layer > 0:
            # In-register re-padding of the previous output: zero the invalid lanes,
            # then shift valid pixels from the corner frame into the zero-padded frame.
            a = _shift_lanes(a * mask, npx - repad_shift)

        # im2col via lane shifts: tap (kh, kw) reads flat offset kh*Wp + kw.
        taps = []
        for kh in range(K):
            for kw in range(K):
                taps.append(_shift_lanes(a, kh * wp + kw))
        col = jnp.concatenate(taps, axis=0)             # (K*K*Cin_l, N*Pp)

        # Single MXU matmul per layer: (Cout, K*K*Cin_l) @ (K*K*Cin_l, N*Pp).
        y = jnp.dot(w_ref[...].astype(jnp.float32), col,
                    preferred_element_type=jnp.float32)  # (Cout, N*Pp)
        y = y + b_ref[...].astype(jnp.float32)           # (Cout, 1) lane-broadcast

        # One-pass masked batch statistics (biased, training mode).
        ym = y * mask
        mean = jnp.sum(ym, axis=1, keepdims=True) * inv_count
        var = jnp.sum(ym * ym, axis=1, keepdims=True) * inv_count - mean * mean
        inv_std = jax.lax.rsqrt(var + BN_EPS)
        y = (y - mean) * (inv_std * g_ref[...].astype(jnp.float32)) \
            + be_ref[...].astype(jnp.float32)

        # Per-channel PReLU.
        y = jnp.where(y >= 0, y, al_ref[...].astype(jnp.float32) * y)
        a = y

    out_ref[...] = a.astype(out_ref.dtype)


def vnet_conv_block_forward(x_nchw, params):
    """Forward pass of VNetConvBlock. Input/output are NCHW (PyTorch convention)."""
    N, Cin, H, W = x_nchw.shape
    Cout = params[0]["w"].shape[-1]
    Hp, Wp = H + 2 * PAD, W + 2 * PAD
    P = Hp * Wp
    Pp = ((P + 127) // 128) * 128           # lane-pad flattened padded image
    NP = N * Pp

    # Padded-frame, channel-major, flattened activations: (Cin, N*Pp).
    xc = jnp.transpose(x_nchw, (1, 0, 2, 3)).astype(jnp.float32)      # (Cin, N, H, W)
    xpad = jnp.pad(xc, ((0, 0), (0, 0), (PAD, PAD), (PAD, PAD)))      # (Cin, N, Hp, Wp)
    a0 = jnp.pad(xpad.reshape(Cin, N, P), ((0, 0), (0, 0), (0, Pp - P)))
    a0 = a0.reshape(Cin, NP)

    # Validity mask for conv-output ("corner frame") positions: p = y*Wp + x, y<H, x<W.
    pidx = jnp.arange(Pp, dtype=jnp.int32)
    valid = ((pidx // Wp) < H) & ((pidx % Wp) < W)
    mask = jnp.tile(valid.astype(jnp.float32), (N,)).reshape(1, NP)

    flat_params = []
    for p in params:
        cin_l = p["w"].shape[2]
        # HWIO (kh,kw,ci,co) -> (co, kh, kw, ci) -> (Cout, K*K*cin_l), row = (kh*K+kw)*cin_l + ci
        wmat = jnp.transpose(p["w"], (3, 0, 1, 2)).reshape(Cout, K * K * cin_l)
        flat_params += [wmat.astype(jnp.float32),
                        p["b"].reshape(Cout, 1),
                        p["gamma"].reshape(Cout, 1),
                        p["beta"].reshape(Cout, 1),
                        p["alpha"].reshape(Cout, 1)]

    kernel = functools.partial(_fused_vnet_block_kernel, wp=Wp, n_valid=N * H * W)

    in_arrays = [a0, mask] + flat_params
    in_specs = [pl.BlockSpec(arr.shape, lambda i: (0, 0)) for arr in in_arrays]

    out_flat = pl.pallas_call(
        kernel,
        grid=(1,),
        in_specs=in_specs,
        out_specs=pl.BlockSpec((Cout, NP), lambda i: (0, 0)),
        out_shape=jax.ShapeDtypeStruct((Cout, NP), jnp.float32),
        compiler_params=pltpu.CompilerParams(
            dimension_semantics=("arbitrary",)),
    )(*in_arrays)

    # Extract valid pixels (corner frame) and return NCHW.
    out = out_flat.reshape(Cout, N, Pp)[:, :, :P]
    out = out.reshape(Cout, N, Hp, Wp)[:, :, :H, :W]
    return jnp.transpose(out, (1, 0, 2, 3)).astype(x_nchw.dtype)


def init_vnet_conv_block_params(key, in_channels, out_channels, layers=2):
    """Deterministic parameter init mimicking the PyTorch module's shapes (weights HWIO)."""
    params = []
    cin = in_channels
    for _ in range(layers):
        key, kw_, kb = jax.random.split(key, 3)
        fan_in = cin * K * K
        bound = 1.0 / np.sqrt(fan_in)
        w = jax.random.uniform(kw_, (K, K, cin, out_channels),
                               minval=-bound, maxval=bound, dtype=jnp.float32)
        b = jax.random.uniform(kb, (out_channels,),
                               minval=-bound, maxval=bound, dtype=jnp.float32)
        gamma = jnp.ones((out_channels,), jnp.float32)
        beta = jnp.zeros((out_channels,), jnp.float32)
        alpha = jnp.full((out_channels,), 0.25, jnp.float32)   # PReLU default init
        params.append(dict(w=w, b=b, gamma=gamma, beta=beta, alpha=alpha))
        cin = out_channels
    return params


def _reference_forward(x_nchw, params):
    """Pure-JAX reference (same math) for a correctness check."""
    x = jnp.transpose(x_nchw, (0, 2, 3, 1))
    for p in params:
        y = jax.lax.conv_general_dilated(
            x, p["w"], window_strides=(1, 1),
            padding=((PAD, PAD), (PAD, PAD)),
            dimension_numbers=("NHWC", "HWIO", "NHWC"))
        y = y + p["b"]
        mean = jnp.mean(y, axis=(0, 1, 2), keepdims=True)
        var = jnp.mean((y - mean) ** 2, axis=(0, 1, 2), keepdims=True)
        y = (y - mean) * jax.lax.rsqrt(var + BN_EPS) * p["gamma"] + p["beta"]
        y = jnp.where(y >= 0, y, p["alpha"] * y)
        x = y
    return jnp.transpose(x, (0, 3, 1, 2))


if __name__ == "__main__":
    key = jax.random.PRNGKey(0)
    k_x, k_p = jax.random.split(key)

    N, Cin, H, W = 2, 4, 16, 16
    Cout = 8
    LAYERS = 2

    x = jax.random.normal(k_x, (N, Cin, H, W), dtype=jnp.float32)
    params = init_vnet_conv_block_params(k_p, Cin, Cout, layers=LAYERS)

    out = vnet_conv_block_forward(x, params)
    out = jax.block_until_ready(out)

    ref = jax.block_until_ready(_reference_forward(x, params))
    assert out.shape == (N, Cout, H, W), out.shape
    np.testing.assert_allclose(np.asarray(out), np.asarray(ref),
                               rtol=1e-3, atol=1e-3)

    print("KERNEL_OK")
</pallas_src>

<mosaic_0001>
module attributes {stable_mosaic.version = 11 : i64} {
  func.func @_fused_vnet_block_kernel(%arg0: i32, %arg1: memref<4x1024xf32, #tpu.memory_space<vmem>>, %arg2: memref<1x1024xf32, #tpu.memory_space<vmem>>, %arg3: memref<8x100xf32, #tpu.memory_space<vmem>>, %arg4: memref<8x1xf32, #tpu.memory_space<vmem>>, %arg5: memref<8x1xf32, #tpu.memory_space<vmem>>, %arg6: memref<8x1xf32, #tpu.memory_space<vmem>>, %arg7: memref<8x1xf32, #tpu.memory_space<vmem>>, %arg8: memref<8x200xf32, #tpu.memory_space<vmem>>, %arg9: memref<8x1xf32, #tpu.memory_space<vmem>>, %arg10: memref<8x1xf32, #tpu.memory_space<vmem>>, %arg11: memref<8x1xf32, #tpu.memory_space<vmem>>, %arg12: memref<8x1xf32, #tpu.memory_space<vmem>>, %arg13: memref<8x1024xf32, #tpu.memory_space<vmem>>) attributes {dimension_semantics = [#tpu.dimension_semantics<arbitrary>], iteration_bounds = array<i64: 1>, scalar_prefetch = 0 : i64, scratch_operands = 0 : i64, tpu.core_type = #tpu.core_type<tc>, window_params = [{pipeline_mode = #tpu.pipeline_mode<synchronous>, transform_indices = @transform_0, window_bounds = array<i64: 4, 1024>}, {pipeline_mode = #tpu.pipeline_mode<synchronous>, transform_indices = @transform_1, window_bounds = array<i64: 1, 1024>}, {pipeline_mode = #tpu.pipeline_mode<synchronous>, transform_indices = @transform_2, window_bounds = array<i64: 8, 100>}, {pipeline_mode = #tpu.pipeline_mode<synchronous>, transform_indices = @transform_3, window_bounds = array<i64: 8, 1>}, {pipeline_mode = #tpu.pipeline_mode<synchronous>, transform_indices = @transform_4, window_bounds = array<i64: 8, 1>}, {pipeline_mode = #tpu.pipeline_mode<synchronous>, transform_indices = @transform_5, window_bounds = array<i64: 8, 1>}, {pipeline_mode = #tpu.pipeline_mode<synchronous>, transform_indices = @transform_6, window_bounds = array<i64: 8, 1>}, {pipeline_mode = #tpu.pipeline_mode<synchronous>, transform_indices = @transform_7, window_bounds = array<i64: 8, 200>}, {pipeline_mode = #tpu.pipeline_mode<synchronous>, transform_indices = @transform_8, window_bounds = array<i64: 8, 1>}, {pipeline_mode = #tpu.pipeline_mode<synchronous>, transform_indices = @transform_9, window_bounds = array<i64: 8, 1>}, {pipeline_mode = #tpu.pipeline_mode<synchronous>, transform_indices = @transform_10, window_bounds = array<i64: 8, 1>}, {pipeline_mode = #tpu.pipeline_mode<synchronous>, transform_indices = @transform_11, window_bounds = array<i64: 8, 1>}, {pipeline_mode = #tpu.pipeline_mode<synchronous>, transform_indices = @transform_12, window_bounds = array<i64: 8, 1024>}]} {
    %c0 = arith.constant 0 : index
    %c0_0 = arith.constant 0 : index
    %0 = vector.load %arg2[%c0, %c0_0] : memref<1x1024xf32, #tpu.memory_space<vmem>>, vector<1x1024xf32>
    %c0_1 = arith.constant 0 : index
    %c0_2 = arith.constant 0 : index
    %1 = vector.load %arg1[%c0_1, %c0_2] : memref<4x1024xf32, #tpu.memory_space<vmem>>, vector<4x1024xf32>
    %2 = vector.extract_strided_slice %1 {offsets = [0, 1], sizes = [4, 1023], strides = [1, 1]} : vector<4x1024xf32> to vector<4x1023xf32>
    %3 = vector.extract_strided_slice %1 {offsets = [0, 0], sizes = [4, 1], strides = [1, 1]} : vector<4x1024xf32> to vector<4x1xf32>
    %4 = tpu.concatenate %2, %3 in 1 : vector<4x1023xf32>, vector<4x1xf32> -> vector<4x1024xf32>
    %5 = vector.extract_strided_slice %1 {offsets = [0, 2], sizes = [4, 1022], strides = [1, 1]} : vector<4x1024xf32> to vector<4x1022xf32>
    %6 = vector.extract_strided_slice %1 {offsets = [0, 0], sizes = [4, 2], strides = [1, 1]} : vector<4x1024xf32> to vector<4x2xf32>
    %7 = tpu.concatenate %5, %6 in 1 : vector<4x1022xf32>, vector<4x2xf32> -> vector<4x1024xf32>
    %8 = vector.extract_strided_slice %1 {offsets = [0, 3], sizes = [4, 1021], strides = [1, 1]} : vector<4x1024xf32> to vector<4x1021xf32>
    %9 = vector.extract_strided_slice %1 {offsets = [0, 0], sizes = [4, 3], strides = [1, 1]} : vector<4x1024xf32> to vector<4x3xf32>
    %10 = tpu.concatenate %8, %9 in 1 : vector<4x1021xf32>, vector<4x3xf32> -> vector<4x1024xf32>
    %11 = vector.extract_strided_slice %1 {offsets = [0, 4], sizes = [4, 1020], strides = [1, 1]} : vector<4x1024xf32> to vector<4x1020xf32>
    %12 = vector.extract_strided_slice %1 {offsets = [0, 0], sizes = [4, 4], strides = [1, 1]} : vector<4x1024xf32> to vector<4x4xf32>
    %13 = tpu.concatenate %11, %12 in 1 : vector<4x1020xf32>, vector<4x4xf32> -> vector<4x1024xf32>
    %14 = vector.extract_strided_slice %1 {offsets = [0, 20], sizes = [4, 1004], strides = [1, 1]} : vector<4x1024xf32> to vector<4x1004xf32>
    %15 = vector.extract_strided_slice %1 {offsets = [0, 0], sizes = [4, 20], strides = [1, 1]} : vector<4x1024xf32> to vector<4x20xf32>
    %16 = tpu.concatenate %14, %15 in 1 : vector<4x1004xf32>, vector<4x20xf32> -> vector<4x1024xf32>
    %17 = vector.extract_strided_slice %1 {offsets = [0, 21], sizes = [4, 1003], strides = [1, 1]} : vector<4x1024xf32> to vector<4x1003xf32>
    %18 = vector.extract_strided_slice %1 {offsets = [0, 0], sizes = [4, 21], strides = [1, 1]} : vector<4x1024xf32> to vector<4x21xf32>
    %19 = tpu.concatenate %17, %18 in 1 : vector<4x1003xf32>, vector<4x21xf32> -> vector<4x1024xf32>
    %20 = vector.extract_strided_slice %1 {offsets = [0, 22], sizes = [4, 1002], strides = [1, 1]} : vector<4x1024xf32> to vector<4x1002xf32>
    %21 = vector.extract_strided_slice %1 {offsets = [0, 0], sizes = [4, 22], strides = [1, 1]} : vector<4x1024xf32> to vector<4x22xf32>
    %22 = tpu.concatenate %20, %21 in 1 : vector<4x1002xf32>, vector<4x22xf32> -> vector<4x1024xf32>
    %23 = vector.extract_strided_slice %1 {offsets = [0, 23], sizes = [4, 1001], strides = [1, 1]} : vector<4x1024xf32> to vector<4x1001xf32>
    %24 = vector.extract_strided_slice %1 {offsets = [0, 0], sizes = [4, 23], strides = [1, 1]} : vector<4x1024xf32> to vector<4x23xf32>
    %25 = tpu.concatenate %23, %24 in 1 : vector<4x1001xf32>, vector<4x23xf32> -> vector<4x1024xf32>
    %26 = vector.extract_strided_slice %1 {offsets = [0, 24], sizes = [4, 1000], strides = [1, 1]} : vector<4x1024xf32> to vector<4x1000xf32>
    %27 = vector.extract_strided_slice %1 {offsets = [0, 0], sizes = [4, 24], strides = [1, 1]} : vector<4x1024xf32> to vector<4x24xf32>
    %28 = tpu.concatenate %26, %27 in 1 : vector<4x1000xf32>, vector<4x24xf32> -> vector<4x1024xf32>
    %29 = vector.extract_strided_slice %1 {offsets = [0, 40], sizes = [4, 984], strides = [1, 1]} : vector<4x1024xf32> to vector<4x984xf32>
    %30 = vector.extract_strided_slice %1 {offsets = [0, 0], sizes = [4, 40], strides = [1, 1]} : vector<4x1024xf32> to vector<4x40xf32>
    %31 = tpu.concatenate %29, %30 in 1 : vector<4x984xf32>, vector<4x40xf32> -> vector<4x1024xf32>
    %32 = vector.extract_strided_slice %1 {offsets = [0, 41], sizes = [4, 983], strides = [1, 1]} : vector<4x1024xf32> to vector<4x983xf32>
    %33 = vector.extract_strided_slice %1 {offsets = [0, 0], sizes = [4, 41], strides = [1, 1]} : vector<4x1024xf32> to vector<4x41xf32>
    %34 = tpu.concatenate %32, %33 in 1 : vector<4x983xf32>, vector<4x41xf32> -> vector<4x1024xf32>
    %35 = vector.extract_strided_slice %1 {offsets = [0, 42], sizes = [4, 982], strides = [1, 1]} : vector<4x1024xf32> to vector<4x982xf32>
    %36 = vector.extract_strided_slice %1 {offsets = [0, 0], sizes = [4, 42], strides = [1, 1]} : vector<4x1024xf32> to vector<4x42xf32>
    %37 = tpu.concatenate %35, %36 in 1 : vector<4x982xf32>, vector<4x42xf32> -> vector<4x1024xf32>
    %38 = vector.extract_strided_slice %1 {offsets = [0, 43], sizes = [4, 981], strides = [1, 1]} : vector<4x1024xf32> to vector<4x981xf32>
    %39 = vector.extract_strided_slice %1 {offsets = [0, 0], sizes = [4, 43], strides = [1, 1]} : vector<4x1024xf32> to vector<4x43xf32>
    %40 = tpu.concatenate %38, %39 in 1 : vector<4x981xf32>, vector<4x43xf32> -> vector<4x1024xf32>
    %41 = vector.extract_strided_slice %1 {offsets = [0, 44], sizes = [4, 980], strides = [1, 1]} : vector<4x1024xf32> to vector<4x980xf32>
    %42 = vector.extract_strided_slice %1 {offsets = [0, 0], sizes = [4, 44], strides = [1, 1]} : vector<4x1024xf32> to vector<4x44xf32>
    %43 = tpu.concatenate %41, %42 in 1 : vector<4x980xf32>, vector<4x44xf32> -> vector<4x1024xf32>
    %44 = vector.extract_strided_slice %1 {offsets = [0, 60], sizes = [4, 964], strides = [1, 1]} : vector<4x1024xf32> to vector<4x964xf32>
    %45 = vector.extract_strided_slice %1 {offsets = [0, 0], sizes = [4, 60], strides = [1, 1]} : vector<4x1024xf32> to vector<4x60xf32>
    %46 = tpu.concatenate %44, %45 in 1 : vector<4x964xf32>, vector<4x60xf32> -> vector<4x1024xf32>
    %47 = vector.extract_strided_slice %1 {offsets = [0, 61], sizes = [4, 963], strides = [1, 1]} : vector<4x1024xf32> to vector<4x963xf32>
    %48 = vector.extract_strided_slice %1 {offsets = [0, 0], sizes = [4, 61], strides = [1, 1]} : vector<4x1024xf32> to vector<4x61xf32>
    %49 = tpu.concatenate %47, %48 in 1 : vector<4x963xf32>, vector<4x61xf32> -> vector<4x1024xf32>
    %50 = vector.extract_strided_slice %1 {offsets = [0, 62], sizes = [4, 962], strides = [1, 1]} : vector<4x1024xf32> to vector<4x962xf32>
    %51 = vector.extract_strided_slice %1 {offsets = [0, 0], sizes = [4, 62], strides = [1, 1]} : vector<4x1024xf32> to vector<4x62xf32>
    %52 = tpu.concatenate %50, %51 in 1 : vector<4x962xf32>, vector<4x62xf32> -> vector<4x1024xf32>
    %53 = vector.extract_strided_slice %1 {offsets = [0, 63], sizes = [4, 961], strides = [1, 1]} : vector<4x1024xf32> to vector<4x961xf32>
    %54 = vector.extract_strided_slice %1 {offsets = [0, 0], sizes = [4, 63], strides = [1, 1]} : vector<4x1024xf32> to vector<4x63xf32>
    %55 = tpu.concatenate %53, %54 in 1 : vector<4x961xf32>, vector<4x63xf32> -> vector<4x1024xf32>
    %56 = vector.extract_strided_slice %1 {offsets = [0, 64], sizes = [4, 960], strides = [1, 1]} : vector<4x1024xf32> to vector<4x960xf32>
    %57 = vector.extract_strided_slice %1 {offsets = [0, 0], sizes = [4, 64], strides = [1, 1]} : vector<4x1024xf32> to vector<4x64xf32>
    %58 = tpu.concatenate %56, %57 in 1 : vector<4x960xf32>, vector<4x64xf32> -> vector<4x1024xf32>
    %59 = vector.extract_strided_slice %1 {offsets = [0, 80], sizes = [4, 944], strides = [1, 1]} : vector<4x1024xf32> to vector<4x944xf32>
    %60 = vector.extract_strided_slice %1 {offsets = [0, 0], sizes = [4, 80], strides = [1, 1]} : vector<4x1024xf32> to vector<4x80xf32>
    %61 = tpu.concatenate %59, %60 in 1 : vector<4x944xf32>, vector<4x80xf32> -> vector<4x1024xf32>
    %62 = vector.extract_strided_slice %1 {offsets = [0, 81], sizes = [4, 943], strides = [1, 1]} : vector<4x1024xf32> to vector<4x943xf32>
    %63 = vector.extract_strided_slice %1 {offsets = [0, 0], sizes = [4, 81], strides = [1, 1]} : vector<4x1024xf32> to vector<4x81xf32>
    %64 = tpu.concatenate %62, %63 in 1 : vector<4x943xf32>, vector<4x81xf32> -> vector<4x1024xf32>
    %65 = vector.extract_strided_slice %1 {offsets = [0, 82], sizes = [4, 942], strides = [1, 1]} : vector<4x1024xf32> to vector<4x942xf32>
    %66 = vector.extract_strided_slice %1 {offsets = [0, 0], sizes = [4, 82], strides = [1, 1]} : vector<4x1024xf32> to vector<4x82xf32>
    %67 = tpu.concatenate %65, %66 in 1 : vector<4x942xf32>, vector<4x82xf32> -> vector<4x1024xf32>
    %68 = vector.extract_strided_slice %1 {offsets = [0, 83], sizes = [4, 941], strides = [1, 1]} : vector<4x1024xf32> to vector<4x941xf32>
    %69 = vector.extract_strided_slice %1 {offsets = [0, 0], sizes = [4, 83], strides = [1, 1]} : vector<4x1024xf32> to vector<4x83xf32>
    %70 = tpu.concatenate %68, %69 in 1 : vector<4x941xf32>, vector<4x83xf32> -> vector<4x1024xf32>
    %71 = vector.extract_strided_slice %1 {offsets = [0, 84], sizes = [4, 940], strides = [1, 1]} : vector<4x1024xf32> to vector<4x940xf32>
    %72 = vector.extract_strided_slice %1 {offsets = [0, 0], sizes = [4, 84], strides = [1, 1]} : vector<4x1024xf32> to vector<4x84xf32>
    %73 = tpu.concatenate %71, %72 in 1 : vector<4x940xf32>, vector<4x84xf32> -> vector<4x1024xf32>
    %74 = tpu.concatenate %1, %4, %7, %10, %13, %16, %19, %22, %25, %28, %31, %34, %37, %40, %43, %46 in 0 : vector<4x1024xf32>, vector<4x1024xf32>, vector<4x1024xf32>, vector<4x1024xf32>, vector<4x1024xf32>, vector<4x1024xf32>, vector<4x1024xf32>, vector<4x1024xf32>, vector<4x1024xf32>, vector<4x1024xf32>, vector<4x1024xf32>, vector<4x1024xf32>, vector<4x1024xf32>, vector<4x1024xf32>, vector<4x1024xf32>, vector<4x1024xf32> -> vector<64x1024xf32>
    %75 = tpu.concatenate %49, %52, %55, %58, %61, %64, %67, %70, %73 in 0 : vector<4x1024xf32>, vector<4x1024xf32>, vector<4x1024xf32>, vector<4x1024xf32>, vector<4x1024xf32>, vector<4x1024xf32>, vector<4x1024xf32>, vector<4x1024xf32>, vector<4x1024xf32> -> vector<36x1024xf32>
    %76 = tpu.concatenate %74, %75 in 0 : vector<64x1024xf32>, vector<36x1024xf32> -> vector<100x1024xf32>
    %c0_3 = arith.constant 0 : index
    %c0_4 = arith.constant 0 : index
    %77 = vector.load %arg3[%c0_3, %c0_4] : memref<8x100xf32, #tpu.memory_space<vmem>>, vector<8x100xf32>
    %cst = arith.constant dense<0.000000e+00> : vector<8x1024xf32>
    %78 = tpu.matmul %77, %76, %cst {dimension_numbers = #tpu.dot_dimension_numbers<[1], [0], [0], [1], [0, 0, 1, 1], [], []>} : vector<8x100xf32>, vector<100x1024xf32>, vector<8x1024xf32> -> vector<8x1024xf32>
    %c0_5 = arith.constant 0 : index
    %c0_6 = arith.constant 0 : index
    %79 = vector.load %arg4[%c0_5, %c0_6] : memref<8x1xf32, #tpu.memory_space<vmem>>, vector<8x1xf32>
    %80 = vector.broadcast %79 : vector<8x1xf32> to vector<8x1024xf32>
    %81 = arith.addf %78, %80 : vector<8x1024xf32>
    %82 = vector.broadcast %0 : vector<1x1024xf32> to vector<8x1024xf32>
    %83 = arith.mulf %81, %82 : vector<8x1024xf32>
    %cst_7 = arith.constant dense<0.000000e+00> : vector<8xf32>
    %84 = vector.multi_reduction <add>, %83, %cst_7 [1] : vector<8x1024xf32> to vector<8xf32>
    %85 = vector.shape_cast %84 : vector<8xf32> to vector<8x1xf32>
    %cst_8 = arith.constant 0.001953125 : f32
    %86 = vector.broadcast %cst_8 : f32 to vector<8x1xf32>
    %87 = arith.mulf %85, %86 : vector<8x1xf32>
    %88 = arith.mulf %83, %83 : vector<8x1024xf32>
    %cst_9 = arith.constant dense<0.000000e+00> : vector<8xf32>
    %89 = vector.multi_reduction <add>, %88, %cst_9 [1] : vector<8x1024xf32> to vector<8xf32>
    %90 = vector.shape_cast %89 : vector<8xf32> to vector<8x1xf32>
    %cst_10 = arith.constant 0.001953125 : f32
    %91 = vector.broadcast %cst_10 : f32 to vector<8x1xf32>
    %92 = arith.mulf %90, %91 : vector<8x1xf32>
    %93 = arith.mulf %87, %87 : vector<8x1xf32>
    %94 = arith.subf %92, %93 : vector<8x1xf32>
    %cst_11 = arith.constant 9.99999974E-6 : f32
    %95 = vector.broadcast %cst_11 : f32 to vector<8x1xf32>
    %96 = arith.addf %94, %95 : vector<8x1xf32>
    %97 = math.rsqrt %96 : vector<8x1xf32>
    %98 = vector.broadcast %87 : vector<8x1xf32> to vector<8x1024xf32>
    %99 = arith.subf %81, %98 : vector<8x1024xf32>
    %c0_12 = arith.constant 0 : index
    %c0_13 = arith.constant 0 : index
    %100 = vector.load %arg5[%c0_12, %c0_13] : memref<8x1xf32, #tpu.memory_space<vmem>>, vector<8x1xf32>
    %101 = arith.mulf %97, %100 : vector<8x1xf32>
    %102 = vector.broadcast %101 : vector<8x1xf32> to vector<8x1024xf32>
    %103 = arith.mulf %99, %102 : vector<8x1024xf32>
    %c0_14 = arith.constant 0 : index
    %c0_15 = arith.constant 0 : index
    %104 = vector.load %arg6[%c0_14, %c0_15] : memref<8x1xf32, #tpu.memory_space<vmem>>, vector<8x1xf32>
    %105 = vector.broadcast %104 : vector<8x1xf32> to vector<8x1024xf32>
    %106 = arith.addf %103, %105 : vector<8x1024xf32>
    %cst_16 = arith.constant 0.000000e+00 : f32
    %107 = vector.broadcast %cst_16 : f32 to vector<8x1024xf32>
    %108 = arith.cmpf oge, %106, %107 : vector<8x1024xf32>
    %c0_17 = arith.constant 0 : index
    %c0_18 = arith.constant 0 : index
    %109 = vector.load %arg7[%c0_17, %c0_18] : memref<8x1xf32, #tpu.memory_space<vmem>>, vector<8x1xf32>
    %110 = vector.broadcast %109 : vector<8x1xf32> to vector<8x1024xf32>
    %111 = arith.mulf %110, %106 : vector<8x1024xf32>
    %112 = arith.select %108, %106, %111 : vector<8x1024xi1>, vector<8x1024xf32>
    %113 = vector.broadcast %0 : vector<1x1024xf32> to vector<8x1024xf32>
    %114 = arith.mulf %112, %113 : vector<8x1024xf32>
    %115 = vector.extract_strided_slice %114 {offsets = [0, 982], sizes = [8, 42], strides = [1, 1]} : vector<8x1024xf32> to vector<8x42xf32>
    %116 = vector.extract_strided_slice %114 {offsets = [0, 0], sizes = [8, 982], strides = [1, 1]} : vector<8x1024xf32> to vector<8x982xf32>
    %117 = tpu.concatenate %115, %116 in 1 : vector<8x42xf32>, vector<8x982xf32> -> vector<8x1024xf32>
    %118 = vector.extract_strided_slice %117 {offsets = [0, 1], sizes = [8, 1023], strides = [1, 1]} : vector<8x1024xf32> to vector<8x1023xf32>
    %119 = vector.extract_strided_slice %117 {offsets = [0, 0], sizes = [8, 1], strides = [1, 1]} : vector<8x1024xf32> to vector<8x1xf32>
    %120 = tpu.concatenate %118, %119 in 1 : vector<8x1023xf32>, vector<8x1xf32> -> vector<8x1024xf32>
    %121 = vector.extract_strided_slice %117 {offsets = [0, 2], sizes = [8, 1022], strides = [1, 1]} : vector<8x1024xf32> to vector<8x1022xf32>
    %122 = vector.extract_strided_slice %117 {offsets = [0, 0], sizes = [8, 2], strides = [1, 1]} : vector<8x1024xf32> to vector<8x2xf32>
    %123 = tpu.concatenate %121, %122 in 1 : vector<8x1022xf32>, vector<8x2xf32> -> vector<8x1024xf32>
    %124 = vector.extract_strided_slice %117 {offsets = [0, 3], sizes = [8, 1021], strides = [1, 1]} : vector<8x1024xf32> to vector<8x1021xf32>
    %125 = vector.extract_strided_slice %117 {offsets = [0, 0], sizes = [8, 3], strides = [1, 1]} : vector<8x1024xf32> to vector<8x3xf32>
    %126 = tpu.concatenate %124, %125 in 1 : vector<8x1021xf32>, vector<8x3xf32> -> vector<8x1024xf32>
    %127 = vector.extract_strided_slice %117 {offsets = [0, 4], sizes = [8, 1020], strides = [1, 1]} : vector<8x1024xf32> to vector<8x1020xf32>
    %128 = vector.extract_strided_slice %117 {offsets = [0, 0], sizes = [8, 4], strides = [1, 1]} : vector<8x1024xf32> to vector<8x4xf32>
    %129 = tpu.concatenate %127, %128 in 1 : vector<8x1020xf32>, vector<8x4xf32> -> vector<8x1024xf32>
    %130 = vector.extract_strided_slice %117 {offsets = [0, 20], sizes = [8, 1004], strides = [1, 1]} : vector<8x1024xf32> to vector<8x1004xf32>
    %131 = vector.extract_strided_slice %117 {offsets = [0, 0], sizes = [8, 20], strides = [1, 1]} : vector<8x1024xf32> to vector<8x20xf32>
    %132 = tpu.concatenate %130, %131 in 1 : vector<8x1004xf32>, vector<8x20xf32> -> vector<8x1024xf32>
    %133 = vector.extract_strided_slice %117 {offsets = [0, 21], sizes = [8, 1003], strides = [1, 1]} : vector<8x1024xf32> to vector<8x1003xf32>
    %134 = vector.extract_strided_slice %117 {offsets = [0, 0], sizes = [8, 21], strides = [1, 1]} : vector<8x1024xf32> to vector<8x21xf32>
    %135 = tpu.concatenate %133, %134 in 1 : vector<8x1003xf32>, vector<8x21xf32> -> vector<8x1024xf32>
    %136 = vector.extract_strided_slice %117 {offsets = [0, 22], sizes = [8, 1002], strides = [1, 1]} : vector<8x1024xf32> to vector<8x1002xf32>
    %137 = vector.extract_strided_slice %117 {offsets = [0, 0], sizes = [8, 22], strides = [1, 1]} : vector<8x1024xf32> to vector<8x22xf32>
    %138 = tpu.concatenate %136, %137 in 1 : vector<8x1002xf32>, vector<8x22xf32> -> vector<8x1024xf32>
    %139 = vector.extract_strided_slice %117 {offsets = [0, 23], sizes = [8, 1001], strides = [1, 1]} : vector<8x1024xf32> to vector<8x1001xf32>
    %140 = vector.extract_strided_slice %117 {offsets = [0, 0], sizes = [8, 23], strides = [1, 1]} : vector<8x1024xf32> to vector<8x23xf32>
    %141 = tpu.concatenate %139, %140 in 1 : vector<8x1001xf32>, vector<8x23xf32> -> vector<8x1024xf32>
    %142 = vector.extract_strided_slice %117 {offsets = [0, 24], sizes = [8, 1000], strides = [1, 1]} : vector<8x1024xf32> to vector<8x1000xf32>
    %143 = vector.extract_strided_slice %117 {offsets = [0, 0], sizes = [8, 24], strides = [1, 1]} : vector<8x1024xf32> to vector<8x24xf32>
    %144 = tpu.concatenate %142, %143 in 1 : vector<8x1000xf32>, vector<8x24xf32> -> vector<8x1024xf32>
    %145 = vector.extract_strided_slice %117 {offsets = [0, 40], sizes = [8, 984], strides = [1, 1]} : vector<8x1024xf32> to vector<8x984xf32>
    %146 = vector.extract_strided_slice %117 {offsets = [0, 0], sizes = [8, 40], strides = [1, 1]} : vector<8x1024xf32> to vector<8x40xf32>
    %147 = tpu.concatenate %145, %146 in 1 : vector<8x984xf32>, vector<8x40xf32> -> vector<8x1024xf32>
    %148 = vector.extract_strided_slice %117 {offsets = [0, 41], sizes = [8, 983], strides = [1, 1]} : vector<8x1024xf32> to vector<8x983xf32>
    %149 = vector.extract_strided_slice %117 {offsets = [0, 0], sizes = [8, 41], strides = [1, 1]} : vector<8x1024xf32> to vector<8x41xf32>
    %150 = tpu.concatenate %148, %149 in 1 : vector<8x983xf32>, vector<8x41xf32> -> vector<8x1024xf32>
    %151 = vector.extract_strided_slice %117 {offsets = [0, 42], sizes = [8, 982], strides = [1, 1]} : vector<8x1024xf32> to vector<8x982xf32>
    %152 = vector.extract_strided_slice %117 {offsets = [0, 0], sizes = [8, 42], strides = [1, 1]} : vector<8x1024xf32> to vector<8x42xf32>
    %153 = tpu.concatenate %151, %152 in 1 : vector<8x982xf32>, vector<8x42xf32> -> vector<8x1024xf32>
    %154 = vector.extract_strided_slice %117 {offsets = [0, 43], sizes = [8, 981], strides = [1, 1]} : vector<8x1024xf32> to vector<8x981xf32>
    %155 = vector.extract_strided_slice %117 {offsets = [0, 0], sizes = [8, 43], strides = [1, 1]} : vector<8x1024xf32> to vector<8x43xf32>
    %156 = tpu.concatenate %154, %155 in 1 : vector<8x981xf32>, vector<8x43xf32> -> vector<8x1024xf32>
    %157 = vector.extract_strided_slice %117 {offsets = [0, 44], sizes = [8, 980], strides = [1, 1]} : vector<8x1024xf32> to vector<8x980xf32>
    %158 = vector.extract_strided_slice %117 {offsets = [0, 0], sizes = [8, 44], strides = [1, 1]} : vector<8x1024xf32> to vector<8x44xf32>
    %159 = tpu.concatenate %157, %158 in 1 : vector<8x980xf32>, vector<8x44xf32> -> vector<8x1024xf32>
    %160 = vector.extract_strided_slice %117 {offsets = [0, 60], sizes = [8, 964], strides = [1, 1]} : vector<8x1024xf32> to vector<8x964xf32>
    %161 = vector.extract_strided_slice %117 {offsets = [0, 0], sizes = [8, 60], strides = [1, 1]} : vector<8x1024xf32> to vector<8x60xf32>
    %162 = tpu.concatenate %160, %161 in 1 : vector<8x964xf32>, vector<8x60xf32> -> vector<8x1024xf32>
    %163 = vector.extract_strided_slice %117 {offsets = [0, 61], sizes = [8, 963], strides = [1, 1]} : vector<8x1024xf32> to vector<8x963xf32>
    %164 = vector.extract_strided_slice %117 {offsets = [0, 0], sizes = [8, 61], strides = [1, 1]} : vector<8x1024xf32> to vector<8x61xf32>
    %165 = tpu.concatenate %163, %164 in 1 : vector<8x963xf32>, vector<8x61xf32> -> vector<8x1024xf32>
    %166 = vector.extract_strided_slice %117 {offsets = [0, 62], sizes = [8, 962], strides = [1, 1]} : vector<8x1024xf32> to vector<8x962xf32>
    %167 = vector.extract_strided_slice %117 {offsets = [0, 0], sizes = [8, 62], strides = [1, 1]} : vector<8x1024xf32> to vector<8x62xf32>
    %168 = tpu.concatenate %166, %167 in 1 : vector<8x962xf32>, vector<8x62xf32> -> vector<8x1024xf32>
    %169 = vector.extract_strided_slice %117 {offsets = [0, 63], sizes = [8, 961], strides = [1, 1]} : vector<8x1024xf32> to vector<8x961xf32>
    %170 = vector.extract_strided_slice %117 {offsets = [0, 0], sizes = [8, 63], strides = [1, 1]} : vector<8x1024xf32> to vector<8x63xf32>
    %171 = tpu.concatenate %169, %170 in 1 : vector<8x961xf32>, vector<8x63xf32> -> vector<8x1024xf32>
    %172 = vector.extract_strided_slice %117 {offsets = [0, 64], sizes = [8, 960], strides = [1, 1]} : vector<8x1024xf32> to vector<8x960xf32>
    %173 = vector.extract_strided_slice %117 {offsets = [0, 0], sizes = [8, 64], strides = [1, 1]} : vector<8x1024xf32> to vector<8x64xf32>
    %174 = tpu.concatenate %172, %173 in 1 : vector<8x960xf32>, vector<8x64xf32> -> vector<8x1024xf32>
    %175 = vector.extract_strided_slice %117 {offsets = [0, 80], sizes = [8, 944], strides = [1, 1]} : vector<8x1024xf32> to vector<8x944xf32>
    %176 = vector.extract_strided_slice %117 {offsets = [0, 0], sizes = [8, 80], strides = [1, 1]} : vector<8x1024xf32> to vector<8x80xf32>
    %177 = tpu.concatenate %175, %176 in 1 : vector<8x944xf32>, vector<8x80xf32> -> vector<8x1024xf32>
    %178 = vector.extract_strided_slice %117 {offsets = [0, 81], sizes = [8, 943], strides = [1, 1]} : vector<8x1024xf32> to vector<8x943xf32>
    %179 = vector.extract_strided_slice %117 {offsets = [0, 0], sizes = [8, 81], strides = [1, 1]} : vector<8x1024xf32> to vector<8x81xf32>
    %180 = tpu.concatenate %178, %179 in 1 : vector<8x943xf32>, vector<8x81xf32> -> vector<8x1024xf32>
    %181 = vector.extract_strided_slice %117 {offsets = [0, 82], sizes = [8, 942], strides = [1, 1]} : vector<8x1024xf32> to vector<8x942xf32>
    %182 = vector.extract_strided_slice %117 {offsets = [0, 0], sizes = [8, 82], strides = [1, 1]} : vector<8x1024xf32> to vector<8x82xf32>
    %183 = tpu.concatenate %181, %182 in 1 : vector<8x942xf32>, vector<8x82xf32> -> vector<8x1024xf32>
    %184 = vector.extract_strided_slice %117 {offsets = [0, 83], sizes = [8, 941], strides = [1, 1]} : vector<8x1024xf32> to vector<8x941xf32>
    %185 = vector.extract_strided_slice %117 {offsets = [0, 0], sizes = [8, 83], strides = [1, 1]} : vector<8x1024xf32> to vector<8x83xf32>
    %186 = tpu.concatenate %184, %185 in 1 : vector<8x941xf32>, vector<8x83xf32> -> vector<8x1024xf32>
    %187 = vector.extract_strided_slice %117 {offsets = [0, 84], sizes = [8, 940], strides = [1, 1]} : vector<8x1024xf32> to vector<8x940xf32>
    %188 = vector.extract_strided_slice %117 {offsets = [0, 0], sizes = [8, 84], strides = [1, 1]} : vector<8x1024xf32> to vector<8x84xf32>
    %189 = tpu.concatenate %187, %188 in 1 : vector<8x940xf32>, vector<8x84xf32> -> vector<8x1024xf32>
    %190 = tpu.concatenate %117, %120, %123, %126, %129, %132, %135, %138, %141, %144, %147, %150, %153, %156, %159, %162 in 0 : vector<8x1024xf32>, vector<8x1024xf32>, vector<8x1024xf32>, vector<8x1024xf32>, vector<8x1024xf32>, vector<8x1024xf32>, vector<8x1024xf32>, vector<8x1024xf32>, vector<8x1024xf32>, vector<8x1024xf32>, vector<8x1024xf32>, vector<8x1024xf32>, vector<8x1024xf32>, vector<8x1024xf32>, vector<8x1024xf32>, vector<8x1024xf32> -> vector<128x1024xf32>
    %191 = tpu.concatenate %165, %168, %171, %174, %177, %180, %183, %186, %189 in 0 : vector<8x1024xf32>, vector<8x1024xf32>, vector<8x1024xf32>, vector<8x1024xf32>, vector<8x1024xf32>, vector<8x1024xf32>, vector<8x1024xf32>, vector<8x1024xf32>, vector<8x1024xf32> -> vector<72x1024xf32>
    %192 = tpu.concatenate %190, %191 in 0 : vector<128x1024xf32>, vector<72x1024xf32> -> vector<200x1024xf32>
    %c0_19 = arith.constant 0 : index
    %c0_20 = arith.constant 0 : index
    %193 = vector.load %arg8[%c0_19, %c0_20] : memref<8x200xf32, #tpu.memory_space<vmem>>, vector<8x200xf32>
    %cst_21 = arith.constant dense<0.000000e+00> : vector<8x1024xf32>
    %194 = tpu.matmul %193, %192, %cst_21 {dimension_numbers = #tpu.dot_dimension_numbers<[1], [0], [0], [1], [0, 0, 1, 1], [], []>} : vector<8x200xf32>, vector<200x1024xf32>, vector<8x1024xf32> -> vector<8x1024xf32>
    %c0_22 = arith.constant 0 : index
    %c0_23 = arith.constant 0 : index
    %195 = vector.load %arg9[%c0_22, %c0_23] : memref<8x1xf32, #tpu.memory_space<vmem>>, vector<8x1xf32>
    %196 = vector.broadcast %195 : vector<8x1xf32> to vector<8x1024xf32>
    %197 = arith.addf %194, %196 : vector<8x1024xf32>
    %198 = vector.broadcast %0 : vector<1x1024xf32> to vector<8x1024xf32>
    %199 = arith.mulf %197, %198 : vector<8x1024xf32>
    %cst_24 = arith.constant dense<0.000000e+00> : vector<8xf32>
    %200 = vector.multi_reduction <add>, %199, %cst_24 [1] : vector<8x1024xf32> to vector<8xf32>
    %201 = vector.shape_cast %200 : vector<8xf32> to vector<8x1xf32>
    %cst_25 = arith.constant 0.001953125 : f32
    %202 = vector.broadcast %cst_25 : f32 to vector<8x1xf32>
    %203 = arith.mulf %201, %202 : vector<8x1xf32>
    %204 = arith.mulf %199, %199 : vector<8x1024xf32>
    %cst_26 = arith.constant dense<0.000000e+00> : vector<8xf32>
    %205 = vector.multi_reduction <add>, %204, %cst_26 [1] : vector<8x1024xf32> to vector<8xf32>
    %206 = vector.shape_cast %205 : vector<8xf32> to vector<8x1xf32>
    %cst_27 = arith.constant 0.001953125 : f32
    %207 = vector.broadcast %cst_27 : f32 to vector<8x1xf32>
    %208 = arith.mulf %206, %207 : vector<8x1xf32>
    %209 = arith.mulf %203, %203 : vector<8x1xf32>
    %210 = arith.subf %208, %209 : vector<8x1xf32>
    %cst_28 = arith.constant 9.99999974E-6 : f32
    %211 = vector.broadcast %cst_28 : f32 to vector<8x1xf32>
    %212 = arith.addf %210, %211 : vector<8x1xf32>
    %213 = math.rsqrt %212 : vector<8x1xf32>
    %214 = vector.broadcast %203 : vector<8x1xf32> to vector<8x1024xf32>
    %215 = arith.subf %197, %214 : vector<8x1024xf32>
    %c0_29 = arith.constant 0 : index
    %c0_30 = arith.constant 0 : index
    %216 = vector.load %arg10[%c0_29, %c0_30] : memref<8x1xf32, #tpu.memory_space<vmem>>, vector<8x1xf32>
    %217 = arith.mulf %213, %216 : vector<8x1xf32>
    %218 = vector.broadcast %217 : vector<8x1xf32> to vector<8x1024xf32>
    %219 = arith.mulf %215, %218 : vector<8x1024xf32>
    %c0_31 = arith.constant 0 : index
    %c0_32 = arith.constant 0 : index
    %220 = vector.load %arg11[%c0_31, %c0_32] : memref<8x1xf32, #tpu.memory_space<vmem>>, vector<8x1xf32>
    %221 = vector.broadcast %220 : vector<8x1xf32> to vector<8x1024xf32>
    %222 = arith.addf %219, %221 : vector<8x1024xf32>
    %cst_33 = arith.constant 0.000000e+00 : f32
    %223 = vector.broadcast %cst_33 : f32 to vector<8x1024xf32>
    %224 = arith.cmpf oge, %222, %223 : vector<8x1024xf32>
    %c0_34 = arith.constant 0 : index
    %c0_35 = arith.constant 0 : index
    %225 = vector.load %arg12[%c0_34, %c0_35] : memref<8x1xf32, #tpu.memory_space<vmem>>, vector<8x1xf32>
    %226 = vector.broadcast %225 : vector<8x1xf32> to vector<8x1024xf32>
    %227 = arith.mulf %226, %222 : vector<8x1024xf32>
    %228 = arith.select %224, %222, %227 : vector<8x1024xi1>, vector<8x1024xf32>
    %c0_36 = arith.constant 0 : index
    %c0_37 = arith.constant 0 : index
    %229 = vector.load %arg13[%c0_36, %c0_37] : memref<8x1024xf32, #tpu.memory_space<vmem>>, vector<8x1024xf32>
    tpu.vector_store %arg13[%c0_36, %c0_37], %228 {strides = array<i32>} : memref<8x1024xf32, #tpu.memory_space<vmem>>, vector<8x1024xf32>,
    return
  }
  func.func @transform_0(%arg0: i32) -> (i32, i32) {
    %c0_i32 = arith.constant 0 : i32
    %c0_i32_0 = arith.constant 0 : i32
    %c0_i32_1 = arith.constant 0 : i32
    return %c0_i32, %c0_i32_0 : i32, i32
  }
  func.func @transform_1(%arg0: i32) -> (i32, i32) {
    %c0_i32 = arith.constant 0 : i32
    %c0_i32_0 = arith.constant 0 : i32
    %c0_i32_1 = arith.constant 0 : i32
    return %c0_i32, %c0_i32_0 : i32, i32
  }
  func.func @transform_2(%arg0: i32) -> (i32, i32) {
    %c0_i32 = arith.constant 0 : i32
    %c0_i32_0 = arith.constant 0 : i32
    %c0_i32_1 = arith.constant 0 : i32
    return %c0_i32, %c0_i32_0 : i32, i32
  }
  func.func @transform_3(%arg0: i32) -> (i32, i32) {
    %c0_i32 = arith.constant 0 : i32
    %c0_i32_0 = arith.constant 0 : i32
    %c0_i32_1 = arith.constant 0 : i32
    return %c0_i32, %c0_i32_0 : i32, i32
  }
  func.func @transform_4(%arg0: i32) -> (i32, i32) {
    %c0_i32 = arith.constant 0 : i32
    %c0_i32_0 = arith.constant 0 : i32
    %c0_i32_1 = arith.constant 0 : i32
    return %c0_i32, %c0_i32_0 : i32, i32
  }
  func.func @transform_5(%arg0: i32) -> (i32, i32) {
    %c0_i32 = arith.constant 0 : i32
    %c0_i32_0 = arith.constant 0 : i32
    %c0_i32_1 = arith.constant 0 : i32
    return %c0_i32, %c0_i32_0 : i32, i32
  }
  func.func @transform_6(%arg0: i32) -> (i32, i32) {
    %c0_i32 = arith.constant 0 : i32
    %c0_i32_0 = arith.constant 0 : i32
    %c0_i32_1 = arith.constant 0 : i32
    return %c0_i32, %c0_i32_0 : i32, i32
  }
  func.func @transform_7(%arg0: i32) -> (i32, i32) {
    %c0_i32 = arith.constant 0 : i32
    %c0_i32_0 = arith.constant 0 : i32
    %c0_i32_1 = arith.constant 0 : i32
    return %c0_i32, %c0_i32_0 : i32, i32
  }
  func.func @transform_8(%arg0: i32) -> (i32, i32) {
    %c0_i32 = arith.constant 0 : i32
    %c0_i32_0 = arith.constant 0 : i32
    %c0_i32_1 = arith.constant 0 : i32
    return %c0_i32, %c0_i32_0 : i32, i32
  }
  func.func @transform_9(%arg0: i32) -> (i32, i32) {
    %c0_i32 = arith.constant 0 : i32
    %c0_i32_0 = arith.constant 0 : i32
    %c0_i32_1 = arith.constant 0 : i32
    return %c0_i32, %c0_i32_0 : i32, i32
  }
  func.func @transform_10(%arg0: i32) -> (i32, i32) {
    %c0_i32 = arith.constant 0 : i32
    %c0_i32_0 = arith.constant 0 : i32
    %c0_i32_1 = arith.constant 0 : i32
    return %c0_i32, %c0_i32_0 : i32, i32
  }
  func.func @transform_11(%arg0: i32) -> (i32, i32) {
    %c0_i32 = arith.constant 0 : i32
    %c0_i32_0 = arith.constant 0 : i32
    %c0_i32_1 = arith.constant 0 : i32
    return %c0_i32, %c0_i32_0 : i32, i32
  }
  func.func @transform_12(%arg0: i32) -> (i32, i32) {
    %c0_i32 = arith.constant 0 : i32
    %c0_i32_0 = arith.constant 0 : i32
    %c0_i32_1 = arith.constant 0 : i32
    return %c0_i32, %c0_i32_0 : i32, i32
  }
}

</mosaic_0001>

<bundles_post_ra>
// kernel: tpu_custom_call.1
= control target key start
LH: loop header
LB: loop body
LE: loop exit
PB: predicated region body
PF: predicated region fallthrough
CT: control target
= control target key end

     0   :  { %s6290_s0 = inlined_call_operand.vmem [shape: f32[4,1024], index: 0, kind: input, shape index: {}]   ;;  %s6291_s1 = inlined_call_operand.vmem [shape: f32[1,1024], index: 1, kind: input, shape index: {}]   ;;  %s6292_s2 = inlined_call_operand.vmem [shape: f32[8,100], index: 2, kind: input, shape index: {}]   ;;  %s6293_s3 = inlined_call_operand.vmem [shape: f32[8,1], index: 3, kind: input, shape index: {}]   ;;  %s6294_s4 = inlined_call_operand.vmem [shape: f32[8,1], index: 4, kind: input, shape index: {}]   ;;  %s6295_s5 = inlined_call_operand.vmem [shape: f32[8,1], index: 5, kind: input, shape index: {}]   ;;  %s6296_s6 = inlined_call_operand.vmem [shape: f32[8,1], index: 6, kind: input, shape index: {}]   ;;  %s6297_s7 = inlined_call_operand.vmem [shape: f32[8,200], index: 7, kind: input, shape index: {}]   ;;  %s6298_s8 = inlined_call_operand.vmem [shape: f32[8,1], index: 8, kind: input, shape index: {}]   ;;  %s6299_s9 = inlined_call_operand.vmem [shape: f32[8,1], index: 9, kind: input, shape index: {}]   ;;  %s6300_s10 = inlined_call_operand.vmem [shape: f32[8,1], index: 10, kind: input, shape index: {}]   ;;  %s6301_s11 = inlined_call_operand.vmem [shape: f32[8,1], index: 11, kind: input, shape index: {}]   ;;  %s6302_s12 = inlined_call_operand.hbm [shape: f32[8,1024], index: 12, kind: output, shape index: {}]  }
   0x1   :  { %v4126_v0 = vld [vmem:[%s6290_s0] sm:$0xff]  ;;  %v4131_v1 = vld [vmem:[%s6290_s0 + $0x8] sm:$0xff] }
   0x2   :  { %v4135_v2 = vcombine.high %v4131_v1, %v4131_v1  ;;  %v4139_v3 = vcombine.high %v4126_v0, %v4126_v0 }
   0x3   :  { %17 = vsyncpa [#allocation3], 0  ;;  %s4030_s25 = smov 127   ;;  %v4156_v6 = vld [vmem:[%s6290_s0 + $0x10] sm:$0xff]  ;;  %s4031_s28 = smov 125   ;;  %vm71_vm0 = vcmask 1039360  }
   0x4   :  { %v4143_v4 = vpack.i.bf16 %v4135_v2, %v4126_v0  ;;  %v4147_v5 = vpack.i.bf16 %v4131_v1, %v4139_v3  ;;  %v4164_v7 = vcombine.high %v4156_v6, %v4156_v6  ;;  %s4032_s29 = smov 126   ;;  %s6340_s30 = smov 106   ;;  %vm6406_vm1 = vcmask 1022976   ;;  %v4303_v23 = vld [vmem:[%s6290_s0 + $0x18] sm:$0xff] }
   0x5   :  { %s4034_s13 = smov 108   ;;  %s4035_s14 = smov 124   ;;  %vm98_vm2 = vcmask 1031168   ;;  %vm920_vm3 = vcmask 1043456   ;;  %v4314_v33 = vcombine.high %v4303_v23, %v4303_v23  ;;  %vm6402_vm4 = vcmask 867328  }
   0x6   :  { %3156 = vrot.lane.b32.xlu1 %v4143_v4, %s4030_s25  ;;  %3146 = vrot.lane.b32.xlu0 %v4147_v5, %s4030_s25  ;;  %v4172_v8 = vpack.i.bf16 %v4164_v7, %v4156_v6  ;;  %s4036_s15 = smov 107   ;;  %s6329_s16 = smov 104   ;;  %vm6404_vm5 = vcmask 883712   ;;  %vm6405_vm6 = vcmask 1014784   ;;  %vm6403_vm7 = vcmask 875520  }
   0x7   :  { %s6325_s17 = smov 87   ;;  %s6331_s18 = smov 105   ;;  %v4338_v46 = vpack.i.bf16 %v4314_v33, %v4303_v23  ;;  %vm6362_vm8 = vcmask 850944   ;;  %vm6359_vm9 = vcmask 711680   ;;  %vm6358_vm10 = vcmask 859136  }
   0x8   :  { %s6327_s19 = smov 88   ;;  %s6323_s20 = smov 85   ;;  %vm6357_vm11 = vcmask 719872   ;;  %vm6379_vm12 = vcmask 695296   ;;  %vm6377_vm13 = vcmask 556032   ;;  %vm6378_vm14 = vcmask 703488  }
   0x9   :  { %s6303_s21 = smov 68   ;;  %s6305_s22 = smov 86   ;;  %vm6376_vm15 = vcmask 687104  }
   0xa   :  { %3161 = vrot.lane.b32.xlu1 %v4143_v4, %s4031_s28  ;;  %3151 = vrot.lane.b32.xlu0 %v4147_v5, %s4031_s28  ;;  %s6307_s23 = smov 84   ;;  %s6313_s24 = smov 66  }
   0xb   :  { %s6309_s26 = smov 64   ;;  %s6311_s27 = smov 67  }
   0xe   :  { %3171 = vrot.lane.b32.xlu1 %v4143_v4, %s4032_s29  ;;  %3166 = vrot.lane.b32.xlu0 %v4147_v5, %s4032_s29 }
  0x12   :  { %3181 = vrot.lane.b32.xlu1 %v4172_v8, %s4031_s28  ;;  %3176 = vrot.lane.b32.xlu0 %v4172_v8, %s4030_s25 }
  0x16   :  { %3191 = vrot.lane.b32.xlu1 %v4147_v5, %s6340_s30  ;;  %3186 = vrot.lane.b32.xlu0 %v4147_v5, %s4034_s13 }
  0x1a   :  { %3201 = vrot.lane.b32.xlu1 %v4143_v4, %s6340_s30  ;;  %3196 = vrot.lane.b32.xlu0 %v4143_v4, %s4034_s13 }
  0x1e   :  { %3211 = vrot.lane.b32.xlu1 %v4147_v5, %s4035_s14  ;;  %3206 = vrot.lane.b32.xlu0 %v4172_v8, %s4032_s29 }
  0x22   :  { %3221 = vrot.lane.b32.xlu1 %v4143_v4, %s4035_s14  ;;  %3216 = vrot.lane.b32.xlu0 %v4147_v5, %s4036_s15 }
  0x26   :  { %3231 = vrot.lane.b32.xlu1 %v4172_v8, %s4034_s13  ;;  %3226 = vrot.lane.b32.xlu0 %v4143_v4, %s4036_s15 }
  0x2a   :  { %3241 = vrot.lane.b32.xlu1 %v4147_v5, %s6329_s16  ;;  %3236 = vrot.lane.b32.xlu0 %v4172_v8, %s6340_s30 }
  0x2e   :  { %3251 = vrot.lane.b32.xlu1 %v4143_v4, %s6329_s16  ;;  %3246 = vrot.lane.b32.xlu0 %v4147_v5, %s6325_s17 }
  0x32   :  { %3261 = vrot.lane.b32.xlu1 %v4172_v8, %s4035_s14  ;;  %3256 = vrot.lane.b32.xlu0 %v4143_v4, %s6325_s17 }
  0x36   :  { %3271 = vrot.lane.b32.xlu1 %v4147_v5, %s6331_s18  ;;  %3266 = vrot.lane.b32.xlu0 %v4172_v8, %s4036_s15 }
  0x3a   :  { %3281 = vrot.lane.b32.xlu1 %v4143_v4, %s6331_s18  ;;  %3276 = vrot.lane.b32.xlu0 %v4147_v5, %s6327_s19 }
  0x3e   :  { %3291 = vrot.lane.b32.xlu1 %v4172_v8, %s6329_s16  ;;  %3286 = vrot.lane.b32.xlu0 %v4143_v4, %s6327_s19 }
  0x42   :  { %3301 = vrot.lane.b32.xlu1 %v4147_v5, %s6323_s20  ;;  %3296 = vrot.lane.b32.xlu0 %v4172_v8, %s6325_s17 }
  0x46   :  { %3311 = vrot.lane.b32.xlu1 %v4143_v4, %s6323_s20  ;;  %3306 = vrot.lane.b32.xlu0 %v4147_v5, %s6303_s21 }
  0x4a   :  { %3321 = vrot.lane.b32.xlu1 %v4172_v8, %s6331_s18  ;;  %3316 = vrot.lane.b32.xlu0 %v4143_v4, %s6303_s21 }
  0x4e   :  { %3331 = vrot.lane.b32.xlu1 %v4147_v5, %s6305_s22  ;;  %3326 = vrot.lane.b32.xlu0 %v4172_v8, %s6327_s19 }
  0x52   :  { %3341 = vrot.lane.b32.xlu1 %v4143_v4, %s6305_s22  ;;  %3336 = vrot.lane.b32.xlu0 %v4147_v5, %s6307_s23 }
  0x56   :  { %3351 = vrot.lane.b32.xlu1 %v4172_v8, %s6323_s20  ;;  %3346 = vrot.lane.b32.xlu0 %v4143_v4, %s6307_s23 }
  0x5a   :  { %3361 = vrot.lane.b32.xlu1 %v4147_v5, %s6313_s24  ;;  %3356 = vrot.lane.b32.xlu0 %v4172_v8, %s6303_s21  ;;  %s6315_s21 = smov 65  }
  0x5e   :  { %3371 = vrot.lane.b32.xlu1 %v4143_v4, %s6313_s24  ;;  %3366 = vrot.lane.b32.xlu0 %v4147_v5, %s6309_s26 }
  0x62   :  { %3381 = vrot.lane.b32.xlu1 %v4172_v8, %s6305_s22  ;;  %3376 = vrot.lane.b32.xlu0 %v4143_v4, %s6309_s26  ;;  %s4049_s22 = smov 47  }
  0x66   :  { %3391 = vrot.lane.b32.xlu1 %v4147_v5, %s6311_s27  ;;  %3386 = vrot.lane.b32.xlu0 %v4172_v8, %s6307_s23  ;;  %s6353_s23 = smov 45  }
  0x6a   :  { %3401 = vrot.lane.b32.xlu1 %v4143_v4, %s6311_s27  ;;  %3396 = vrot.lane.b32.xlu0 %v4147_v5, %s6315_s21 }
  0x6e   :  { %3411 = vrot.lane.b32.xlu1 %v4172_v8, %s6313_s24  ;;  %3406 = vrot.lane.b32.xlu0 %v4143_v4, %s6315_s21  ;;  %s4054_s24 = smov 44  }
  0x72   :  { %3421 = vrot.lane.b32.xlu1 %v4147_v5, %s4049_s22  ;;  %3416 = vrot.lane.b32.xlu0 %v4172_v8, %s6309_s26  ;;  %s6407_s26 = smov 48  }
  0x76   :  { %3431 = vrot.lane.b32.xlu1 %v4143_v4, %s4049_s22  ;;  %3426 = vrot.lane.b32.xlu0 %v4147_v5, %s6353_s23 }
  0x78   :  { %v4278_v9 = vpop.permute.xlu1 %3156  ;;  %v3147_v10 = vpop.permute.xlu0 %3146 }
  0x79   :  { %v3149_v11 = vunpack.i.h.bf16 %v3147_v10  ;;  %v3148_v12 = vunpack.i.l.bf16 %v3147_v10  ;;  %v6352_v13 = vunpack.i.l.bf16 %v4278_v9  ;;  %v3159_v36 = vunpack.i.h.bf16 %v4278_v9 }
  0x7a   :  { %3441 = vrot.lane.b32.xlu1 %v4172_v8, %s6311_s27  ;;  %3436 = vrot.lane.b32.xlu0 %v4143_v4, %s6353_s23  ;;  %s6469_s27 = smov 86  }
  0x7b   :  { %v73_v19 = vsel %vm71_vm0, %v3148_v12, %v3149_v11  ;;  %v72_v20 = vsel %vm71_vm0, %v6352_v13, %v3148_v12  ;;  %v74_v50 = vsel %vm71_vm0, %v3149_v11, %v3159_v36 }
  0x7c   :  { %v4285_v14 = vpop.permute.xlu1 %3161  ;;  %v3152_v15 = vpop.permute.xlu0 %3151  ;;  %v786_v26 = vrot.slane %v73_v19, 4  ;;  %v785_v30 = vrot.slane %v72_v20, 4  ;;  %v787_v59 = vrot.slane %v74_v50, 4  ;;  %v6319_v50 = vmov 0.0  }
  0x7d   :  { %v6347_v16 = vunpack.i.l.bf16 %v4285_v14  ;;  %v3154_v17 = vunpack.i.h.bf16 %v3152_v15  ;;  %v3153_v18 = vunpack.i.l.bf16 %v3152_v15  ;;  %v3164_v43 = vunpack.i.h.bf16 %v4285_v14  ;;  %1177 = vmatprep.mubr.f32.mxu0 %v6319_v50  ;;  %1248 = vmatprep.mubr.f32.mxu1 %v6319_v50 }
  0x7e   :  { %3451 = vrot.lane.b32.xlu1 %v4147_v5, %s6407_s26  ;;  %3446 = vrot.lane.b32.xlu0 %v4172_v8, %s6315_s21  ;;  %s6355_s21 = smov 46   ;;  %v922_v41 = vsel %vm920_vm3, %v4139_v3, %v786_v26  ;;  %v921_v42 = vsel %vm920_vm3, %v4126_v0, %v785_v30  ;;  %v923_v19 = vsel %vm920_vm3, %v4131_v1, %v787_v59 }
  0x7f   :  { %v134_v21 = vsel %vm6406_vm1, %v3153_v18, %v3154_v17  ;;  %v133_v22 = vsel %vm6406_vm1, %v6347_v16, %v3153_v18  ;;  %v135_v55 = vsel %vm6406_vm1, %v3154_v17, %v3164_v43 }
  0x80   :  { %v4305_v24 = vpop.permute.xlu1 %3171  ;;  %v3167_v25 = vpop.permute.xlu0 %3166  ;;  %v803_v31 = vrot.slane %v134_v21, 4  ;;  %v802_v32 = vrot.slane %v133_v22, 4  ;;  %v804_v63 = vrot.slane %v135_v55, 4 }
  0x81   :  { %v6344_v27 = vunpack.i.l.bf16 %v4305_v24  ;;  %v3169_v28 = vunpack.i.h.bf16 %v3167_v25  ;;  %v3168_v29 = vunpack.i.l.bf16 %v3167_v25  ;;  %v3174_v51 = vunpack.i.h.bf16 %v4305_v24 }
  0x82   :  { %3461 = vrot.lane.b32.xlu1 %v4143_v4, %s6407_s26  ;;  %3456 = vrot.lane.b32.xlu0 %v4147_v5, %s6355_s21 }
  0x83   :  { %v100_v34 = vsel %vm98_vm2, %v3168_v29, %v3169_v28  ;;  %v99_v35 = vsel %vm98_vm2, %v6344_v27, %v3168_v29  ;;  %v101_v62 = vsel %vm98_vm2, %v3169_v28, %v3174_v51 }
  0x84   :  { %v4321_v37 = vpop.permute.xlu1 %3181  ;;  %v4323_v38 = vpop.permute.xlu0 %3176  ;;  %v930_v39 = vsel %vm920_vm3, %v100_v34, %v803_v31  ;;  %v929_v40 = vsel %vm920_vm3, %v99_v35, %v802_v32  ;;  %v931_v20 = vsel %vm920_vm3, %v101_v62, %v804_v63 }
  0x85   :  { %v2829_v44 = vpack.c.bf16 %v930_v39, %v922_v41  ;;  %v2831_v45 = vpack.c.bf16 %v929_v40, %v921_v42  ;;  %v3178_v47 = vunpack.i.l.bf16 %v4323_v38  ;;  %v6349_v52 = vunpack.i.h.bf16 %v4321_v37 }
  0x86   :  { %3471 = vrot.lane.b32.xlu1 %v4172_v8, %s4049_s22  ;;  %3466 = vrot.lane.b32.xlu0 %v4143_v4, %s6355_s21  ;;  %v3183_v53 = vunpack.i.l.bf16 %v4321_v37  ;;  %v6350_v54 = vunpack.i.h.bf16 %v4323_v38  ;;  %v2855_v62 = vpack.c.bf16 %v931_v20, %v923_v19 }
  0x87   :  { %2830 = vmatprep.subr.bf16.mxu0 %v2829_v44  ;;  %v75_v56 = vsel %vm71_vm0, %v3159_v36, %v3178_v47 }
  0x88   :  { %v4341_v48 = vpop.permute.xlu1 %3191  ;;  %v4343_v49 = vpop.permute.xlu0 %3186  ;;  %2832 = vmatpush1.bf16.msra.mxu0 %v2831_v45  ;;  %v137_v60 = vsel %vm6406_vm1, %v3183_v53, %v6349_v52  ;;  %v76_v61 = vsel %vm71_vm0, %v3178_v47, %v6350_v54  ;;  %v136_v8 = vsel %vm6406_vm1, %v3164_v43, %v3183_v53  ;;  %v788_v10 = vrot.slane %v75_v56, 4 }
  0x89   :  { %v3194_v4 = vunpack.i.h.bf16 %v4341_v48  ;;  %v3193_v5 = vunpack.i.l.bf16 %v4341_v48  ;;  %v3189_v11 = vunpack.i.h.bf16 %v4343_v49  ;;  %v3188_v12 = vunpack.i.l.bf16 %v4343_v49 }
  0x8a   :  { %3476 = vrot.lane.b32.xlu1 %v4338_v46, %s4030_s25  ;;  %734 = vrot.lane.b32.xlu0 %v4156_v6, %s6353_s23  ;;  %v806_v15 = vrot.slane %v137_v60, 4  ;;  %v789_v21 = vrot.slane %v76_v61, 4  ;;  %v805_v26 = vrot.slane %v136_v8, 4  ;;  %v924_v31 = vsel %vm920_vm3, %v4135_v2, %v788_v10 }
  0x8b   :  { %v256_v28 = vsel %vm6402_vm4, %v3193_v5, %v3194_v4  ;;  %v195_v32 = vsel %vm6404_vm5, %v3188_v12, %v3189_v11 }
  0x8c   :  { %v4356_v57 = vpop.permute.xlu1 %3201  ;;  %v4358_v58 = vpop.permute.xlu0 %3196  ;;  %v837_v44 = vrot.slane %v256_v28, 4  ;;  %v820_v60 = vrot.slane %v195_v32, 4 }
  0x8d   :  { %v6343_v34 = vunpack.i.l.bf16 %v4356_v57  ;;  %v6338_v39 = vunpack.i.l.bf16 %v4358_v58  ;;  %v3199_v32 = vunpack.i.h.bf16 %v4358_v58 }
  0x8e   :  { %639 = vrot.lane.b32.xlu1 %v4156_v6, %s6407_s26  ;;  %3481 = vrot.lane.b32.xlu0 %v4338_v46, %s4031_s28 }
  0x8f   :  { %v255_v61 = vsel %vm6402_vm4, %v6343_v34, %v3193_v5 }
  0x90   :  { %v4376_v17 = vpop.permute.xlu1 %3211  ;;  %v4378_v18 = vpop.permute.xlu0 %3206  ;;  %v836_v19 = vrot.slane %v255_v61, 4 }
  0x91   :  { %v6348_v22 = vunpack.i.h.bf16 %v4378_v18  ;;  %v3208_v25 = vunpack.i.l.bf16 %v4378_v18  ;;  %v3214_v29 = vunpack.i.h.bf16 %v4376_v17  ;;  %v3213_v30 = vunpack.i.l.bf16 %v4376_v17 }
  0x92   :  { %3486 = vrot.lane.b32.xlu1 %v4338_v46, %s4032_s29  ;;  %700 = vrot.lane.b32.xlu0 %v4156_v6, %s6355_s21 }
  0x93   :  { %v103_v35 = vsel %vm98_vm2, %v3208_v25, %v6348_v22  ;;  %v102_v36 = vsel %vm98_vm2, %v3174_v51, %v3208_v25  ;;  %v4418_v51 = vsel %vm920_vm3, %v4156_v6, %v789_v21  ;;  %v161_v56 = vsel %vm6405_vm6, %v3213_v30, %v3214_v29 }
  0x94   :  { %v4405_v40 = vpop.permute.xlu1 %3221  ;;  %v4407_v41 = vpop.permute.xlu0 %3216  ;;  %v932_v42 = vsel %vm920_vm3, %v102_v36, %v805_v26  ;;  %v4411_v43 = vsel %vm920_vm3, %v103_v35, %v806_v15  ;;  %v938_v5 = vsel %vm920_vm3, %v161_v56, %v820_v60  ;;  %v196_v60 = vsel %vm6404_vm5, %v3189_v11, %v3199_v32 }
  0x95   :  { %v3219_v45 = vunpack.i.h.bf16 %v4407_v41  ;;  %v3218_v47 = vunpack.i.l.bf16 %v4407_v41  ;;  %v6318_v53 = vunpack.i.l.bf16 %v4405_v40  ;;  %v2853_v55 = vpack.c.bf16 %v932_v42, %v924_v31 }
  0x96   :  { %757 = vrot.lane.b32.xlu1 %v4131_v1, %s4054_s24  ;;  %755 = vrot.lane.b32.xlu0 %v4139_v3, %s4054_s24  ;;  %v194_v3 = vsel %vm6404_vm5, %v6338_v39, %v3188_v12 }
  0x97   :  { %v222_v1 = vsel %vm6403_vm7, %v3218_v47, %v3219_v45  ;;  %2854 = vmatprep.subr.bf16.mxu1 %v2853_v55  ;;  %v160_v20 = vsel %vm6405_vm6, %v6318_v53, %v3213_v30  ;;  %v819_v21 = vrot.slane %v194_v3, 4 }
  0x98   :  { %v4440_v63 = vpop.permute.xlu1 %3231  ;;  %v4442_v8 = vpop.permute.xlu0 %3226  ;;  %v946_v10 = vsel %vm920_vm3, %v222_v1, %v837_v44  ;;  %2856 = vmatpush1.bf16.msra.mxu1 %v2855_v62  ;;  %v3204_v44 = vunpack.i.h.bf16 %v4356_v57  ;;  %v821_v1 = vrot.slane %v196_v60, 4 }
  0x99   :  { %v6317_v15 = vunpack.i.l.bf16 %v4442_v8  ;;  %v2833_v12 = vpack.c.bf16 %v946_v10, %v938_v5  ;;  %v937_v35 = vsel %vm920_vm3, %v160_v20, %v819_v21  ;;  %v6339_v36 = vunpack.i.h.bf16 %v4440_v63 }
  0x9a   :  { %3496 = vrot.lane.b32.xlu1 %v4338_v46, %s6340_s30  ;;  %3491 = vrot.lane.b32.xlu0 %v4338_v46, %s4034_s13  ;;  %v3233_v30 = vunpack.i.l.bf16 %v4440_v63  ;;  %v3229_v49 = vunpack.i.h.bf16 %v4442_v8  ;;  %v257_v11 = vsel %vm6402_vm4, %v3194_v4, %v3204_v44  ;;  %s6476_s30 = smov 65  }
  0x9b   :  { %v221_v25 = vsel %vm6403_vm7, %v6317_v15, %v3218_v47  ;;  %2834 = vmatprep.subr.bf16.mxu0 %v2833_v12  ;;  %v3224_v47 = vunpack.i.h.bf16 %v4405_v40 }
  0x9c   :  { %v4457_v26 = vpop.permute.xlu1 %3241  ;;  %v4459_v28 = vpop.permute.xlu0 %3236  ;;  %v945_v31 = vsel %vm920_vm3, %v221_v25, %v836_v19 }
  0x9d   :  { %v2835_v42 = vpack.c.bf16 %v945_v31, %v937_v35  ;;  %v6346_v61 = vunpack.i.h.bf16 %v4459_v28  ;;  %v3238_v62 = vunpack.i.l.bf16 %v4459_v28  ;;  %v162_v5 = vsel %vm6405_vm6, %v3214_v29, %v3224_v47 }
  0x9e   :  { %3501 = vrot.lane.b32.xlu1 %v4338_v46, %s4035_s14  ;;  %753 = vrot.lane.b32.xlu0 %v4126_v0, %s4054_s24  ;;  %v198_v0 = vsel %vm6404_vm5, %v3233_v30, %v6339_v36  ;;  %v838_v29 = vrot.slane %v257_v11, 4  ;;  %v223_v31 = vsel %vm6403_vm7, %v3219_v45, %v3229_v49 }
  0x9f   :  { %2836 = vmatpush1.bf16.msra.mxu0 %v2835_v42  ;;  %v823_v19 = vrot.slane %v198_v0, 4  ;;  %v258_v48 = vsel %vm6402_vm4, %v3204_v44, %v3238_v62  ;;  %v259_v4 = vsel %vm6402_vm4, %v3238_v62, %v6346_v61  ;;  %v3243_v42 = vunpack.i.l.bf16 %v4457_v26 }
  0xa0   :  { %v4472_v55 = vpop.permute.xlu1 %3251  ;;  %v4474_v56 = vpop.permute.xlu0 %3246  ;;  %v839_v0 = vrot.slane %v258_v48, 4  ;;  %v840_v62 = vrot.slane %v259_v4, 4 }
  0xa1   :  { %v3249_v21 = vunpack.i.h.bf16 %v4474_v56  ;;  %v3248_v17 = vunpack.i.l.bf16 %v4474_v56  ;;  %v6336_v53 = vunpack.i.l.bf16 %v4472_v55 }
  0xa2   :  { %759 = vrot.lane.b32.xlu1 %v4135_v2, %s4054_s24  ;;  %3506 = vrot.lane.b32.xlu0 %v4338_v46, %s4036_s15  ;;  %v197_v2 = vsel %vm6404_vm5, %v3199_v32, %v3233_v30  ;;  %v939_v32 = vsel %vm920_vm3, %v162_v5, %v821_v1  ;;  %v3244_v30 = vunpack.i.h.bf16 %v4457_v26  ;;  %v3580_v26 = vpack.i.bf16 %v4303_v23, %v4164_v7 }
  0xa3   :  { %v822_v35 = vrot.slane %v197_v2, 4  ;;  %v378_v11 = vsel %vm6359_vm9, %v3248_v17, %v3249_v21 }
  0xa4   :  { %v4492_v3 = vpop.permute.xlu1 %3261  ;;  %v4494_v10 = vpop.permute.xlu0 %3256  ;;  %v317_v15 = vsel %vm6362_vm8, %v3243_v42, %v3244_v30 }
  0xa5   :  { %v6321_v12 = vunpack.i.h.bf16 %v4492_v3  ;;  %v3263_v20 = vunpack.i.l.bf16 %v4492_v3 }
  0xa6   :  { %3511 = vrot.lane.b32.xlu1 %v4338_v46, %s6329_s16  ;;  %761 = vrot.lane.b32.xlu0 %v4156_v6, %s4054_s24  ;;  %s6473_s16 = smov 67  }
  0xa7   :  { %v164_v25 = vsel %vm6405_vm6, %v3263_v20, %v6321_v12  ;;  %v163_v2 = vsel %vm6405_vm6, %v3224_v47, %v3263_v20 }
  0xa8   :  { %v4521_v44 = vpop.permute.xlu1 %3271  ;;  %v4523_v60 = vpop.permute.xlu0 %3266  ;;  %v4526_v6 = vsel %vm920_vm3, %v164_v25, %v823_v19  ;;  %v6335_v19 = vunpack.i.l.bf16 %v4494_v10  ;;  %v947_v25 = vsel %vm920_vm3, %v223_v31, %v838_v29  ;;  %v940_v31 = vsel %vm920_vm3, %v163_v2, %v822_v35 }
  0xa9   :  { %v6322_v41 = vunpack.i.h.bf16 %v4523_v60  ;;  %v3268_v45 = vunpack.i.l.bf16 %v4523_v60  ;;  %v3274_v1 = vunpack.i.h.bf16 %v4521_v44  ;;  %v3273_v5 = vunpack.i.l.bf16 %v4521_v44 }
  0xaa   :  { %3521 = vrot.lane.b32.xlu1 %v4338_v46, %s6331_s18  ;;  %3516 = vrot.lane.b32.xlu0 %v4338_v46, %s6325_s17  ;;  %v377_v35 = vsel %vm6359_vm9, %v6335_v19, %v3248_v17  ;;  %v2859_v2 = vpack.c.bf16 %v947_v25, %v939_v32  ;;  %s6471_s17 = smov 66   ;;  %s6474_s18 = smov 64  }
  0xab   :  { %v225_v48 = vsel %vm6403_vm7, %v3268_v45, %v6322_v41  ;;  %v224_v4 = vsel %vm6403_vm7, %v3229_v49, %v3268_v45  ;;  %v871_v41 = vrot.slane %v378_v11, 4  ;;  %v854_v11 = vrot.slane %v317_v15, 4 }
  0xac   :  { %v4550_v50 = vpop.permute.xlu1 %3281  ;;  %v4552_v12 = vpop.permute.xlu0 %3276  ;;  %v948_v47 = vsel %vm920_vm3, %v224_v4, %v839_v0  ;;  %v4556_v20 = vsel %vm920_vm3, %v225_v48, %v840_v62  ;;  %v283_v0 = vsel %vm6358_vm10, %v3273_v5, %v3274_v1  ;;  %v316_v4 = vsel %vm6362_vm8, %v6336_v53, %v3243_v42 }
  0xad   :  { %v3279_v49 = vunpack.i.h.bf16 %v4552_v12  ;;  %v3278_v29 = vunpack.i.l.bf16 %v4552_v12  ;;  %v6334_v45 = vunpack.i.l.bf16 %v4550_v50  ;;  %v2857_v59 = vpack.c.bf16 %v948_v47, %v940_v31 }
  0xae   :  { %3531 = vrot.lane.b32.xlu1 %v4338_v46, %s6323_s20  ;;  %3526 = vrot.lane.b32.xlu0 %v4338_v46, %s6327_s19  ;;  %v954_v17 = vsel %vm920_vm3, %v283_v0, %v854_v11  ;;  %v870_v32 = vrot.slane %v377_v35, 4  ;;  %s6470_s20 = smov 68   ;;  %v853_v25 = vrot.slane %v316_v4, 4  ;;  %v3254_v35 = vunpack.i.h.bf16 %v4472_v55  ;;  %s6472_s19 = smov 84  }
  0xaf   :  { %v344_v48 = vsel %vm6357_vm11, %v3278_v29, %v3279_v49  ;;  %2858 = vmatprep.subr.bf16.mxu1 %v2857_v59  ;;  %v282_v59 = vsel %vm6358_vm10, %v6334_v45, %v3273_v5  ;;  %v3259_v4 = vunpack.i.h.bf16 %v4494_v10 }
  0xb0   :  { %v4580_v47 = vpop.permute.xlu1 %3291  ;;  %v4582_v31 = vpop.permute.xlu0 %3286  ;;  %v962_v15 = vsel %vm920_vm3, %v344_v48, %v871_v41  ;;  %2860 = vmatpush1.bf16.msra.mxu1 %v2859_v2  ;;  %v953_v48 = vsel %vm920_vm3, %v282_v59, %v853_v25  ;;  %v318_v59 = vsel %vm6362_vm8, %v3244_v30, %v3254_v35 }
  0xb1   :  { %v6333_v62 = vunpack.i.l.bf16 %v4582_v31  ;;  %v2837_v42 = vpack.c.bf16 %v962_v15, %v954_v17  ;;  %v6337_v15 = vunpack.i.h.bf16 %v4580_v47  ;;  %v3293_v5 = vunpack.i.l.bf16 %v4580_v47 }
  0xb2   :  { %3541 = vrot.lane.b32.xlu1 %v4338_v46, %s6469_s27  ;;  %3536 = vrot.lane.b32.xlu0 %v4338_v46, %s6470_s20  ;;  %v3284_v17 = vunpack.i.h.bf16 %v4550_v50  ;;  %v3289_v30 = vunpack.i.h.bf16 %v4582_v31 }
  0xb3   :  { %v343_v41 = vsel %vm6357_vm11, %v6333_v62, %v3278_v29  ;;  %2838 = vmatprep.subr.bf16.mxu0 %v2837_v42  ;;  %v320_v25 = vsel %vm6362_vm8, %v3293_v5, %v6337_v15  ;;  %v319_v53 = vsel %vm6362_vm8, %v3254_v35, %v3293_v5  ;;  %vm586_vm8 = vcmask 531456  }
  0xb4   :  { %v4597_v2 = vpop.permute.xlu1 %3301  ;;  %v4599_v0 = vpop.permute.xlu0 %3296  ;;  %v961_v11 = vsel %vm920_vm3, %v343_v41, %v870_v32  ;;  %v284_v19 = vsel %vm6358_vm10, %v3274_v1, %v3284_v17  ;;  %v857_v15 = vrot.slane %v320_v25, 4  ;;  %v345_v5 = vsel %vm6357_vm11, %v3279_v49, %v3289_v30 }
  0xb5   :  { %v2839_v29 = vpack.c.bf16 %v961_v11, %v953_v48  ;;  %v6342_v41 = vunpack.i.h.bf16 %v4599_v0  ;;  %v3298_v11 = vunpack.i.l.bf16 %v4599_v0  ;;  %v855_v48 = vrot.slane %v318_v59, 4 }
  0xb6   :  { %3551 = vrot.lane.b32.xlu1 %v4338_v46, %s6471_s17  ;;  %3546 = vrot.lane.b32.xlu0 %v4338_v46, %s6472_s19  ;;  %v856_v25 = vrot.slane %v319_v53, 4 }
  0xb7   :  { %2840 = vmatpush1.bf16.msra.mxu0 %v2839_v29  ;;  %v379_v29 = vsel %vm6359_vm9, %v3249_v21, %v3259_v4  ;;  %v380_v56 = vsel %vm6359_vm9, %v3259_v4, %v3298_v11  ;;  %v381_v21 = vsel %vm6359_vm9, %v3298_v11, %v6342_v41  ;;  %v955_v4 = vsel %vm920_vm3, %v284_v19, %v855_v48 }
  0xb8   :  { %v4612_v32 = vpop.permute.xlu1 %3311  ;;  %v4614_v42 = vpop.permute.xlu0 %3306  ;;  %v872_v1 = vrot.slane %v379_v29, 4  ;;  %v3304_v11 = vunpack.i.h.bf16 %v4597_v2  ;;  %v3303_v41 = vunpack.i.l.bf16 %v4597_v2  ;;  %v873_v29 = vrot.slane %v380_v56, 4 }
  0xb9   :  { %v3309_v36 = vunpack.i.h.bf16 %v4614_v42  ;;  %v3308_v44 = vunpack.i.l.bf16 %v4614_v42  ;;  %v6364_v22 = vunpack.i.l.bf16 %v4612_v32  ;;  %vm525_vm9 = vcmask 547840  }
  0xba   :  { %3561 = vrot.lane.b32.xlu1 %v4338_v46, %s6473_s16  ;;  %3556 = vrot.lane.b32.xlu0 %v4338_v46, %s6474_s18  ;;  %v963_v61 = vsel %vm920_vm3, %v345_v5, %v872_v1  ;;  %v439_v16 = vsel %vm6379_vm12, %v3303_v41, %v3304_v11 }
  0xbb   :  { %v500_v53 = vsel %vm6377_vm13, %v3308_v44, %v3309_v36 }
  0xbc   :  { %v4634_v62 = vpop.permute.xlu1 %3321  ;;  %v4636_v45 = vpop.permute.xlu0 %3316 }
  0xbd   :  { %6475 = vst [vmem:[#allocation5_spill] sm:$0xff] %v4636_v45  ;;  %v6345_v39 = vunpack.i.h.bf16 %v4634_v62  ;;  %v3323_v59 = vunpack.i.l.bf16 %v4634_v62  ;;  %v6363_v56 = vunpack.i.l.bf16 %v4636_v45 }
  0xbe   :  { %3571 = vrot.lane.b32.xlu1 %v4338_v46, %s4049_s22  ;;  %3566 = vrot.lane.b32.xlu0 %v4338_v46, %s6476_s30 }
  0xbf   :  { %v286_v35 = vsel %vm6358_vm10, %v3323_v59, %v6345_v39  ;;  %v874_v39 = vrot.slane %v381_v21, 4 }
  0xc0   :  { %v4663_v34 = vpop.permute.xlu1 %3331  ;;  %v4665_v27 = vpop.permute.xlu0 %3326  ;;  %v4668_v46 = vsel %vm920_vm3, %v286_v35, %v857_v15  ;;  %v285_v15 = vsel %vm6358_vm10, %v3284_v17, %v3323_v59  ;;  %vm620_vm10 = vcmask 523264  }
  0xc1   :  { %6477 = vst [vmem:[#allocation6_spill] sm:$0xff] %v4668_v46  ;;  %v6351_v12 = vunpack.i.h.bf16 %v4665_v27  ;;  %v3328_v49 = vunpack.i.l.bf16 %v4665_v27  ;;  %v3334_v19 = vunpack.i.h.bf16 %v4663_v34  ;;  %v3333_v48 = vunpack.i.l.bf16 %v4663_v34 }
  0xc2   :  { %3581 = vrot.lane.b32.xlu1 %v3580_v26, %s6407_s26  ;;  %3576 = vrot.lane.b32.xlu0 %v3580_v26, %s6353_s23  ;;  %v956_v5 = vsel %vm920_vm3, %v285_v15, %v856_v25  ;;  %v499_v25 = vsel %vm6377_vm13, %v6363_v56, %v3308_v44  ;;  %v2863_v15 = vpack.c.bf16 %v963_v61, %v955_v4 }
  0xc3   :  { %v347_v21 = vsel %vm6357_vm11, %v3328_v49, %v6351_v12  ;;  %v346_v35 = vsel %vm6357_vm11, %v3289_v30, %v3328_v49  ;;  %v905_v12 = vrot.slane %v500_v53, 4  ;;  %v888_v53 = vrot.slane %v439_v16, 4 }
  0xc4   :  { %v4690_v52 = vpop.permute.xlu1 %3341  ;;  %v4692_v54 = vpop.permute.xlu0 %3336  ;;  %v964_v17 = vsel %vm920_vm3, %v346_v35, %v873_v29  ;;  %v4696_v59 = vsel %vm920_vm3, %v347_v21, %v874_v39  ;;  %v405_v39 = vsel %vm6378_vm14, %v3333_v48, %v3334_v19  ;;  %v904_v44 = vrot.slane %v499_v25, 4 }
  0xc5   :  { %6478 = vst [vmem:[#allocation7_spill] sm:$0xff] %v4690_v52  ;;  %6479 = vst [vmem:[#allocation8_spill] sm:$0xff] %v4696_v59  ;;  %v3339_v30 = vunpack.i.h.bf16 %v4692_v54  ;;  %v3338_v1 = vunpack.i.l.bf16 %v4692_v54  ;;  %v6361_v49 = vunpack.i.l.bf16 %v4690_v52  ;;  %v2861_v13 = vpack.c.bf16 %v964_v17, %v956_v5 }
  0xc6   :  { %740 = vrot.lane.b32.xlu1 %v4314_v33, %s6353_s23  ;;  %3586 = vrot.lane.b32.xlu0 %v3580_v26, %s6355_s21  ;;  %v438_v26 = vsel %vm6379_vm12, %v6364_v22, %v3303_v41  ;;  %v970_v61 = vsel %vm920_vm3, %v405_v39, %v888_v53  ;;  %vm559_vm11 = vcmask 539648   ;;  %s6622_s23 = smov 85  }
  0xc7   :  { %v466_v21 = vsel %vm6376_vm15, %v3338_v1, %v3339_v30  ;;  %2862 = vmatprep.subr.bf16.mxu1 %v2861_v13  ;;  %v404_v13 = vsel %vm6378_vm14, %v6361_v49, %v3333_v48  ;;  %v887_v4 = vrot.slane %v438_v26, 4 }
  0xc8   :  { %v4719_v35 = vpop.permute.xlu1 %3351  ;;  %v4721_v17 = vpop.permute.xlu0 %3346  ;;  %v978_v16 = vsel %vm920_vm3, %v466_v21, %v905_v12  ;;  %2864 = vmatpush1.bf16.msra.mxu1 %v2863_v15  ;;  %v4055_v15 = vmov 0   ;;  %v3314_v21 = vunpack.i.h.bf16 %v4612_v32 }
  0xc9   :  { %6480 = vst [vmem:[#allocation9_spill] sm:$0xff] %v4721_v17  ;;  %v6360_v5 = vunpack.i.l.bf16 %v4721_v17  ;;  %v2841_v41 = vpack.c.bf16 %v978_v16, %v970_v61  ;;  %3590 = vset.pattern.permute.xlu1 %v4055_v15  ;;  %3591 = vset.pattern.permute.xlu0 %v4055_v15  ;;  %v969_v16 = vsel %vm920_vm3, %v404_v13, %v887_v4  ;;  %v6365_v48 = vunpack.i.h.bf16 %v4719_v35  ;;  %v1086_v61 = vld [vmem:[%s6293_s3] sm:$0xff]  ;;  %s6625_s3 = smov 45  }
  0xca   :  { %706 = vrot.lane.b32.xlu1 %v4314_v33, %s6355_s21  ;;  %645 = vrot.lane.b32.xlu0 %v4314_v33, %s6407_s26  ;;  %v3353_v26 = vunpack.i.l.bf16 %v4719_v35  ;;  %s6620_s21 = smov 88  }
  0xcb   :  { %v465_v12 = vsel %vm6376_vm15, %v6360_v5, %v3338_v1  ;;  %2842 = vmatprep.subr.bf16.mxu0 %v2841_v41  ;;  %v3344_v41 = vunpack.i.h.bf16 %v4690_v52 }
  0xcc   :  { %v4736_v39 = vpop.permute.xlu1 %3361  ;;  %v4738_v53 = vpop.permute.xlu0 %3356  ;;  %v977_v25 = vsel %vm920_vm3, %v465_v12, %v904_v44  ;;  %v3319_v44 = vunpack.i.h.bf16 %v4636_v45  ;;  %v440_v12 = vsel %vm6379_vm12, %v3304_v11, %v3314_v21 }
  0xcd   :  { %v2843_v1 = vpack.c.bf16 %v977_v25, %v969_v16  ;;  %v6366_v15 = vunpack.i.h.bf16 %v4738_v53  ;;  %v3358_v25 = vunpack.i.l.bf16 %v4738_v53  ;;  %v3349_v16 = vunpack.i.h.bf16 %v4721_v17 }
  0xce   :  { %763 = vrot.lane.b32.xlu0 %v4164_v7, %s4054_s24  ;;  %765 = vrot.lane.b32.xlu1 %v4303_v23, %s4054_s24  ;;  %v442_v23 = vsel %vm6379_vm12, %v3353_v26, %v6365_v48  ;;  %v889_v2 = vrot.slane %v440_v12, 4  ;;  %v501_v11 = vsel %vm6377_vm13, %v3309_v36, %v3319_v44  ;;  %v406_v49 = vsel %vm6378_vm14, %v3334_v19, %v3344_v41 }
  0xcf   :  { %2844 = vmatpush1.bf16.msra.mxu0 %v2843_v1  ;;  %v891_v29 = vrot.slane %v442_v23, 4  ;;  %v502_v42 = vsel %vm6377_vm13, %v3319_v44, %v3358_v25  ;;  %v503_v36 = vsel %vm6377_vm13, %v3358_v25, %v6366_v15  ;;  %v906_v48 = vrot.slane %v501_v11, 4 }
  0xd0   :  { %v4754_v13 = vpop.permute.xlu1 %3371  ;;  %v4756_v4 = vpop.permute.xlu0 %3366  ;;  %v3363_v25 = vunpack.i.l.bf16 %v4736_v39  ;;  %v907_v17 = vrot.slane %v502_v42, 4  ;;  %vm6398_vm13 = vcmask 367616  }
  0xd1   :  { %6481 = vst [vmem:[#allocation10_spill] sm:$0xff] %v4754_v13  ;;  %v3368_v34 = vunpack.i.l.bf16 %v4756_v4 }
  0xd2   :  { %767 = vrot.lane.b32.xlu0 %v4314_v33, %s4054_s24  ;;  %1089 = vperm.xlu1 %3590, %v1086_v61   ;;  %v441_v61 = vsel %vm6379_vm12, %v3314_v21, %v3353_v26  ;;  %v467_v21 = vsel %vm6376_vm15, %v3339_v30, %v3349_v16  ;;  %v971_v26 = vsel %vm920_vm3, %v406_v49, %v889_v2  ;;  %v6486_v49 = vunpack.i.h.bf16 %v4756_v4 }
  0xd3   :  { %v890_v44 = vrot.slane %v441_v61, 4  ;;  %vm6401_vm12 = vcmask 375808  }
  0xd4   :  { %v4772_v1 = vpop.permute.xlu1 %3381  ;;  %v4774_v5 = vpop.permute.xlu0 %3376  ;;  %v622_v2 = vsel %vm620_vm10, %v3368_v34, %v6486_v49 }
  0xd5   :  { %6482 = vst [vmem:[#allocation11_spill] sm:$0xff] %v4772_v1  ;;  %6483 = vst [vmem:[#allocation12_spill] sm:$0xff] %v4774_v5  ;;  %v6368_v56 = vunpack.i.h.bf16 %v4772_v1  ;;  %v3383_v12 = vunpack.i.l.bf16 %v4772_v1  ;;  %v1004_v46 = vrot.slane %v622_v2, 4  ;;  %v6490_v45 = vunpack.i.l.bf16 %v4774_v5 }
  0xd7   :  { %v408_v19 = vsel %vm6378_vm14, %v3383_v12, %v6368_v56  ;;  %v908_v56 = vrot.slane %v503_v36, 4  ;;  %v407_v52 = vsel %vm6378_vm14, %v3344_v41, %v3383_v12  ;;  %v979_v36 = vsel %vm920_vm3, %v467_v21, %v906_v48 }
  0xd8   :  { %v4797_v15 = vpop.permute.xlu1 %3391  ;;  %v4799_v22 = vpop.permute.xlu0 %3386  ;;  %v4802_v11 = vsel %vm920_vm3, %v408_v19, %v891_v29  ;;  %v6487_v19 = vunpack.i.h.bf16 %v4736_v39  ;;  %vm647_vm14 = vcmask 392192  }
  0xd9   :  { %6484 = vst [vmem:[#allocation13_spill] sm:$0xff] %v4799_v22  ;;  %6485 = vst [vmem:[#allocation14_spill] sm:$0xff] %v4802_v11  ;;  %v6373_v54 = vunpack.i.h.bf16 %v4799_v22  ;;  %v3388_v30 = vunpack.i.l.bf16 %v4799_v22  ;;  %v3394_v61 = vunpack.i.h.bf16 %v4797_v15  ;;  %v3393_v23 = vunpack.i.l.bf16 %v4797_v15 }
  0xda   :  { %v561_v49 = vsel %vm559_vm11, %v3363_v25, %v6487_v19 }
  0xdb   :  { %v469_v29 = vsel %vm6376_vm15, %v3388_v30, %v6373_v54  ;;  %v468_v42 = vsel %vm6376_vm15, %v3349_v16, %v3388_v30  ;;  %v972_v16 = vsel %vm920_vm3, %v407_v52, %v890_v44  ;;  %v527_v30 = vsel %vm525_vm9, %v3393_v23, %v3394_v61 }
  0xdc   :  { %v4822_v1 = vpop.permute.xlu1 %3401  ;;  %v3397_v15 = vpop.permute.xlu0 %3396  ;;  %v980_v41 = vsel %vm920_vm3, %v468_v42, %v907_v17  ;;  %v4826_v12 = vsel %vm920_vm3, %v469_v29, %v908_v56  ;;  %v987_v59 = vrot.slane %v561_v49, 4  ;;  %v621_v17 = vsel %vm620_vm10, %v6490_v45, %v3368_v34 }
  0xdd   :  { %6488 = vst [vmem:[#allocation15_spill] sm:$0xff] %v4822_v1  ;;  %6489 = vst [vmem:[#allocation16_spill] sm:$0xff] %v4826_v12  ;;  %v3399_v54 = vunpack.i.h.bf16 %v3397_v15  ;;  %v3398_v22 = vunpack.i.l.bf16 %v3397_v15  ;;  %v6381_v48 = vunpack.i.l.bf16 %v4822_v1  ;;  %v2865_v21 = vpack.c.bf16 %v980_v41, %v972_v16 }
  0xde   :  { %v2867_v56 = vpack.c.bf16 %v979_v36, %v971_v26  ;;  %v6491_v29 = vunpack.i.l.bf16 %v4754_v13  ;;  %v1054_v41 = vsel %vm920_vm3, %v527_v30, %v987_v59  ;;  %v1003_v45 = vrot.slane %v621_v17, 4 }
  0xdf   :  { %v588_v2 = vsel %vm586_vm8, %v3398_v22, %v3399_v54  ;;  %2866 = vmatprep.subr.bf16.mxu1 %v2865_v21  ;;  %v526_v26 = vsel %vm525_vm9, %v6381_v48, %v3393_v23  ;;  %v3374_v59 = vunpack.i.h.bf16 %v4754_v13  ;;  %v3379_v17 = vunpack.i.h.bf16 %v4774_v5 }
  0xe0   :  { %v560_v52 = vsel %vm559_vm11, %v6491_v29, %v3363_v25  ;;  %v4840_v44 = vpop.permute.xlu1 %3411  ;;  %v4842_v42 = vpop.permute.xlu0 %3406  ;;  %v1062_v15 = vsel %vm920_vm3, %v588_v2, %v1004_v46  ;;  %2868 = vmatpush1.bf16.msra.mxu1 %v2867_v56  ;;  %v3404_v23 = vunpack.i.h.bf16 %v4822_v1  ;;  %vm681_vm15 = vcmask 384000  }
  0xe1   :  { %6492 = vst [vmem:[#allocation17_spill] sm:$0xff] %v4840_v44  ;;  %6493 = vst [vmem:[#allocation18_spill] sm:$0xff] %v4842_v42  ;;  %v6380_v49 = vunpack.i.l.bf16 %v4842_v42  ;;  %v2845_v34 = vpack.c.bf16 %v1062_v15, %v1054_v41  ;;  %v986_v36 = vrot.slane %v560_v52, 4  ;;  %v6382_v2 = vunpack.i.h.bf16 %v4840_v44 }
  0xe2   :  { %v6495_v15 = vmov %v6487_v19  ;;  %v528_v39 = vsel %vm525_vm9, %v3394_v61, %v3404_v23 }
  0xe3   :  { %v587_v25 = vsel %vm586_vm8, %v6380_v49, %v3398_v22  ;;  %2846 = vmatprep.subr.bf16.mxu0 %v2845_v34  ;;  %v1053_v30 = vsel %vm920_vm3, %v526_v26, %v986_v36  ;;  %v3413_v22 = vunpack.i.l.bf16 %v4840_v44  ;;  %v562_v41 = vsel %vm559_vm11, %v6495_v15, %v3374_v59 }
  0xe4   :  { %v4853_v16 = vpop.permute.xlu1 %3421  ;;  %v4855_v46 = vpop.permute.xlu0 %3416  ;;  %v1061_v21 = vsel %vm920_vm3, %v587_v25, %v1003_v45  ;;  %v3409_v45 = vunpack.i.h.bf16 %v4842_v42  ;;  %v6496_v34 = vunpack.i.h.bf16 %v4756_v4 }
  0xe5   :  { %6494 = vst [vmem:[#allocation19_spill] sm:$0xff] %v4855_v46  ;;  %v2847_v56 = vpack.c.bf16 %v1061_v21, %v1053_v30  ;;  %v3418_v25 = vunpack.i.l.bf16 %v4855_v46  ;;  %v564_v21 = vsel %vm559_vm11, %v3413_v22, %v6382_v2  ;;  %v988_v30 = vrot.slane %v562_v41, 4 }
  0xe6   :  { %v623_v26 = vsel %vm620_vm10, %v6496_v34, %v3379_v17  ;;  %v589_v19 = vsel %vm586_vm8, %v3399_v54, %v3409_v45  ;;  %v990_v2 = vrot.slane %v564_v21, 4  ;;  %v6498_v61 = vunpack.i.h.bf16 %v4855_v46 }
  0xe7   :  { %2848 = vmatpush1.bf16.msra.mxu0 %v2847_v56  ;;  %v563_v56 = vsel %vm559_vm11, %v3374_v59, %v3413_v22  ;;  %v1005_v34 = vrot.slane %v623_v26, 4  ;;  %v624_v36 = vsel %vm620_vm10, %v3379_v17, %v3418_v25  ;;  %v1055_v22 = vsel %vm920_vm3, %v528_v39, %v988_v30 }
  0xe8   :  { %v4864_v29 = vpop.permute.xlu1 %3431  ;;  %v4866_v52 = vpop.permute.xlu0 %3426  ;;  %v625_v59 = vsel %vm620_vm10, %v3418_v25, %v6498_v61  ;;  %v989_v41 = vrot.slane %v563_v56, 4  ;;  %v3424_v54 = vunpack.i.h.bf16 %v4853_v16  ;;  %v3423_v21 = vunpack.i.l.bf16 %v4853_v16 }
  0xe9   :  { %v3428_v26 = vunpack.i.l.bf16 %v4866_v52  ;;  %v1063_v25 = vsel %vm920_vm3, %v589_v19, %v1005_v34  ;;  %v1006_v30 = vrot.slane %v624_v36, 4  ;;  %v1007_v56 = vrot.slane %v625_v59, 4 }
  0xea   :  { %v6501_v5 = vunpack.i.h.bf16 %v4866_v52  ;;  %v683_v34 = vsel %vm681_vm15, %v3423_v21, %v3424_v54 }
  0xec   :  { %v4882_v15 = vpop.permute.xlu1 %3441  ;;  %v4884_v4 = vpop.permute.xlu0 %3436  ;;  %v744_v19 = vsel %vm6398_vm13, %v3428_v26, %v6501_v5 }
  0xed   :  { %6497 = vst [vmem:[#allocation20_spill] sm:$0xff] %v4882_v15  ;;  %v6386_v49 = vunpack.i.h.bf16 %v4882_v15  ;;  %v3443_v48 = vunpack.i.l.bf16 %v4882_v15 }
  0xef   :  { %v530_v1 = vsel %vm525_vm9, %v3443_v48, %v6386_v49  ;;  %v529_v15 = vsel %vm525_vm9, %v3404_v23, %v3443_v48  ;;  %v2871_v48 = vpack.c.bf16 %v1063_v25, %v1055_v22  ;;  %v6504_v22 = vunpack.i.l.bf16 %v4864_v29 }
  0xf0   :  { %v4901_v17 = vpop.permute.xlu1 %3451  ;;  %v4903_v11 = vpop.permute.xlu0 %3446  ;;  %v4907_v39 = vsel %vm920_vm3, %v530_v1, %v990_v2 }
  0xf1   :  { %6499 = vst [vmem:[#allocation21_spill] sm:$0xff] %v4903_v11  ;;  %6500 = vst [vmem:[#allocation22_spill] sm:$0xff] %v4907_v39  ;;  %v6392_v61 = vunpack.i.h.bf16 %v4903_v11  ;;  %v3448_v42 = vunpack.i.l.bf16 %v4903_v11  ;;  %v3453_v16 = vunpack.i.l.bf16 %v4901_v17  ;;  %v1056_v11 = vsel %vm920_vm3, %v529_v15, %v989_v41 }
  0xf2   :  { %v682_v25 = vsel %vm681_vm15, %v6504_v22, %v3423_v21 }
  0xf3   :  { %v591_v2 = vsel %vm586_vm8, %v3448_v42, %v6392_v61  ;;  %v590_v36 = vsel %vm586_vm8, %v3409_v45, %v3448_v42  ;;  %v1038_v61 = vrot.slane %v744_v19, 4  ;;  %v6503_v42 = vunpack.i.h.bf16 %v4901_v17 }
  0xf4   :  { %v4924_v59 = vpop.permute.xlu1 %3461  ;;  %v3457_v49 = vpop.permute.xlu0 %3456  ;;  %v1064_v12 = vsel %vm920_vm3, %v590_v36, %v1006_v30  ;;  %v4928_v23 = vsel %vm920_vm3, %v591_v2, %v1007_v56  ;;  %v1021_v30 = vrot.slane %v683_v34, 4  ;;  %v6505_v56 = vunpack.i.l.bf16 %v4884_v4 }
  0xf5   :  { %6502 = vst [vmem:[#allocation23_spill] sm:$0xff] %v4924_v59  ;;  %v6395_v5 = vunpack.i.l.bf16 %v4924_v59  ;;  %v3459_v1 = vunpack.i.h.bf16 %v3457_v49  ;;  %v3458_v46 = vunpack.i.l.bf16 %v3457_v49  ;;  %v2869_v13 = vpack.c.bf16 %v1064_v12, %v1056_v11 }
  0xf6   :  { %v649_v45 = vsel %vm647_vm14, %v3453_v16, %v6503_v42  ;;  %v743_v49 = vsel %vm6398_vm13, %v6505_v56, %v3428_v26  ;;  %v1020_v36 = vrot.slane %v682_v25, 4  ;;  %v3434_v42 = vunpack.i.h.bf16 %v4864_v29 }
  0xf7   :  { %v710_v15 = vsel %vm6401_vm12, %v3458_v46, %v3459_v1  ;;  %2870 = vmatprep.subr.bf16.mxu1 %v2869_v13  ;;  %v1070_v2 = vsel %vm920_vm3, %v649_v45, %v1021_v30  ;;  %v648_v21 = vsel %vm647_vm14, %v6395_v5, %v3453_v16  ;;  %v1037_v26 = vrot.slane %v743_v49, 4 }
  0xf8   :  { %v4944_v11 = vpop.permute.xlu1 %3471  ;;  %v4946_v12 = vpop.permute.xlu0 %3466  ;;  %v1078_v41 = vsel %vm920_vm3, %v710_v15, %v1038_v61  ;;  %2872 = vmatpush1.bf16.msra.mxu1 %v2871_v48  ;;  %v3439_v61 = vunpack.i.h.bf16 %v4884_v4  ;;  %v1069_v45 = vsel %vm920_vm3, %v648_v21, %v1020_v36  ;;  %v6507_v49 = vunpack.i.h.bf16 %v4866_v52 }
  0xf9   :  { %6506 = vst [vmem:[#allocation24_spill] sm:$0xff] %v4946_v12  ;;  %v6396_v19 = vunpack.i.l.bf16 %v4946_v12  ;;  %v2849_v34 = vpack.c.bf16 %v1078_v41, %v1070_v2  ;;  %v3473_v16 = vunpack.i.l.bf16 %v4944_v11  ;;  %v3469_v56 = vunpack.i.h.bf16 %v4946_v12 }
  0xfa   :  { %v745_v15 = vsel %vm6398_vm13, %v6507_v49, %v3439_v61  ;;  %v3464_v41 = vunpack.i.h.bf16 %v4924_v59 }
  0xfb   :  { %v709_v13 = vsel %vm6401_vm12, %v6396_v19, %v3458_v46  ;;  %2850 = vmatprep.subr.bf16.mxu0 %v2849_v34  ;;  %v684_v46 = vsel %vm681_vm15, %v3424_v54, %v3434_v42  ;;  %v685_v21 = vsel %vm681_vm15, %v3434_v42, %v3473_v16  ;;  %v6508_v19 = vunpack.i.h.bf16 %v4901_v17 }
  0xfc   :  { %v3477_v22 = vpop.permute.xlu1 %3476  ;;  %v4959_v48 = vpop.permute.xlu0 %734  ;;  %v1077_v30 = vsel %vm920_vm3, %v709_v13, %v1037_v26  ;;  %v711_v26 = vsel %vm6401_vm12, %v3459_v1, %v3469_v56  ;;  %v1022_v13 = vrot.slane %v684_v46, 4  ;;  %v1023_v52 = vrot.slane %v685_v21, 4 }
  0xfd   :  { %v2851_v25 = vpack.c.bf16 %v1077_v30, %v1069_v45  ;;  %v746_v36 = vsel %vm6398_vm13, %v3439_v61, %v4959_v48  ;;  %v1039_v45 = vrot.slane %v745_v15, 4  ;;  %v3479_v30 = vunpack.i.h.bf16 %v3477_v22 }
  0xfe   :  { %v650_v42 = vsel %vm647_vm14, %v6508_v19, %v3464_v41  ;;  %v3478_v44 = vunpack.i.l.bf16 %v3477_v22  ;;  %vm769_vm13 = vcmask 359424   ;;  %v6509_v17 = vunpack.i.l.bf16 %v4278_v9 }
  0xff   :  { %2852 = vmatpush1.bf16.msra.mxu0 %v2851_v25  ;;  %v1040_v25 = vrot.slane %v746_v36, 4  ;;  %v1079_v61 = vsel %vm920_vm3, %v711_v26, %v1039_v45  ;;  %v1071_v12 = vsel %vm920_vm3, %v650_v42, %v1022_v13  ;;  %v3474_v9 = vunpack.i.h.bf16 %v4944_v11 }
 0x100   :  { %v4970_v2 = vpop.permute.xlu1 %639  ;;  %v3482_v34 = vpop.permute.xlu0 %3481  ;;  %v81_v19 = vsel %vm71_vm0, %v3479_v30, %v6509_v17  ;;  %v2875_v39 = vpack.c.bf16 %v1079_v61, %v1071_v12  ;;  %v6512_v12 = vunpack.i.h.bf16 %v4378_v18 }
 0x101   :  { %v651_v54 = vsel %vm647_vm14, %v3464_v41, %v4970_v2  ;;  %v3483_v59 = vunpack.i.l.bf16 %v3482_v34  ;;  %v3484_v45 = vunpack.i.h.bf16 %v3482_v34  ;;  %v78_v34 = vsel %vm71_vm0, %v3478_v44, %v3479_v30 }
 0x102   :  { %v1072_v46 = vsel %vm920_vm3, %v651_v54, %v1023_v52  ;;  %v6511_v54 = vunpack.i.h.bf16 %v4321_v37  ;;  %v791_v30 = vrot.slane %v78_v34, 4  ;;  %v5033_v34 = vld [vmem:[%s6292_s2] sm:$0xff]  ;;  %s6621_s2 = smov 87  }
 0x104   :  { %v3487_v49 = vpop.permute.xlu1 %3486  ;;  %v4978_v5 = vpop.permute.xlu0 %700  ;;  %v138_v52 = vsel %vm6406_vm1, %v6511_v54, %v3483_v59 }
 0x105   :  { %v712_v1 = vsel %vm6401_vm12, %v3469_v56, %v4978_v5  ;;  %v3488_v21 = vunpack.i.l.bf16 %v3487_v49  ;;  %v6510_v56 = vunpack.i.h.bf16 %v4323_v38  ;;  %v807_v37 = vrot.slane %v138_v52, 4 }
 0x106   :  { %v1080_v15 = vsel %vm920_vm3, %v712_v1, %v1040_v25  ;;  %v792_v25 = vrot.slane %v81_v19, 4  ;;  %vm1092_vm12 = vcmask 818176  }
 0x107   :  { %v2873_v36 = vpack.c.bf16 %v1080_v15, %v1072_v46  ;;  %v77_v26 = vsel %vm71_vm0, %v6510_v56, %v3478_v44  ;;  %v104_v38 = vsel %vm98_vm2, %v6512_v12, %v3488_v21  ;;  %v6513_v46 = vunpack.i.l.bf16 %v4285_v14 }
 0x108   :  { %v4992_v22 = vpop.permute.xlu1 %757  ;;  %v756_v41 = vpop.permute.xlu0 %755  ;;  %v790_v42 = vrot.slane %v77_v26, 4  ;;  %v934_v18 = vsel %vm920_vm3, %v104_v38, %v807_v37  ;;  %v5016_v44 = vsel %vm681_vm15, %v3473_v16, %v3474_v9  ;;  %v6514_v16 = vunpack.i.h.bf16 %v4459_v28 }
 0x109   :  { %2874 = vmatprep.subr.bf16.mxu1 %v2873_v36  ;;  %v771_v13 = vsel %vm769_vm13, %v756_v41, %v4992_v22  ;;  %v142_v15 = vsel %vm6406_vm1, %v3484_v45, %v6513_v46  ;;  %v139_v36 = vsel %vm6406_vm1, %v3483_v59, %v3484_v45  ;;  %v6515_v37 = vunpack.i.l.bf16 %v4305_v24 }
 0x10a   :  { %2813 = vmatprep.subr.msk.mxu0 %vm920_vm3, %v771_v13  ;;  %2876 = vmatpush1.bf16.msra.mxu1 %v2875_v39  ;;  %v3489_v39 = vunpack.i.h.bf16 %v3487_v49  ;;  %v809_v54 = vrot.slane %v142_v15, 4  ;;  %v808_v14 = vrot.slane %v139_v36, 4  ;;  %v926_v59 = vsel %vm920_vm3, %v4164_v7, %v790_v42 }
 0x10b   :  { %v5024_v49 = vsel %vm920_vm3, %v4314_v33, %v792_v25  ;;  %v2877_v38 = vpack.c.bf16 %v934_v18, %v926_v59  ;;  %v6516_v33 = vunpack.i.l.bf16 %v4356_v57  ;;  %v6518_v24 = vunpack.i.l.bf16 %v4358_v58 }
 0x10c   :  { %v3497_v1 = vpop.permute.xlu1 %3496  ;;  %v3492_v61 = vpop.permute.xlu0 %3491  ;;  %v105_v45 = vsel %vm98_vm2, %v3488_v21, %v3489_v39  ;;  %v115_v7 = vsel %vm98_vm2, %v3489_v39, %v6515_v37  ;;  %v6520_v59 = vunpack.i.h.bf16 %v4492_v3 }
 0x10d   :  { %v3498_v17 = vunpack.i.l.bf16 %v3497_v1  ;;  %v3499_v56 = vunpack.i.h.bf16 %v3497_v1  ;;  %v3494_v19 = vunpack.i.h.bf16 %v3492_v61  ;;  %v3493_v26 = vunpack.i.l.bf16 %v3492_v61 }
 0x10e   :  { %v6517_v1 = vunpack.i.h.bf16 %v4440_v63  ;;  %v936_v63 = vsel %vm920_vm3, %v115_v7, %v809_v54  ;;  %v6521_v54 = vmov 0.0  }
 0x10f   :  { %v260_v12 = vsel %vm6402_vm4, %v6514_v16, %v3498_v17  ;;  %v261_v42 = vsel %vm6402_vm4, %v3498_v17, %v3499_v56  ;;  %v264_v21 = vsel %vm6402_vm4, %v3499_v56, %v6516_v33  ;;  %v200_v46 = vsel %vm6404_vm5, %v3493_v26, %v3494_v19 }
 0x110   :  { %v3502_v52 = vpop.permute.xlu1 %3501  ;;  %v5018_v13 = vpop.permute.xlu0 %753  ;;  %v199_v61 = vsel %vm6404_vm5, %v6517_v1, %v3493_v26  ;;  %v203_v15 = vsel %vm6404_vm5, %v3494_v19, %v6518_v24  ;;  %v841_v57 = vrot.slane %v260_v12, 4  ;;  %v935_v56 = vsel %vm920_vm3, %v105_v45, %v808_v14 }
 0x111   :  { %v3503_v25 = vunpack.i.l.bf16 %v3502_v52  ;;  %v770_v28 = vsel %vm769_vm13, %v5018_v13, %v756_v41  ;;  %v3504_v36 = vunpack.i.h.bf16 %v3502_v52  ;;  %v4005_v41 = vld [vmem:[%s6290_s0 + $0x18] sm:$0xff]  ;;  %v842_v18 = vrot.slane %v261_v42, 4  ;;  %s6623_s0 = smov 46  }
 0x112   :  { %2814 = vmatpush1.msk.msra.mxu0 %vm920_vm3, %v770_v28  ;;  %v927_v58 = vsel %vm920_vm3, %v4005_v41, %v791_v30  ;;  %v6519_v52 = vpack.c.bf16 %v4411_v43, %v4418_v51  ;;  %v843_v12 = vrot.slane %v264_v21, 4  ;;  %v825_v37 = vrot.slane %v200_v46, 4 }
 0x113   :  { %2878 = vmatprep.subr.bf16.mxu0 %v2877_v38  ;;  %2815 = vmatmul.mubr.msk.f32.vlgmr.msra.gmra.mrb[0].mxu0 %vm1092_vm12, %v5033_v34  ;;  %v165_v16 = vsel %vm6405_vm6, %v6520_v59, %v3503_v25  ;;  %v824_v38 = vrot.slane %v199_v61, 4  ;;  %v826_v7 = vrot.slane %v203_v15, 4  ;;  %v166_v30 = vsel %vm6405_vm6, %v3503_v25, %v3504_v36 }
 0x114   :  { %v760_v39 = vpop.permute.xlu1 %759  ;;  %v3507_v17 = vpop.permute.xlu0 %3506  ;;  %2880 = vmatpush1.bf16.msra.mxu0 %v6519_v52  ;;  %1319 = vmatprep.mubr.f32.mxu0 %v6521_v54  ;;  %v6522_v14 = vunpack.i.h.bf16 %v4523_v60  ;;  %v6523_v42 = vunpack.i.l.bf16 %v4405_v40  ;;  %v6524_v51 = vunpack.i.l.bf16 %v4442_v8  ;;  %v2901_v15 = vpack.c.bf16 %v936_v63, %v5024_v49 }
 0x115   :  { %v3509_v19 = vunpack.i.h.bf16 %v3507_v17  ;;  %v3508_v26 = vunpack.i.l.bf16 %v3507_v17  ;;  %v942_v1 = vsel %vm920_vm3, %v165_v16, %v824_v38  ;;  %v772_v8 = vsel %vm769_vm13, %v4992_v22, %v760_v39 }
 0x116   :  { %v176_v43 = vsel %vm6405_vm6, %v3504_v36, %v6523_v42  ;;  %v2903_v36 = vpack.c.bf16 %v935_v56, %v927_v58  ;;  %vm6526_vm4 = vcmask 850944   ;;  %v6528_v22 = vunpack.i.l.bf16 %v4472_v55 }
 0x117   :  { %v226_v45 = vsel %vm6403_vm7, %v6522_v14, %v3508_v26  ;;  %v237_v3 = vsel %vm6403_vm7, %v3509_v19, %v6524_v51  ;;  %v227_v33 = vsel %vm6403_vm7, %v3508_v26, %v3509_v19  ;;  %v944_v17 = vsel %vm920_vm3, %v176_v43, %v826_v7  ;;  %vm6527_vm7 = vmmov %vm6526_vm4 }
 0x118   :  { %v3512_v21 = vpop.permute.xlu1 %3511  ;;  %v5078_v28 = vpop.permute.xlu0 %761  ;;  %v950_v25 = vsel %vm920_vm3, %v226_v45, %v841_v57  ;;  %v952_v60 = vsel %vm920_vm3, %v237_v3, %v843_v12  ;;  %v6525_v57 = vunpack.i.h.bf16 %v4580_v47  ;;  %v943_v19 = vsel %vm920_vm3, %v166_v30, %v825_v37  ;;  %vm6529_vm5 = vmmov %vm6526_vm4 }
 0x119   :  { %v3514_v61 = vunpack.i.h.bf16 %v3512_v21  ;;  %v3513_v46 = vunpack.i.l.bf16 %v3512_v21  ;;  %v773_v40 = vsel %vm769_vm13, %v760_v39, %v5078_v28  ;;  %v2881_v24 = vpack.c.bf16 %v950_v25, %v942_v1 }
 0x11a   :  { %2816 = vmatprep.subr.msk.mxu1 %vm920_vm3, %v773_v40  ;;  %v951_v26 = vsel %vm920_vm3, %v227_v33, %v842_v18  ;;  %v6530_v47 = vpack.c.bf16 %v4556_v20, %v4526_v6  ;;  %v2905_v58 = vpack.c.bf16 %v952_v60, %v944_v17  ;;  %v1024_v18 = vrot.slane %v5016_v44, 4 }
 0x11b   :  { %v321_v41 = vsel %vm6526_vm4, %v6525_v57, %v3513_v46  ;;  %2817 = vmatpush1.msk.msra.mxu1 %vm920_vm3, %v772_v8  ;;  %2882 = vmatprep.subr.bf16.mxu0 %v2881_v24  ;;  %v322_v52 = vsel %vm6527_vm7, %v3513_v46, %v3514_v61  ;;  %v325_v49 = vsel %vm6529_vm5, %v3514_v61, %v6528_v22  ;;  %v6531_v6 = vunpack.i.h.bf16 %v4599_v0 }
 0x11c   :  { %v3522_v39 = vpop.permute.xlu1 %3521  ;;  %v3517_v63 = vpop.permute.xlu0 %3516  ;;  %2884 = vmatpush1.bf16.msra.mxu0 %v6530_v47  ;;  %2902 = vmatprep.subr.bf16.mxu1 %v2901_v15  ;;  %v858_v55 = vrot.slane %v321_v41, 4  ;;  %v2907_v38 = vpack.c.bf16 %v951_v26, %v943_v19  ;;  %v859_v37 = vrot.slane %v322_v52, 4  ;;  %vm6532_vm4 = vcmask 711680  }
 0x11d   :  { %v3524_v56 = vunpack.i.h.bf16 %v3522_v39  ;;  %v3523_v59 = vunpack.i.l.bf16 %v3522_v39  ;;  %v3519_v16 = vunpack.i.h.bf16 %v3517_v63  ;;  %v3518_v12 = vunpack.i.l.bf16 %v3517_v63  ;;  %2818 = vmatmul.mubr.msk.f32.vlgmr.msra.gmra.mrb[0].mxu1 %vm1092_vm12, %v5033_v34  ;;  %vm6533_vm5 = vmmov %vm6532_vm4 }
 0x11e   :  { %2904 = vmatpush1.bf16.msra.mxu1 %v2903_v36  ;;  %1390 = vmatprep.mubr.f32.mxu1 %v6521_v54  ;;  %v6534_v30 = vunpack.i.l.bf16 %v4494_v10  ;;  %vm6535_vm7 = vmmov %vm6532_vm4  ;;  %v860_v45 = vrot.slane %v325_v49, 4  ;;  %vm6536_vm6 = vcmask 859136   ;;  %v6537_v54 = vunpack.i.h.bf16 %v4634_v62 }
 0x11f   :  { %v382_v20 = vsel %vm6532_vm4, %v6531_v6, %v3518_v12  ;;  %v383_v7 = vsel %vm6533_vm5, %v3518_v12, %v3519_v16  ;;  %2906 = vmatprep.subr.bf16.mxu1 %v2905_v58  ;;  %v288_v42 = vsel %vm6536_vm6, %v3523_v59, %v3524_v56  ;;  %vm6538_vm1 = vmmov %vm6536_vm6  ;;  %v6539_v46 = vunpack.i.l.bf16 %v4550_v50 }
 0x120   :  { %v386_v14 = vsel %vm6535_vm7, %v3519_v16, %v6534_v30  ;;  %v875_v43 = vrot.slane %v382_v20, 4  ;;  %v3532_v51 = vpop.permute.xlu1 %3531  ;;  %v3527_v3 = vpop.permute.xlu0 %3526  ;;  %v287_v33 = vsel %vm6538_vm1, %v6537_v54, %v3523_v59  ;;  %v876_v60 = vrot.slane %v383_v7, 4  ;;  %vm6540_vm4 = vmmov %vm6538_vm1 }
 0x121   :  { %v3534_v0 = vunpack.i.h.bf16 %v3532_v51  ;;  %v3533_v21 = vunpack.i.l.bf16 %v3532_v51  ;;  %v3529_v1 = vunpack.i.h.bf16 %v3527_v3  ;;  %v3528_v25 = vunpack.i.l.bf16 %v3527_v3 }
 0x122   :  { %v877_v61 = vrot.slane %v386_v14, 4  ;;  %2908 = vmatpush1.bf16.msra.mxu1 %v2907_v38  ;;  %v958_v10 = vsel %vm920_vm3, %v287_v33, %v858_v55  ;;  %v298_v40 = vsel %vm6540_vm4, %v3524_v56, %v6539_v46  ;;  %v6541_v24 = vunpack.i.h.bf16 %v4719_v35 }
 0x123   :  { %vm6542_vm6 = vcmask 695296   ;;  %v6544_v15 = vunpack.i.l.bf16 %v4612_v32  ;;  %v959_v17 = vsel %vm920_vm3, %v288_v42, %v859_v37  ;;  %vm6546_vm7 = vcmask 719872   ;;  %v6555_v37 = vld [vmem:[#allocation5_spill] sm:$0xff] }
 0x124   :  { %v443_v8 = vsel %vm6542_vm6, %v6541_v24, %v3533_v21  ;;  %vm6543_vm5 = vmmov %vm6542_vm6  ;;  %v349_v19 = vsel %vm6546_vm7, %v3528_v25, %v3529_v1  ;;  %v3542_v50 = vpop.permute.xlu1 %3541  ;;  %v3537_v26 = vpop.permute.xlu0 %3536  ;;  %v6547_v52 = vunpack.i.h.bf16 %v4665_v27  ;;  %v6549_v58 = vunpack.i.l.bf16 %v4582_v31 }
 0x125   :  { %v444_v62 = vsel %vm6543_vm5, %v3533_v21, %v3534_v0  ;;  %vm6545_vm1 = vmmov %vm6543_vm5  ;;  %v892_v57 = vrot.slane %v443_v8, 4  ;;  %v3544_v22 = vunpack.i.h.bf16 %v3542_v50  ;;  %v3543_v49 = vunpack.i.l.bf16 %v3542_v50 }
 0x126   :  { %v5129_v36 = vsel %vm6545_vm1, %v3534_v0, %v6544_v15  ;;  %v893_v41 = vrot.slane %v444_v62, 4  ;;  %vm6548_vm4 = vmmov %vm6546_vm7  ;;  %v3539_v39 = vunpack.i.h.bf16 %v3537_v26  ;;  %v3538_v63 = vunpack.i.l.bf16 %v3537_v26  ;;  %v6558_v0 = vld [vmem:[#allocation11_spill] sm:$0xff]  ;;  %v6565_v62 = vld [vmem:[#allocation8_spill] sm:$0xff] }
 0x127   :  { %v348_v35 = vsel %vm6548_vm4, %v6547_v52, %v3528_v25  ;;  %v894_v32 = vrot.slane %v5129_v36, 4  ;;  %vm6550_vm6 = vmmov %vm6548_vm4  ;;  %v960_v59 = vsel %vm920_vm3, %v298_v40, %v860_v45  ;;  %vm6551_vm5 = vcmask 703488   ;;  %v6566_v15 = vld [vmem:[#allocation6_spill] sm:$0xff] }
 0x128   :  { %v966_v47 = vsel %vm920_vm3, %v348_v35, %v875_v43  ;;  %v359_v56 = vsel %vm6550_vm6, %v3529_v1, %v6549_v58  ;;  %v410_v16 = vsel %vm6551_vm5, %v3543_v49, %v3544_v22  ;;  %v6552_v27 = vunpack.i.h.bf16 %v4738_v53  ;;  %v3552_v14 = vpop.permute.xlu1 %3551  ;;  %v3547_v42 = vpop.permute.xlu0 %3546  ;;  %vm6560_vm6 = vmmov %vm6551_vm5 }
 0x129   :  { %vm6553_vm1 = vcmask 556032   ;;  %v967_v38 = vsel %vm920_vm3, %v349_v19, %v876_v60  ;;  %v6556_v6 = vunpack.i.l.bf16 %v6555_v37  ;;  %v2885_v30 = vpack.c.bf16 %v966_v47, %v958_v10  ;;  %v6561_v60 = vld [vmem:[#allocation17_spill] sm:$0xff] }
 0x12a   :  { %v504_v12 = vsel %vm6553_vm1, %v6552_v27, %v3538_v63  ;;  %vm6554_vm7 = vmmov %vm6553_vm1  ;;  %v968_v45 = vsel %vm920_vm3, %v359_v56, %v877_v61  ;;  %v3554_v43 = vunpack.i.h.bf16 %v3552_v14  ;;  %v3553_v51 = vunpack.i.l.bf16 %v3552_v14  ;;  %v6563_v61 = vld [vmem:[#allocation10_spill] sm:$0xff]  ;;  %v6569_v56 = vld [vmem:[#allocation13_spill] sm:$0xff] }
 0x12b   :  { %v505_v55 = vsel %vm6554_vm7, %v3538_v63, %v3539_v39  ;;  %vm6557_vm4 = vmmov %vm6553_vm1  ;;  %v909_v7 = vrot.slane %v504_v12, 4  ;;  %v3549_v53 = vunpack.i.h.bf16 %v3547_v42  ;;  %2886 = vmatprep.subr.bf16.mxu0 %v2885_v30  ;;  %v2909_v3 = vpack.c.bf16 %v968_v45, %v960_v59  ;;  %v6572_v12 = vld [vmem:[#allocation7_spill] sm:$0xff]  ;;  %v6575_v37 = vld [vmem:[#allocation9_spill] sm:$0xff] }
 0x12c   :  { %v508_v20 = vsel %vm6557_vm4, %v3539_v39, %v6556_v6  ;;  %v910_v31 = vrot.slane %v505_v55, 4  ;;  %v3548_v54 = vunpack.i.l.bf16 %v3547_v42  ;;  %v2911_v33 = vpack.c.bf16 %v967_v38, %v959_v17  ;;  %v3562_v26 = vpop.permute.xlu1 %3561  ;;  %v3557_v52 = vpop.permute.xlu0 %3556  ;;  %vm6574_vm7 = vmmov %vm6560_vm6  ;;  %v6578_v30 = vld [vmem:[#allocation19_spill] sm:$0xff] }
 0x12d   :  { %v6559_v21 = vunpack.i.h.bf16 %v6558_v0  ;;  %v911_v25 = vrot.slane %v508_v20, 4  ;;  %v6562_v46 = vunpack.i.h.bf16 %v6561_v60  ;;  %v5161_v40 = vsel %vm559_vm11, %v3553_v51, %v3554_v43  ;;  %2910 = vmatprep.subr.bf16.mxu1 %v2909_v3 }
 0x12e   :  { %v6564_v24 = vunpack.i.l.bf16 %v6563_v61  ;;  %v6567_v36 = vpack.c.bf16 %v6565_v62, %v6566_v15  ;;  %v992_v19 = vrot.slane %v5161_v40, 4  ;;  %2912 = vmatpush1.bf16.msra.mxu1 %v2911_v33  ;;  %v3563_v39 = vunpack.i.l.bf16 %v3562_v26 }
 0x12f   :  { %v409_v1 = vsel %vm6560_vm6, %v6559_v21, %v3543_v49  ;;  %v5158_v10 = vsel %vm559_vm11, %v6562_v46, %v3553_v51  ;;  %v3564_v49 = vunpack.i.h.bf16 %v3562_v26  ;;  %v3559_v63 = vunpack.i.h.bf16 %v3557_v52  ;;  %v6580_v51 = vld [vmem:[#allocation12_spill] sm:$0xff] }
 0x130   :  { %v5166_v8 = vsel %vm559_vm11, %v3554_v43, %v6564_v24  ;;  %2888 = vmatpush1.bf16.msra.mxu0 %v6567_v36  ;;  %v991_v17 = vrot.slane %v5158_v10, 4  ;;  %v974_v35 = vsel %vm920_vm3, %v409_v1, %v892_v57  ;;  %v3558_v47 = vunpack.i.l.bf16 %v3557_v52  ;;  %v3572_v0 = vpop.permute.xlu1 %3571  ;;  %v3567_v21 = vpop.permute.xlu0 %3566  ;;  %v6583_v36 = vld [vmem:[#allocation20_spill] sm:$0xff] }
 0x131   :  { %v993_v50 = vrot.slane %v5166_v8, 4  ;;  %vm6568_vm5 = vcmask 687104   ;;  %v6570_v59 = vunpack.i.h.bf16 %v6569_v56  ;;  %v6573_v55 = vunpack.i.l.bf16 %v6572_v12 }
 0x132   :  { %v471_v58 = vsel %vm6568_vm5, %v3548_v54, %v3549_v53  ;;  %vm6571_vm1 = vmmov %vm6568_vm5  ;;  %v6576_v6 = vunpack.i.l.bf16 %v6575_v37  ;;  %v5186_v57 = vsel %vm525_vm9, %v3563_v39, %v3564_v49  ;;  %v6579_v14 = vunpack.i.h.bf16 %v6578_v30 }
 0x133   :  { %v470_v27 = vsel %vm6571_vm1, %v6570_v59, %v3548_v54  ;;  %v420_v38 = vsel %vm6574_vm7, %v3544_v22, %v6573_v55  ;;  %vm6577_vm4 = vmmov %vm6571_vm1  ;;  %v5192_v45 = vsel %vm620_vm10, %v3558_v47, %v3559_v63  ;;  %v975_v43 = vsel %vm920_vm3, %v410_v16, %v893_v41 }
 0x134   :  { %v481_v20 = vsel %vm6577_vm4, %v3549_v53, %v6576_v6  ;;  %v626_v42 = vsel %vm620_vm10, %v6579_v14, %v3558_v47  ;;  %v6581_v3 = vunpack.i.l.bf16 %v6580_v51  ;;  %v1009_v33 = vrot.slane %v5192_v45, 4  ;;  %v3582_v56 = vpop.permute.xlu1 %3581  ;;  %v3577_v59 = vpop.permute.xlu0 %3576  ;;  %v6590_v6 = vld [vmem:[#allocation21_spill] sm:$0xff]  ;;  %v6592_v51 = vld [vmem:[#allocation18_spill] sm:$0xff] }
 0x135   :  { %v1008_v54 = vrot.slane %v626_v42, 4  ;;  %v982_v53 = vsel %vm920_vm3, %v470_v27, %v909_v7  ;;  %v976_v60 = vsel %vm920_vm3, %v420_v38, %v894_v32  ;;  %v984_v46 = vsel %vm920_vm3, %v481_v20, %v911_v25 }
 0x136   :  { %v630_v22 = vsel %vm620_vm10, %v3559_v63, %v6581_v3  ;;  %v2889_v1 = vpack.c.bf16 %v982_v53, %v974_v35  ;;  %v3574_v10 = vunpack.i.h.bf16 %v3572_v0  ;;  %v2913_v61 = vpack.c.bf16 %v984_v46, %v976_v60  ;;  %v6585_v63 = vld [vmem:[#allocation16_spill] sm:$0xff] }
 0x137   :  { %v3573_v24 = vunpack.i.l.bf16 %v3572_v0  ;;  %v3569_v41 = vunpack.i.h.bf16 %v3567_v21  ;;  %v3568_v16 = vunpack.i.l.bf16 %v3567_v21  ;;  %v1010_v8 = vrot.slane %v630_v22, 4 }
 0x138   :  { %2890 = vmatprep.subr.bf16.mxu0 %v2889_v1  ;;  %v6582_v62 = vunpack.i.l.bf16 %v4864_v29  ;;  %v983_v7 = vsel %vm920_vm3, %v471_v58, %v910_v31  ;;  %v6584_v26 = vunpack.i.h.bf16 %v6583_v36  ;;  %2914 = vmatprep.subr.bf16.mxu1 %v2913_v61  ;;  %v6586_v29 = vld [vmem:[#allocation14_spill] sm:$0xff]  ;;  %v6588_v31 = vld [vmem:[#allocation15_spill] sm:$0xff]  ;;  %v3579_v38 = vunpack.i.h.bf16 %v3577_v59  ;;  %v741_v21 = vpop.permute.xlu1 %740  ;;  %v3587_v1 = vpop.permute.xlu0 %3586 }
 0x139   :  { %v687_v25 = vsel %vm681_vm15, %v3474_v9, %v3573_v24  ;;  %v688_v52 = vsel %vm681_vm15, %v3573_v24, %v3574_v10  ;;  %v6587_v47 = vpack.c.bf16 %v6585_v63, %v6586_v29  ;;  %v6589_v58 = vunpack.i.l.bf16 %v6588_v31  ;;  %v6603_v63 = vld [vmem:[#allocation24_spill] sm:$0xff] }
 0x13a   :  { %v5205_v15 = vsel %vm681_vm15, %v3574_v10, %v6582_v62  ;;  %v531_v32 = vsel %vm525_vm9, %v6584_v26, %v3563_v39  ;;  %v1025_v39 = vrot.slane %v687_v25, 4  ;;  %v1026_v12 = vrot.slane %v688_v52, 4  ;;  %v6599_v62 = vld [vmem:[#allocation22_spill] sm:$0xff] }
 0x13b   :  { %v1027_v35 = vrot.slane %v5205_v15, 4  ;;  %2892 = vmatpush1.bf16.msra.mxu0 %v6587_v47  ;;  %v542_v27 = vsel %vm525_vm9, %v3564_v49, %v6589_v58  ;;  %v593_v11 = vsel %vm586_vm8, %v3568_v16, %v3569_v41  ;;  %v2915_v55 = vpack.c.bf16 %v983_v7, %v975_v43  ;;  %v6606_v47 = vld [vmem:[#allocation23_spill] sm:$0xff] }
 0x13c   :  { %v3583_v9 = vunpack.i.l.bf16 %v3582_v56  ;;  %v3578_v37 = vunpack.i.l.bf16 %v3577_v59  ;;  %v6591_v20 = vunpack.i.h.bf16 %v6590_v6  ;;  %v3584_v14 = vunpack.i.h.bf16 %v3582_v56 }
 0x13d   :  { %2916 = vmatpush1.bf16.msra.mxu1 %v2915_v55  ;;  %v1058_v42 = vsel %vm920_vm3, %v531_v32, %v991_v17  ;;  %v6593_v49 = vunpack.i.l.bf16 %v6592_v51  ;;  %vm6594_vm6 = vcmask 367616   ;;  %v1060_v0 = vsel %vm920_vm3, %v542_v27, %v993_v50  ;;  %v646_v32 = vpop.permute.xlu0 %645 }
 0x13e   :  { %v592_v30 = vsel %vm586_vm8, %v6591_v20, %v3568_v16  ;;  %v747_v43 = vsel %vm6594_vm6, %v4959_v48, %v3578_v37  ;;  %vm6595_vm5 = vmmov %vm6594_vm6  ;;  %v652_v60 = vsel %vm647_vm14, %v4970_v2, %v3583_v9  ;;  %v6597_v48 = vunpack.i.l.bf16 %v4884_v4  ;;  %v707_v4 = vpop.permute.xlu1 %706 }
 0x13f   :  { %v1066_v45 = vsel %vm920_vm3, %v592_v30, %v1008_v54  ;;  %v603_v3 = vsel %vm586_vm8, %v3569_v41, %v6593_v49  ;;  %v748_v22 = vsel %vm6595_vm5, %v3578_v37, %v3579_v38  ;;  %v1041_v17 = vrot.slane %v747_v43, 4  ;;  %vm6596_vm1 = vmmov %vm6595_vm5 }
 0x140   :  { %v2893_v53 = vpack.c.bf16 %v1066_v45, %v1058_v42  ;;  %v1068_v54 = vsel %vm920_vm3, %v603_v3, %v1010_v8  ;;  %v749_v46 = vsel %vm6596_vm1, %v3579_v38, %v741_v21  ;;  %v1042_v10 = vrot.slane %v748_v22, 4  ;;  %vm6598_vm7 = vmmov %vm6596_vm1 }
 0x141   :  { %v2917_v61 = vpack.c.bf16 %v1068_v54, %v1060_v0  ;;  %v752_v24 = vsel %vm6598_vm7, %v741_v21, %v6597_v48  ;;  %v3589_v41 = vunpack.i.h.bf16 %v3587_v1  ;;  %v1043_v16 = vrot.slane %v749_v46, 4  ;;  %v764_v55 = vpop.permute.xlu0 %763 }
 0x142   :  { %2894 = vmatprep.subr.bf16.mxu0 %v2893_v53  ;;  %v3588_v50 = vunpack.i.l.bf16 %v3587_v1  ;;  %v6600_v7 = vpack.c.bf16 %v4928_v23, %v6599_v62  ;;  %v1059_v2 = vsel %vm920_vm3, %v5186_v57, %v992_v19  ;;  %v1067_v8 = vsel %vm920_vm3, %v593_v11, %v1009_v33  ;;  %v766_v38 = vpop.permute.xlu1 %765 }
 0x143   :  { %2918 = vmatprep.subr.bf16.mxu1 %v2917_v61  ;;  %v1044_v36 = vrot.slane %v752_v24, 4  ;;  %v2919_v26 = vpack.c.bf16 %v1067_v8, %v1059_v2  ;;  %v653_v25 = vsel %vm647_vm14, %v3583_v9, %v3584_v14  ;;  %v1073_v52 = vsel %vm920_vm3, %v652_v60, %v1024_v18 }
 0x144   :  { %2896 = vmatpush1.bf16.msra.mxu0 %v6600_v7  ;;  %vm6601_vm4 = vcmask 375808   ;;  %v6604_v19 = vunpack.i.l.bf16 %v6603_v63  ;;  %v654_v33 = vsel %vm647_vm14, %v3584_v14, %v646_v32  ;;  %v6607_v56 = vunpack.i.l.bf16 %v6606_v47 }
 0x145   :  { %v713_v23 = vsel %vm6601_vm4, %v4978_v5, %v3588_v50  ;;  %vm6602_vm6 = vmmov %vm6601_vm4  ;;  %2920 = vmatpush1.bf16.msra.mxu1 %v2919_v26  ;;  %v1075_v18 = vsel %vm920_vm3, %v654_v33, %v1026_v12  ;;  %v1074_v31 = vsel %vm920_vm3, %v653_v25, %v1025_v39  ;;  %v775_v20 = vsel %vm769_vm13, %v764_v55, %v766_v38  ;;  %v768_v39 = vpop.permute.xlu0 %767 }
 0x146   :  { %v715_v40 = vsel %vm6602_vm6, %v3589_v41, %v707_v4  ;;  %vm6605_vm5 = vmmov %vm6601_vm4  ;;  %v664_v44 = vsel %vm647_vm14, %v646_v32, %v6607_v56  ;;  %v1081_v27 = vsel %vm920_vm3, %v713_v23, %v1041_v17  ;;  %v776_v30 = vsel %vm769_vm13, %v766_v38, %v768_v39 }
 0x147   :  { %v725_v57 = vsel %vm6605_vm5, %v707_v4, %v6604_v19  ;;  %v1083_v29 = vsel %vm920_vm3, %v715_v40, %v1043_v16  ;;  %vm6608_vm1 = vmmov %vm6601_vm4  ;;  %v2899_v9 = vpack.c.bf16 %v1081_v27, %v1073_v52  ;;  %v1076_v37 = vsel %vm920_vm3, %v664_v44, %v1027_v35 }
 0x148   :  { %v714_v59 = vsel %vm6608_vm1, %v3588_v50, %v3589_v41  ;;  %v2923_v5 = vpack.c.bf16 %v1083_v29, %v1075_v18  ;;  %v1084_v6 = vsel %vm920_vm3, %v725_v57, %v1044_v36  ;;  %v779_v14 = vsel %vm769_vm13, %v768_v39, %v5018_v13 }
 0x149   :  { %v1082_v58 = vsel %vm920_vm3, %v714_v59, %v1042_v10  ;;  %v2921_v12 = vpack.c.bf16 %v1084_v6, %v1076_v37  ;;  %v774_v15 = vsel %vm769_vm13, %v5078_v28, %v764_v55  ;;  %v1398_v13 = vlaneseq  ;;  %v42_v28 = vld [vmem:[%s6291_s1] sm:$0xff]  ;;  %s6619_s1 = smov 104  }
 0x14a   :  { %v2897_v11 = vpack.c.bf16 %v1082_v58, %v1074_v31 }
 0x14b   :  { %2922 = vmatprep.subr.bf16.mxu1 %v2921_v12  ;;  %v1399_v49 = vshrl.u32 %v1398_v13, 7 }
 0x14c   :  { %2898 = vmatprep.subr.bf16.mxu0 %v2897_v11  ;;  %2924 = vmatpush1.bf16.msra.mxu1 %v2923_v5 }
 0x14d   :  { %2900 = vmatpush1.bf16.msra.mxu0 %v2899_v9  ;;  %2822 = vmatprep.subr.msk.mxu1 %vm920_vm3, %v779_v14  ;;  %v1400_v3 = vsub.s32 0, %v1399_v49  ;;  %v1404_v43 = vsub.s32 1, %v1399_v49  ;;  %v1408_v1 = vsub.s32 2, %v1399_v49  ;;  %v1412_v60 = vsub.s32 3, %v1399_v49 }
 0x14e   :  { %2819 = vmatprep.subr.msk.mxu0 %vm920_vm3, %v775_v20  ;;  %v1416_v62 = vsub.s32 4, %v1399_v49  ;;  %v1420_v7 = vsub.s32 5, %v1399_v49  ;;  %v1424_v2 = vsub.s32 6, %v1399_v49  ;;  %v1428_v25 = vsub.s32 7, %v1399_v49 }
 0x14f   :  { %v5291_v53 = vrot.slane %v42_v28, %v1400_v3  ;;  %v5305_v10 = vrot.slane %v42_v28, %v1408_v1  ;;  %v5307_v61 = vrot.slane %v42_v28, %v1412_v60  ;;  %v1486_v60 = vld [vmem:[%s6294_s4] sm:$0xff]  ;;  %s4056_s4 = smov 42  }
 0x150   :  { %2823 = vmatpush1.msk.msra.mxu1 %vm920_vm3, %v776_v30  ;;  %v5315_v32 = vrot.slane %v42_v28, %v1416_v62  ;;  %v5317_v23 = vrot.slane %v42_v28, %v1420_v7  ;;  %v5319_v40 = vrot.slane %v42_v28, %v1424_v2  ;;  %v5324_v31 = vrot.slane %v42_v28, %v1428_v25 }
 0x151   :  { %2820 = vmatpush1.msk.msra.mxu0 %vm920_vm3, %v774_v15  ;;  %2824 = vmatmul.mubr.msk.f32.vlgmr.msra.gmra.mrb[2].mxu1 %vm1092_vm12, %v5033_v34  ;;  %v1090_v22 = vpop.permute.xlu1 %1089  ;;  %6609 = vst [vmem:[#allocation5_spill] sm:$0xff] %v5291_v53  ;;  %6611 = vst [vmem:[#allocation17_spill] sm:$0xff] %v5305_v10 }
 0x152   :  { %2821 = vmatmul.mubr.msk.f32.vlgmr.msra.gmra.mrb[2].mxu0 %vm1092_vm12, %v5033_v34  ;;  %v5297_v34 = vrot.slane %v42_v28, %v1404_v43  ;;  %6612 = vst [vmem:[#allocation10_spill] sm:$0xff] %v5307_v61  ;;  %6613 = vst [vmem:[#allocation8_spill] sm:$0xff] %v5315_v32 }
 0x153   :  { %6614 = vst [vmem:[#allocation6_spill] sm:$0xff] %v5317_v23  ;;  %6615 = vst [vmem:[#allocation13_spill] sm:$0xff] %v5319_v40 }
 0x154   :  { %6610 = vst [vmem:[#allocation11_spill] sm:$0xff] %v5297_v34  ;;  %6616 = vst [vmem:[#allocation7_spill] sm:$0xff] %v5324_v31 }
 0x1e6   :  { %v1179_v35 = vpop.f32.mrb[0].mxu0 }
 0x1e7   :  { %v1181_v42 = vpop.f32.mrb[1].mxu0  ;;  %v5293_v0 = vadd.f32 %v1179_v35, %v1090_v22 }
 0x1e8   :  { %v5295_v21 = vadd.f32 %v1181_v42, %v1090_v22 }
 0x1e9   :  { %v1438_v17 = vmul.f32 %v5291_v53, %v5293_v0 }
 0x1ea   :  { %v1439_v54 = vmul.f32 %v5297_v34, %v5295_v21 }
 0x1eb   :  { %v1456_v48 = vmul.f32 %v1438_v17, %v1438_v17 }
 0x1ec   :  { %v1457_v24 = vmul.f32 %v1439_v54, %v1439_v54  ;;  %v1446_v50 = vadd.f32 %v1439_v54, %v1438_v17 }
 0x1ee   :  { %v1464_v8 = vadd.f32 %v1457_v24, %v1456_v48 }
 0x1f0   :  { %v1250_v45 = vpop.f32.mrb[0].mxu1 }
 0x1f1   :  { %v1252_v51 = vpop.f32.mrb[1].mxu1  ;;  %v5303_v46 = vadd.f32 %v1250_v45, %v1090_v22  ;;  %v1501_v45 = vld [vmem:[%s6295_s5] sm:$0xff]  ;;  %s6617_s5 = smov 106  }
 0x1f2   :  { %v5311_v16 = vadd.f32 %v1252_v51, %v1090_v22  ;;  %v1523_v51 = vld [vmem:[%s6296_s6] sm:$0xff]  ;;  %s6618_s6 = smov 105  }
 0x1f3   :  { %v1440_v41 = vmul.f32 %v5305_v10, %v5303_v46 }
 0x1f4   :  { %v1441_v26 = vmul.f32 %v5307_v61, %v5311_v16 }
 0x1f5   :  { %v1458_v36 = vmul.f32 %v1440_v41, %v1440_v41  ;;  %v1447_v4 = vadd.f32 %v1446_v50, %v1440_v41 }
 0x1f6   :  { %v1459_v19 = vmul.f32 %v1441_v26, %v1441_v26 }
 0x1f7   :  { %v1465_v63 = vadd.f32 %v1464_v8, %v1458_v36  ;;  %v1448_v18 = vadd.f32 %v1447_v4, %v1441_v26 }
 0x1f9   :  { %v1466_v11 = vadd.f32 %v1465_v63, %v1459_v19 }
 0x224   :  { %v1392_v29 = vpop.f32.mrb[2].mxu1 }
 0x225   :  { %v1321_v52 = vpop.f32.mrb[2].mxu0  ;;  %v1393_v56 = vadd.f32 %v1392_v29, %v1090_v22  ;;  %v1394_v44 = vpop.f32.mrb[3].mxu1 }
 0x226   :  { %v1322_v57 = vadd.f32 %v1321_v52, %v1090_v22  ;;  %v1323_v33 = vpop.f32.mrb[3].mxu0  ;;  %v1395_v5 = vadd.f32 %v1394_v44, %v1090_v22 }
 0x227   :  { %v5321_v47 = vadd.f32 %v1323_v33, %v1090_v22  ;;  %v1444_v27 = vmul.f32 %v5319_v40, %v1393_v56 }
 0x228   :  { %v1442_v59 = vmul.f32 %v5315_v32, %v1322_v57  ;;  %v1445_v20 = vmul.f32 %v5324_v31, %v1395_v5 }
 0x229   :  { %v1443_v58 = vmul.f32 %v5317_v23, %v5321_v47  ;;  %v1462_v12 = vmul.f32 %v1444_v27, %v1444_v27 }
 0x22a   :  { %v1449_v55 = vadd.f32 %v1448_v18, %v1442_v59  ;;  %v1460_v9 = vmul.f32 %v1442_v59, %v1442_v59  ;;  %v1463_v14 = vmul.f32 %v1445_v20, %v1445_v20 }
 0x22b   :  { %v1461_v38 = vmul.f32 %v1443_v58, %v1443_v58 }
 0x22c   :  { %v1467_v37 = vadd.f32 %v1466_v11, %v1460_v9  ;;  %v1450_v6 = vadd.f32 %v1449_v55, %v1443_v58 }
 0x22e   :  { %v1468_v39 = vadd.f32 %v1467_v37, %v1461_v38  ;;  %v1451_v30 = vadd.f32 %v1450_v6, %v1444_v27 }
 0x230   :  { %v1452_v15 = vadd.f32 %v1451_v30, %v1445_v20  ;;  %v1469_v35 = vadd.f32 %v1468_v39, %v1462_v12 }
 0x232   :  { %1453 = vadd.xlane.f32.xlu0 %v1452_v15  ;;  %v1470_v42 = vadd.f32 %v1469_v35, %v1463_v14 }
 0x234   :  { %1471 = vadd.xlane.f32.xlu1 %v1470_v42 }
 0x245   :  { %1504 = vperm.xlu1 %3590, %v1501_v45  }
 0x249   :  { %1526 = vperm.xlu1 %3590, %v1523_v51  }
 0x2bf   :  { %v1454_v13 = vpop.xlane.xlu0 %1453 }
 0x2c0   :  { %v1455_v49 = vmul.f32 0.001953125, %v1454_v13 }
 0x2c1   :  { %v1472_v3 = vpop.xlane.xlu1 %1471 }
 0x2c2   :  { %v1473_v28 = vmul.f32 0.001953125, %v1472_v3  ;;  %v1474_v43 = vmul.f32 %v1455_v49, %v1455_v49  ;;  %v1482_v24 = vsub.f32 %v1322_v57, %v1455_v49  ;;  %v1478_v41 = vsub.f32 %v5293_v0, %v1455_v49 }
 0x2c3   :  { %v1484_v50 = vsub.f32 %v1393_v56, %v1455_v49  ;;  %v1479_v62 = vsub.f32 %v5295_v21, %v1455_v49  ;;  %v1480_v2 = vsub.f32 %v5303_v46, %v1455_v49  ;;  %v1485_v52 = vsub.f32 %v1395_v5, %v1455_v49 }
 0x2c4   :  { %v1475_v22 = vsub.f32 %v1473_v28, %v1474_v43  ;;  %v1481_v0 = vsub.f32 %v5311_v16, %v1455_v49  ;;  %v1483_v16 = vsub.f32 %v5321_v47, %v1455_v49 }
 0x2c5   :  { %v1505_v48 = vpop.permute.xlu1 %1504 }
 0x2c6   :  { %v1476_v1 = vadd.f32 1e-05, %v1475_v22 }
 0x2c8   :  { %4001 = vrsqrt.f32 %v1476_v1 }
 0x2c9   :  { %v1527_v44 = vpop.permute.xlu1 %1526 }
 0x2d2   :  { %v4002_v17 = vpop.eup %4001 }
 0x2d3   :  { %v1487_v54 = vmul.f32 %v4002_v17, %v1486_v60 }
 0x2d5   :  { %1490 = vperm.xlu0 %3591, %v1487_v54  }
 0x354   :  { %v1491_v7 = vpop.permute.xlu0 %1490 }
 0x355   :  { %v1497_v8 = vmul.f32 %v1491_v7, %v1482_v24  ;;  %v1493_v36 = vmul.f32 %v1491_v7, %v1478_v41  ;;  %v1499_v26 = vmul.f32 %v1491_v7, %v1484_v50  ;;  %v1494_v4 = vmul.f32 %v1491_v7, %v1479_v62 }
 0x356   :  { %v1495_v25 = vmul.f32 %v1491_v7, %v1480_v2  ;;  %v1500_v18 = vmul.f32 %v1491_v7, %v1485_v52  ;;  %v1496_v55 = vmul.f32 %v1491_v7, %v1481_v0  ;;  %v1498_v15 = vmul.f32 %v1491_v7, %v1483_v16 }
 0x357   :  { %v1511_v63 = vadd.f32 %v1505_v48, %v1497_v8  ;;  %v1507_v19 = vadd.f32 %v1505_v48, %v1493_v36  ;;  %v1513_v33 = vadd.f32 %v1505_v48, %v1499_v26  ;;  %v1508_v29 = vadd.f32 %v1505_v48, %v1494_v4 }
 0x358   :  { %v1509_v57 = vadd.f32 %v1505_v48, %v1495_v25  ;;  %v1514_v6 = vadd.f32 %v1505_v48, %v1500_v18  ;;  %v1510_v14 = vadd.f32 %v1505_v48, %v1496_v55  ;;  %v1512_v51 = vadd.f32 %v1505_v48, %v1498_v15 }
 0x359   :  { %vm1519_vm3 = vcmp.ge.f32.partialorder %v1511_v63, 0.0  ;;  %v1533_v21 = vmul.f32 %v1527_v44, %v1511_v63  ;;  %vm1515_vm12 = vcmp.ge.f32.partialorder %v1507_v19, 0.0  ;;  %v1529_v56 = vmul.f32 %v1527_v44, %v1507_v19 }
 0x35a   :  { %vm1521_vm7 = vcmp.ge.f32.partialorder %v1513_v33, 0.0  ;;  %v1535_v46 = vmul.f32 %v1527_v44, %v1513_v33  ;;  %vm1516_vm4 = vcmp.ge.f32.partialorder %v1508_v29, 0.0  ;;  %v1530_v59 = vmul.f32 %v1527_v44, %v1508_v29 }
 0x35b   :  { %v1541_v58 = vsel %vm1519_vm3, %v1511_v63, %v1533_v21  ;;  %v1537_v27 = vsel %vm1515_vm12, %v1507_v19, %v1529_v56  ;;  %v1531_v37 = vmul.f32 %v1527_v44, %v1509_v57  ;;  %vm1517_vm6 = vcmp.ge.f32.partialorder %v1509_v57, 0.0 }
 0x35c   :  { %v1549_v5 = vmul.f32 %v1541_v58, %v5315_v32  ;;  %v1545_v11 = vmul.f32 %v1537_v27, %v5291_v53  ;;  %v1543_v9 = vsel %vm1521_vm7, %v1513_v33, %v1535_v46  ;;  %v1538_v38 = vsel %vm1516_vm4, %v1508_v29, %v1530_v59 }
 0x35d   :  { %v1551_v12 = vmul.f32 %v1543_v9, %v5319_v40  ;;  %v1546_v20 = vmul.f32 %v1538_v38, %v5297_v34  ;;  %v1539_v39 = vsel %vm1517_vm6, %v1509_v57, %v1531_v37  ;;  %v1536_v30 = vmul.f32 %v1527_v44, %v1514_v6 }
 0x35e   :  { %1572 = vrot.lane.b32.xlu0 %v1549_v5, %s4056_s4  ;;  %1564 = vrot.lane.b32.xlu1 %v1545_v11, %s4056_s4  ;;  %vm1522_vm5 = vcmp.ge.f32.partialorder %v1514_v6, 0.0  ;;  %v1547_v35 = vmul.f32 %v1539_v39, %v5305_v10  ;;  %v1532_v45 = vmul.f32 %v1527_v44, %v1510_v14  ;;  %vm1518_vm1 = vcmp.ge.f32.partialorder %v1510_v14, 0.0 }
 0x35f   :  { %v1544_v42 = vsel %vm1522_vm5, %v1514_v6, %v1536_v30  ;;  %v1534_v49 = vmul.f32 %v1527_v44, %v1512_v51  ;;  %vm1520_vm3 = vcmp.ge.f32.partialorder %v1512_v51, 0.0  ;;  %vm1578_vm12 = vcmask 343040  }
 0x360   :  { %v1552_v47 = vmul.f32 %v1544_v42, %v5324_v31  ;;  %v1540_v13 = vsel %vm1518_vm1, %v1510_v14, %v1532_v45  ;;  %vm6624_vm7 = vcmask 1022976  }
 0x361   :  { %v1548_v3 = vmul.f32 %v1540_v13, %v5307_v61  ;;  %v1542_v28 = vsel %vm1520_vm3, %v1512_v51, %v1534_v49  ;;  %vm6626_vm4 = vmmov %vm6624_vm7  ;;  %vm2396_vm3 = vcmask 588800  }
 0x362   :  { %1576 = vrot.lane.b32.xlu0 %v1551_v12, %s4056_s4  ;;  %1566 = vrot.lane.b32.xlu1 %v1546_v20, %s4056_s4  ;;  %v1550_v43 = vmul.f32 %v1542_v28, %v5317_v23  ;;  %vm6627_vm6 = vmmov %vm6626_vm4 }
 0x363   :  { %vm6628_vm5 = vmmov %vm6626_vm4 }
 0x364   :  { %vm6629_vm1 = vmmov %vm6626_vm4 }
 0x366   :  { %1568 = vrot.lane.b32.xlu1 %v1547_v35, %s4056_s4 }
 0x36a   :  { %1554 = vrot.lane.b32.xlu1 %v1552_v47, %s4056_s4 }
 0x36e   :  { %1570 = vrot.lane.b32.xlu1 %v1548_v3, %s4056_s4 }
 0x372   :  { %1574 = vrot.lane.b32.xlu1 %v1550_v43, %s4056_s4 }
 0x3d0   :  { %v1565_v22 = vpop.permute.xlu1 %1564  ;;  %v1573_v2 = vpop.permute.xlu0 %1572 }
 0x3d4   :  { %v1567_v1 = vpop.permute.xlu1 %1566  ;;  %v1577_v33 = vpop.permute.xlu0 %1576 }
 0x3d5   :  { %v5353_v17 = vsel %vm1578_vm12, %v1565_v22, %v1567_v1 }
 0x3d8   :  { %v1569_v60 = vpop.permute.xlu1 %1568 }
 0x3d9   :  { %v5356_v54 = vsel %vm1578_vm12, %v1567_v1, %v1569_v60 }
 0x3da   :  { %v5360_v48 = vpack.i.bf16 %v5356_v54, %v5353_v17 }
 0x3dc   :  { %3593 = vrot.lane.b32.xlu1 %v5360_v48, %s4030_s25  ;;  %v5364_v24 = vpop.permute.xlu1 %1554 }
 0x3dd   :  { %v5368_v50 = vsel %vm1578_vm12, %v5364_v24, %v1565_v22  ;;  %v5555_v22 = vsel %vm1578_vm12, %v1577_v33, %v5364_v24 }
 0x3e0   :  { %v1571_v41 = vpop.permute.xlu1 %1570 }
 0x3e1   :  { %v5371_v62 = vsel %vm1578_vm12, %v1569_v60, %v1571_v41  ;;  %v5382_v36 = vsel %vm1578_vm12, %v1571_v41, %v1573_v2 }
 0x3e2   :  { %v5375_v7 = vpack.i.bf16 %v5371_v62, %v5368_v50 }
 0x3e4   :  { %3598 = vrot.lane.b32.xlu0 %v5375_v7, %s4030_s25  ;;  %v5379_v8 = vpop.permute.xlu1 %1574 }
 0x3e5   :  { %v5386_v26 = vsel %vm1578_vm12, %v1573_v2, %v5379_v8  ;;  %v5559_v1 = vsel %vm1578_vm12, %v5379_v8, %v1577_v33  ;;  %vm6630_vm12 = vcmask 1014784  }
 0x3e6   :  { %v3602_v4 = vpack.i.bf16 %v5386_v26, %v5382_v36  ;;  %v5591_v33 = vpack.i.bf16 %v5555_v22, %v5559_v1 }
 0x3e8   :  { %3608 = vrot.lane.b32.xlu0 %v5360_v48, %s4032_s29  ;;  %3603 = vrot.lane.b32.xlu1 %v3602_v4, %s4030_s25 }
 0x3ec   :  { %3618 = vrot.lane.b32.xlu0 %v5375_v7, %s4032_s29  ;;  %3613 = vrot.lane.b32.xlu1 %v5360_v48, %s4031_s28 }
 0x3f0   :  { %3628 = vrot.lane.b32.xlu0 %v3602_v4, %s4032_s29  ;;  %3623 = vrot.lane.b32.xlu1 %v5375_v7, %s4031_s28 }
 0x3f4   :  { %3638 = vrot.lane.b32.xlu0 %v5360_v48, %s4035_s14  ;;  %3633 = vrot.lane.b32.xlu1 %v3602_v4, %s4031_s28 }
 0x3f8   :  { %3648 = vrot.lane.b32.xlu0 %v5375_v7, %s4035_s14  ;;  %3643 = vrot.lane.b32.xlu1 %v5360_v48, %s4034_s13 }
 0x3fc   :  { %3658 = vrot.lane.b32.xlu0 %v3602_v4, %s4035_s14  ;;  %3653 = vrot.lane.b32.xlu1 %v5375_v7, %s4034_s13 }
 0x400   :  { %3668 = vrot.lane.b32.xlu0 %v5360_v48, %s4036_s15  ;;  %3663 = vrot.lane.b32.xlu1 %v3602_v4, %s4034_s13 }
 0x404   :  { %3678 = vrot.lane.b32.xlu0 %v5375_v7, %s4036_s15  ;;  %3673 = vrot.lane.b32.xlu1 %v5360_v48, %s6617_s5 }
 0x408   :  { %3688 = vrot.lane.b32.xlu0 %v3602_v4, %s4036_s15  ;;  %3683 = vrot.lane.b32.xlu1 %v5375_v7, %s6617_s5 }
 0x40c   :  { %3698 = vrot.lane.b32.xlu0 %v5360_v48, %s6618_s6  ;;  %3693 = vrot.lane.b32.xlu1 %v3602_v4, %s6617_s5 }
 0x410   :  { %3708 = vrot.lane.b32.xlu0 %v5375_v7, %s6618_s6  ;;  %3703 = vrot.lane.b32.xlu1 %v5360_v48, %s6619_s1 }
 0x414   :  { %3718 = vrot.lane.b32.xlu0 %v3602_v4, %s6618_s6  ;;  %3713 = vrot.lane.b32.xlu1 %v5375_v7, %s6619_s1 }
 0x418   :  { %3728 = vrot.lane.b32.xlu0 %v5360_v48, %s6620_s21  ;;  %3723 = vrot.lane.b32.xlu1 %v3602_v4, %s6619_s1 }
 0x41c   :  { %3738 = vrot.lane.b32.xlu0 %v5375_v7, %s6620_s21  ;;  %3733 = vrot.lane.b32.xlu1 %v5360_v48, %s6621_s2 }
 0x420   :  { %3748 = vrot.lane.b32.xlu0 %v3602_v4, %s6620_s21  ;;  %3743 = vrot.lane.b32.xlu1 %v5375_v7, %s6621_s2 }
 0x424   :  { %3758 = vrot.lane.b32.xlu0 %v5360_v48, %s6469_s27  ;;  %3753 = vrot.lane.b32.xlu1 %v3602_v4, %s6621_s2 }
 0x428   :  { %3768 = vrot.lane.b32.xlu0 %v5375_v7, %s6469_s27  ;;  %3763 = vrot.lane.b32.xlu1 %v5360_v48, %s6622_s23 }
 0x42c   :  { %3778 = vrot.lane.b32.xlu0 %v3602_v4, %s6469_s27  ;;  %3773 = vrot.lane.b32.xlu1 %v5375_v7, %s6622_s23 }
 0x430   :  { %3783 = vrot.lane.b32.xlu0 %v5360_v48, %s6472_s19  ;;  %2000 = vrot.lane.b32.xlu1 %v5382_v36, %s6622_s23 }
 0x434   :  { %3793 = vrot.lane.b32.xlu0 %v5375_v7, %s6472_s19  ;;  %3788 = vrot.lane.b32.xlu1 %v5360_v48, %s6470_s20 }
 0x438   :  { %2033 = vrot.lane.b32.xlu0 %v5382_v36, %s6472_s19  ;;  %3798 = vrot.lane.b32.xlu1 %v5375_v7, %s6470_s20 }
 0x43c   :  { %3803 = vrot.lane.b32.xlu0 %v5360_v48, %s6473_s16  ;;  %2066 = vrot.lane.b32.xlu1 %v5382_v36, %s6470_s20 }
 0x440   :  { %3813 = vrot.lane.b32.xlu0 %v5375_v7, %s6473_s16  ;;  %3808 = vrot.lane.b32.xlu1 %v5360_v48, %s6471_s17 }
 0x444   :  { %2099 = vrot.lane.b32.xlu0 %v5382_v36, %s6473_s16  ;;  %3818 = vrot.lane.b32.xlu1 %v5375_v7, %s6471_s17 }
 0x448   :  { %3823 = vrot.lane.b32.xlu0 %v5360_v48, %s6476_s30  ;;  %2132 = vrot.lane.b32.xlu1 %v5382_v36, %s6471_s17 }
 0x44c   :  { %3833 = vrot.lane.b32.xlu0 %v5375_v7, %s6476_s30  ;;  %3828 = vrot.lane.b32.xlu1 %v5360_v48, %s6474_s18 }
 0x44e   :  { %v3594_v25 = vpop.permute.xlu1 %3593 }
 0x44f   :  { %v3596_v52 = vunpack.i.h.bf16 %v3594_v25  ;;  %v3595_v63 = vunpack.i.l.bf16 %v3594_v25 }
 0x450   :  { %2165 = vrot.lane.b32.xlu0 %v5382_v36, %s6476_s30  ;;  %3838 = vrot.lane.b32.xlu1 %v5375_v7, %s6474_s18 }
 0x451   :  { %v1613_v19 = vsel %vm71_vm0, %v3595_v63, %v3596_v52 }
 0x452   :  { %v2925_v29 = vpack.c.bf16 %v1613_v19, %v5353_v17 }
 0x454   :  { %3843 = vrot.lane.b32.xlu0 %v5360_v48, %s6407_s26  ;;  %2198 = vrot.lane.b32.xlu1 %v5382_v36, %s6474_s18 }
 0x455   :  { %2926 = vmatprep.subr.bf16.mxu0 %v2925_v29 }
 0x456   :  { %v5492_v44 = vpop.permute.xlu0 %3598 }
 0x457   :  { %v6423_v57 = vunpack.i.l.bf16 %v5492_v44  ;;  %v3601_v18 = vunpack.i.h.bf16 %v5492_v44 }
 0x458   :  { %3853 = vrot.lane.b32.xlu0 %v5375_v7, %s6407_s26  ;;  %3848 = vrot.lane.b32.xlu1 %v5360_v48, %s4049_s22 }
 0x459   :  { %v1612_v0 = vsel %vm71_vm0, %v6423_v57, %v3595_v63  ;;  %v1614_v58 = vsel %vm71_vm0, %v3596_v52, %v3601_v18  ;;  %v5585_v63 = vld [vmem:[%s6297_s7 + $0x8] sm:$0xff] }
 0x45a   :  { %v5503_v21 = vpop.permute.xlu0 %3608  ;;  %v5505_v56 = vpop.permute.xlu1 %3603  ;;  %v2927_v46 = vpack.c.bf16 %v1612_v0, %v5368_v50  ;;  %v2975_v16 = vpack.c.bf16 %v1614_v58, %v5356_v54  ;;  %2825 = vmatprep.mubr.msk.f32.mxu0 %vm2396_vm3, %v5585_v63  ;;  %2826 = vmatprep.mubr.msk.f32.mxu1 %vm2396_vm3, %v5585_v63 }
 0x45b   :  { %v6429_v59 = vunpack.i.l.bf16 %v5505_v56  ;;  %v3611_v27 = vunpack.i.h.bf16 %v5503_v21  ;;  %v3610_v5 = vunpack.i.l.bf16 %v5503_v21 }
 0x45c   :  { %2231 = vrot.lane.b32.xlu0 %v5382_v36, %s6407_s26  ;;  %3858 = vrot.lane.b32.xlu1 %v5375_v7, %s4049_s22 }
 0x45d   :  { %2928 = vmatpush1.bf16.msra.mxu0 %v2927_v46  ;;  %v1615_v11 = vsel %vm71_vm0, %v3601_v18, %v6429_v59  ;;  %v1646_v20 = vsel %vm98_vm2, %v3610_v5, %v3611_v27 }
 0x45e   :  { %v5519_v55 = vpop.permute.xlu0 %3618  ;;  %v3614_v9 = vpop.permute.xlu1 %3613  ;;  %v2973_v38 = vpack.c.bf16 %v1615_v11, %v5371_v62 }
 0x45f   :  { %v3616_v37 = vunpack.i.h.bf16 %v3614_v9  ;;  %v3615_v6 = vunpack.i.l.bf16 %v3614_v9  ;;  %v6420_v12 = vunpack.i.l.bf16 %v5519_v55  ;;  %v3621_v49 = vunpack.i.h.bf16 %v5519_v55 }
 0x460   :  { %3863 = vrot.lane.b32.xlu0 %v5360_v48, %s6623_s0  ;;  %2264 = vrot.lane.b32.xlu1 %v5382_v36, %s4049_s22 }
 0x461   :  { %2974 = vmatprep.subr.bf16.mxu1 %v2973_v38  ;;  %v1679_v39 = vsel %vm6624_vm7, %v3615_v6, %v3616_v37  ;;  %v1645_v47 = vsel %vm98_vm2, %v6420_v12, %v3610_v5  ;;  %v1647_v0 = vsel %vm98_vm2, %v3611_v27, %v3621_v49  ;;  %vm6631_vm7 = vcmask 883712  }
 0x462   :  { %2976 = vmatpush1.bf16.msra.mxu1 %v2975_v16  ;;  %v5530_v30 = vpop.permute.xlu0 %3628  ;;  %v5532_v14 = vpop.permute.xlu1 %3623  ;;  %v2929_v15 = vpack.c.bf16 %v1679_v39, %v1646_v20 }
 0x463   :  { %v6422_v35 = vunpack.i.l.bf16 %v5532_v14  ;;  %v6428_v42 = vunpack.i.h.bf16 %v5530_v30  ;;  %v3630_v45 = vunpack.i.l.bf16 %v5530_v30  ;;  %v3626_v51 = vunpack.i.h.bf16 %v5532_v14 }
 0x464   :  { %3873 = vrot.lane.b32.xlu0 %v5375_v7, %s6623_s0  ;;  %3868 = vrot.lane.b32.xlu1 %v5360_v48, %s6625_s3 }
 0x465   :  { %v1678_v13 = vsel %vm6626_vm4, %v6422_v35, %v3615_v6  ;;  %2930 = vmatprep.subr.bf16.mxu0 %v2929_v15  ;;  %v5566_v41 = vsel %vm98_vm2, %v3630_v45, %v6428_v42  ;;  %v1680_v2 = vsel %vm6627_vm6, %v3616_v37, %v3626_v51  ;;  %v1648_v24 = vsel %vm98_vm2, %v3621_v49, %v3630_v45  ;;  %vm6632_vm4 = vmmov %vm6630_vm12 }
 0x466   :  { %v5549_v3 = vpop.permute.xlu0 %3638  ;;  %v5551_v28 = vpop.permute.xlu1 %3633  ;;  %v2931_v43 = vpack.c.bf16 %v1678_v13, %v1645_v47  ;;  %v2979_v58 = vpack.c.bf16 %v1680_v2, %v1647_v0  ;;  %vm6633_vm6 = vmmov %vm6631_vm7 }
 0x467   :  { %v6427_v60 = vunpack.i.h.bf16 %v5551_v28  ;;  %v3635_v48 = vunpack.i.l.bf16 %v5551_v28  ;;  %v3641_v4 = vunpack.i.h.bf16 %v5549_v3  ;;  %v3640_v8 = vunpack.i.l.bf16 %v5549_v3 }
 0x468   :  { %2297 = vrot.lane.b32.xlu0 %v5382_v36, %s6623_s0  ;;  %3878 = vrot.lane.b32.xlu1 %v5375_v7, %s6625_s3 }
 0x469   :  { %v5579_v25 = vsel %vm6628_vm5, %v3635_v48, %v6427_v60  ;;  %2932 = vmatpush1.bf16.msra.mxu0 %v2931_v43  ;;  %v1681_v52 = vsel %vm6629_vm1, %v3626_v51, %v3635_v48  ;;  %v1712_v11 = vsel %vm6630_vm12, %v3640_v8, %v3641_v4  ;;  %vm6634_vm5 = vmmov %vm6632_vm4 }
 0x46a   :  { %v5587_v19 = vpop.permute.xlu0 %3648  ;;  %v3644_v7 = vpop.permute.xlu1 %3643  ;;  %v2977_v29 = vpack.c.bf16 %v1681_v52, %v1648_v24  ;;  %vm6635_vm1 = vmmov %vm6633_vm6 }
 0x46b   :  { %v3646_v21 = vunpack.i.h.bf16 %v3644_v7  ;;  %v3645_v46 = vunpack.i.l.bf16 %v3644_v7  ;;  %v6418_v5 = vunpack.i.l.bf16 %v5587_v19  ;;  %v3651_v51 = vunpack.i.h.bf16 %v5587_v19  ;;  %vm6636_vm12 = vmmov %vm6632_vm4 }
 0x46c   :  { %3883 = vrot.lane.b32.xlu0 %v5591_v33, %s4030_s25  ;;  %2330 = vrot.lane.b32.xlu1 %v5382_v36, %s6625_s3  ;;  %s6676_s25 = smov 48  }
 0x46d   :  { %2978 = vmatprep.subr.bf16.mxu1 %v2977_v29  ;;  %v1745_v9 = vsel %vm6631_vm7, %v3645_v46, %v3646_v21  ;;  %v1711_v15 = vsel %vm6632_vm4, %v6418_v5, %v3640_v8  ;;  %vm6637_vm7 = vmmov %vm6635_vm1 }
 0x46e   :  { %2980 = vmatpush1.bf16.msra.mxu1 %v2979_v58  ;;  %v5607_v38 = vpop.permute.xlu0 %3658  ;;  %v5609_v27 = vpop.permute.xlu1 %3653  ;;  %v2933_v37 = vpack.c.bf16 %v1745_v9, %v1712_v11  ;;  %vm6638_vm4 = vmmov %vm6635_vm1 }
 0x46f   :  { %v6413_v6 = vunpack.i.l.bf16 %v5609_v27  ;;  %v6419_v16 = vunpack.i.h.bf16 %v5607_v38  ;;  %v3660_v20 = vunpack.i.l.bf16 %v5607_v38  ;;  %v3656_v39 = vunpack.i.h.bf16 %v5609_v27 }
 0x470   :  { %2359 = vrot.lane.b32.xlu0 %v5356_v54, %s4054_s24  ;;  %2357 = vrot.lane.b32.xlu1 %v5353_v17, %s4054_s24 }
 0x471   :  { %v1744_v45 = vsel %vm6633_vm6, %v6413_v6, %v3645_v46  ;;  %2934 = vmatprep.subr.bf16.mxu0 %v2933_v37  ;;  %v5635_v3 = vsel %vm6634_vm5, %v3660_v20, %v6419_v16  ;;  %v1746_v43 = vsel %vm6635_vm1, %v3646_v21, %v3656_v39  ;;  %v1714_v48 = vsel %vm6636_vm12, %v3651_v51, %v3660_v20  ;;  %vm6639_vm6 = vmmov %vm6634_vm5 }
 0x472   :  { %v5626_v47 = vpop.permute.xlu0 %3668  ;;  %v5628_v13 = vpop.permute.xlu1 %3663  ;;  %v2935_v49 = vpack.c.bf16 %v1744_v45, %v1711_v15  ;;  %v1713_v21 = vsel %vm6639_vm6, %v3641_v4, %v3651_v51  ;;  %vm6640_vm5 = vcmask 875520   ;;  %vm6641_vm1 = vcmask 867328  }
 0x473   :  { %v6414_v54 = vunpack.i.h.bf16 %v5628_v13  ;;  %v3665_v17 = vunpack.i.l.bf16 %v5628_v13  ;;  %v3671_v2 = vunpack.i.h.bf16 %v5626_v47  ;;  %v3670_v24 = vunpack.i.l.bf16 %v5626_v47  ;;  %vm6642_vm12 = vmmov %vm6640_vm5 }
 0x474   :  { %3888 = vrot.lane.b32.xlu0 %v5591_v33, %s4032_s29  ;;  %2355 = vrot.lane.b32.xlu1 %v5368_v50, %s4054_s24  ;;  %v2983_v11 = vpack.c.bf16 %v1746_v43, %v1713_v21  ;;  %vm6645_vm6 = vmmov %vm6641_vm1 }
 0x475   :  { %v5648_v8 = vsel %vm6637_vm7, %v3665_v17, %v6414_v54  ;;  %2936 = vmatpush1.bf16.msra.mxu0 %v2935_v49  ;;  %v1747_v52 = vsel %vm6638_vm4, %v3656_v39, %v3665_v17  ;;  %v1778_v37 = vsel %vm6640_vm5, %v3670_v24, %v3671_v2  ;;  %vm6643_vm7 = vmmov %vm6640_vm5 }
 0x476   :  { %v5651_v7 = vpop.permute.xlu0 %3678  ;;  %v3674_v29 = vpop.permute.xlu1 %3673  ;;  %v2981_v0 = vpack.c.bf16 %v1747_v52, %v1714_v48  ;;  %vm6644_vm4 = vmmov %vm6641_vm1 }
 0x477   :  { %v3676_v46 = vunpack.i.h.bf16 %v3674_v29  ;;  %v3675_v58 = vunpack.i.l.bf16 %v3674_v29  ;;  %v6410_v9 = vunpack.i.l.bf16 %v5651_v7  ;;  %v3681_v48 = vunpack.i.h.bf16 %v5651_v7 }
 0x478   :  { %2361 = vrot.lane.b32.xlu0 %v5371_v62, %s4054_s24  ;;  %3893 = vrot.lane.b32.xlu1 %v5591_v33, %s4031_s28 }
 0x479   :  { %2982 = vmatprep.subr.bf16.mxu1 %v2981_v0  ;;  %v1811_v20 = vsel %vm6641_vm1, %v3675_v58, %v3676_v46  ;;  %v1777_v49 = vsel %vm6642_vm12, %v6410_v9, %v3670_v24  ;;  %vm6646_vm12 = vmmov %vm6641_vm1 }
 0x47a   :  { %2984 = vmatpush1.bf16.msra.mxu1 %v2983_v11  ;;  %v5663_v39 = vpop.permute.xlu0 %3688  ;;  %v5665_v4 = vpop.permute.xlu1 %3683  ;;  %v2937_v15 = vpack.c.bf16 %v1811_v20, %v1778_v37 }
 0x47b   :  { %v6411_v45 = vunpack.i.h.bf16 %v5663_v39  ;;  %v3690_v62 = vunpack.i.l.bf16 %v5663_v39  ;;  %v6409_v51 = vunpack.i.l.bf16 %v5665_v4  ;;  %v3686_v47 = vunpack.i.h.bf16 %v5665_v4 }
 0x47c   :  { %3898 = vrot.lane.b32.xlu0 %v5591_v33, %s4035_s14  ;;  %2363 = vrot.lane.b32.xlu1 %v5382_v36, %s4054_s24 }
 0x47d   :  { %v5681_v17 = vsel %vm6643_vm7, %v3690_v62, %v6411_v45  ;;  %v1810_v43 = vsel %vm6644_vm4, %v6409_v51, %v3675_v58  ;;  %2938 = vmatprep.subr.bf16.mxu0 %v2937_v15  ;;  %v1812_v11 = vsel %vm6645_vm6, %v3676_v46, %v3686_v47  ;;  %v1780_v58 = vsel %vm6640_vm5, %v3681_v48, %v3690_v62  ;;  %vm6647_vm7 = vmmov %vm6640_vm5 }
 0x47e   :  { %v5687_v52 = vpop.permute.xlu0 %3698  ;;  %v5689_v29 = vpop.permute.xlu1 %3693  ;;  %v2939_v0 = vpack.c.bf16 %v1810_v43, %v1777_v49  ;;  %v1779_v62 = vsel %vm6647_vm7, %v3671_v2, %v3681_v48  ;;  %vm6648_vm4 = vcmask 859136   ;;  %vm6649_vm6 = vcmask 850944  }
 0x47f   :  { %v6412_v21 = vunpack.i.h.bf16 %v5689_v29  ;;  %v3695_v24 = vunpack.i.l.bf16 %v5689_v29  ;;  %v3701_v37 = vunpack.i.h.bf16 %v5687_v52  ;;  %v3700_v20 = vunpack.i.l.bf16 %v5687_v52  ;;  %vm6650_vm5 = vmmov %vm6648_vm4 }
 0x480   :  { %3908 = vrot.lane.b32.xlu0 %v5591_v33, %s4036_s15  ;;  %3903 = vrot.lane.b32.xlu1 %v5591_v33, %s4034_s13  ;;  %v2987_v52 = vpack.c.bf16 %v1812_v11, %v1779_v62  ;;  %vm6653_vm7 = vmmov %vm6649_vm6 }
 0x481   :  { %v5704_v15 = vsel %vm6641_vm1, %v3695_v24, %v6412_v21  ;;  %2940 = vmatpush1.bf16.msra.mxu0 %v2939_v0  ;;  %v1813_v46 = vsel %vm6646_vm12, %v3686_v47, %v3695_v24  ;;  %v1844_v0 = vsel %vm6648_vm4, %v3700_v20, %v3701_v37  ;;  %vm6651_vm1 = vmmov %vm6648_vm4 }
 0x482   :  { %v5709_v43 = vpop.permute.xlu0 %3708  ;;  %v3704_v51 = vpop.permute.xlu1 %3703  ;;  %v2985_v9 = vpack.c.bf16 %v1813_v46, %v1780_v58  ;;  %vm6652_vm12 = vmmov %vm6649_vm6 }
 0x483   :  { %v3706_v50 = vunpack.i.h.bf16 %v3704_v51  ;;  %v3705_v45 = vunpack.i.l.bf16 %v3704_v51  ;;  %v6415_v47 = vunpack.i.l.bf16 %v5709_v43  ;;  %vm6654_vm4 = vmmov %vm6651_vm1 }
 0x484   :  { %3918 = vrot.lane.b32.xlu0 %v5591_v33, %s6618_s6  ;;  %3913 = vrot.lane.b32.xlu1 %v5591_v33, %s6617_s5 }
 0x485   :  { %2986 = vmatprep.subr.bf16.mxu1 %v2985_v9  ;;  %v1877_v24 = vsel %vm6649_vm6, %v3705_v45, %v3706_v50  ;;  %v1843_v9 = vsel %vm6650_vm5, %v6415_v47, %v3700_v20  ;;  %vm6655_vm5 = vmmov %vm6649_vm6 }
 0x486   :  { %2988 = vmatpush1.bf16.msra.mxu1 %v2987_v52  ;;  %v5719_v58 = vpop.permute.xlu0 %3718  ;;  %v5721_v2 = vpop.permute.xlu1 %3713  ;;  %v2941_v51 = vpack.c.bf16 %v1877_v24, %v1844_v0  ;;  %v3711_v0 = vunpack.i.h.bf16 %v5709_v43 }
 0x487   :  { %v6417_v48 = vunpack.i.h.bf16 %v5719_v58  ;;  %v3720_v46 = vunpack.i.l.bf16 %v5719_v58  ;;  %v6416_v49 = vunpack.i.l.bf16 %v5721_v2  ;;  %v3716_v11 = vunpack.i.h.bf16 %v5721_v2 }
 0x488   :  { %3928 = vrot.lane.b32.xlu0 %v5591_v33, %s6620_s21  ;;  %3923 = vrot.lane.b32.xlu1 %v5591_v33, %s6619_s1 }
 0x489   :  { %v5737_v62 = vsel %vm6651_vm1, %v3720_v46, %v6417_v48  ;;  %v1876_v52 = vsel %vm6652_vm12, %v6416_v49, %v3705_v45  ;;  %2942 = vmatprep.subr.bf16.mxu0 %v2941_v51  ;;  %v1878_v47 = vsel %vm6653_vm7, %v3706_v50, %v3716_v11  ;;  %v1846_v45 = vsel %vm6654_vm4, %v3711_v0, %v3720_v46 }
 0x48a   :  { %v2943_v24 = vpack.c.bf16 %v1876_v52, %v1843_v9  ;;  %v5743_v21 = vpop.permute.xlu0 %3728  ;;  %v5745_v6 = vpop.permute.xlu1 %3723  ;;  %v5769_v46 = vpack.i.bf16 %v5559_v1, %v5386_v26  ;;  %vm6656_vm12 = vcmask 719872   ;;  %vm6657_vm7 = vcmask 711680  }
 0x48b   :  { %v6421_v54 = vunpack.i.h.bf16 %v5745_v6  ;;  %v3725_v20 = vunpack.i.l.bf16 %v5745_v6  ;;  %v3731_v51 = vunpack.i.h.bf16 %v5743_v21  ;;  %v3730_v9 = vunpack.i.l.bf16 %v5743_v21  ;;  %vm6658_vm4 = vmmov %vm6656_vm12 }
 0x48c   :  { %3938 = vrot.lane.b32.xlu0 %v5591_v33, %s6469_s27  ;;  %3933 = vrot.lane.b32.xlu1 %v5591_v33, %s6621_s2  ;;  %v1845_v21 = vsel %vm6651_vm1, %v3701_v37, %v3711_v0 }
 0x48d   :  { %v5760_v52 = vsel %vm6649_vm6, %v3725_v20, %v6421_v54  ;;  %2944 = vmatpush1.bf16.msra.mxu0 %v2943_v24  ;;  %v1879_v50 = vsel %vm6655_vm5, %v3716_v11, %v3725_v20  ;;  %v2991_v54 = vpack.c.bf16 %v1878_v47, %v1845_v21  ;;  %v1910_v24 = vsel %vm6656_vm12, %v3730_v9, %v3731_v51  ;;  %vm6659_vm6 = vmmov %vm6658_vm4 }
 0x48e   :  { %v5765_v48 = vpop.permute.xlu0 %3738  ;;  %v3734_v33 = vpop.permute.xlu1 %3733  ;;  %v2989_v5 = vpack.c.bf16 %v1879_v50, %v1846_v45  ;;  %vm6660_vm5 = vmmov %vm6657_vm7 }
 0x48f   :  { %v3736_v16 = vunpack.i.h.bf16 %v3734_v33  ;;  %v3735_v12 = vunpack.i.l.bf16 %v3734_v33  ;;  %v6424_v11 = vunpack.i.l.bf16 %v5765_v48  ;;  %vm6661_vm1 = vmmov %vm6660_vm5 }
 0x490   :  { %2006 = vrot.lane.b32.xlu0 %v5555_v22, %s6622_s23  ;;  %3943 = vrot.lane.b32.xlu1 %v5769_v46, %s6622_s23  ;;  %vm6662_vm12 = vmmov %vm6658_vm4 }
 0x491   :  { %2990 = vmatprep.subr.bf16.mxu1 %v2989_v5  ;;  %v1943_v20 = vsel %vm6657_vm7, %v3735_v12, %v3736_v16  ;;  %v1909_v5 = vsel %vm6658_vm4, %v6424_v11, %v3730_v9  ;;  %vm6663_vm7 = vmmov %vm6661_vm1 }
 0x492   :  { %2992 = vmatpush1.bf16.msra.mxu1 %v2991_v54  ;;  %v5779_v45 = vpop.permute.xlu0 %3748  ;;  %v5781_v37 = vpop.permute.xlu1 %3743  ;;  %v2945_v0 = vpack.c.bf16 %v1943_v20, %v1910_v24  ;;  %v3741_v20 = vunpack.i.h.bf16 %v5765_v48  ;;  %vm6664_vm4 = vmmov %vm6661_vm1 }
 0x493   :  { %v6426_v47 = vunpack.i.h.bf16 %v5779_v45  ;;  %v3750_v50 = vunpack.i.l.bf16 %v5779_v45  ;;  %v6425_v33 = vunpack.i.l.bf16 %v5781_v37  ;;  %v3746_v21 = vunpack.i.h.bf16 %v5781_v37 }
 0x494   :  { %3953 = vrot.lane.b32.xlu0 %v5769_v46, %s6470_s20  ;;  %3948 = vrot.lane.b32.xlu1 %v5769_v46, %s6472_s19  ;;  %v1911_v59 = vsel %vm6659_vm6, %v3731_v51, %v3741_v20 }
 0x495   :  { %v5797_v54 = vsel %vm6659_vm6, %v3750_v50, %v6426_v47  ;;  %v1942_v24 = vsel %vm6660_vm5, %v6425_v33, %v3735_v12  ;;  %2946 = vmatprep.subr.bf16.mxu0 %v2945_v0  ;;  %v1944_v11 = vsel %vm6661_vm1, %v3736_v16, %v3746_v21  ;;  %v1912_v12 = vsel %vm6662_vm12, %v3741_v20, %v3750_v50 }
 0x496   :  { %v2947_v49 = vpack.c.bf16 %v1942_v24, %v1909_v5  ;;  %v3759_v18 = vpop.permute.xlu0 %3758  ;;  %v5803_v35 = vpop.permute.xlu1 %3753  ;;  %vm6665_vm5 = vcmask 703488   ;;  %vm6666_vm1 = vcmask 695296  }
 0x497   :  { %v6431_v57 = vunpack.i.h.bf16 %v5803_v35  ;;  %v3755_v9 = vunpack.i.l.bf16 %v5803_v35  ;;  %v3761_v0 = vunpack.i.h.bf16 %v3759_v18  ;;  %v3760_v33 = vunpack.i.l.bf16 %v3759_v18  ;;  %vm6667_vm12 = vmmov %vm6665_vm5 }
 0x498   :  { %2072 = vrot.lane.b32.xlu0 %v5555_v22, %s6470_s20  ;;  %2039 = vrot.lane.b32.xlu1 %v5555_v22, %s6472_s19  ;;  %v2995_v18 = vpack.c.bf16 %v1944_v11, %v1911_v59  ;;  %vm6670_vm6 = vmmov %vm6666_vm1 }
 0x499   :  { %v5816_v5 = vsel %vm6663_vm7, %v3755_v9, %v6431_v57  ;;  %2948 = vmatpush1.bf16.msra.mxu0 %v2947_v49  ;;  %v1945_v24 = vsel %vm6664_vm4, %v3746_v21, %v3755_v9  ;;  %v1976_v21 = vsel %vm6665_vm5, %v3760_v33, %v3761_v0  ;;  %vm6668_vm7 = vmmov %vm6665_vm5 }
 0x49a   :  { %v5821_v47 = vpop.permute.xlu0 %3768  ;;  %v3764_v60 = vpop.permute.xlu1 %3763  ;;  %v2993_v42 = vpack.c.bf16 %v1945_v24, %v1912_v12  ;;  %vm6669_vm4 = vmmov %vm6666_vm1 }
 0x49b   :  { %v3766_v50 = vunpack.i.h.bf16 %v3764_v60  ;;  %v3765_v31 = vunpack.i.l.bf16 %v3764_v60  ;;  %v6435_v49 = vunpack.i.l.bf16 %v5821_v47 }
 0x49c   :  { %3963 = vrot.lane.b32.xlu0 %v5769_v46, %s6471_s17  ;;  %3958 = vrot.lane.b32.xlu1 %v5769_v46, %s6473_s16 }
 0x49d   :  { %2994 = vmatprep.subr.bf16.mxu1 %v2993_v42  ;;  %v2009_v9 = vsel %vm6666_vm1, %v3765_v31, %v3766_v50  ;;  %v3771_v42 = vunpack.i.h.bf16 %v5821_v47 }
 0x49e   :  { %2996 = vmatpush1.bf16.msra.mxu1 %v2995_v18  ;;  %v5831_v12 = vpop.permute.xlu0 %3778  ;;  %v5833_v51 = vpop.permute.xlu1 %3773  ;;  %v2949_v60 = vpack.c.bf16 %v2009_v9, %v1976_v21  ;;  %v1975_v18 = vsel %vm6667_vm12, %v6435_v49, %v3760_v33  ;;  %vm6671_vm12 = vmmov %vm6665_vm5 }
 0x49f   :  { %v6436_v59 = vunpack.i.h.bf16 %v5831_v12  ;;  %v3780_v11 = vunpack.i.l.bf16 %v5831_v12  ;;  %v3776_v20 = vunpack.i.h.bf16 %v5833_v51  ;;  %v6437_v24 = vunpack.i.l.bf16 %v5833_v51 }
 0x4a0   :  { %2138 = vrot.lane.b32.xlu0 %v5555_v22, %s6471_s17  ;;  %2105 = vrot.lane.b32.xlu1 %v5555_v22, %s6473_s16  ;;  %v1977_v49 = vsel %vm6671_vm12, %v3761_v0, %v3771_v42 }
 0x4a1   :  { %v5850_v21 = vsel %vm6668_vm7, %v3780_v11, %v6436_v59  ;;  %v2008_v9 = vsel %vm6669_vm4, %v6437_v24, %v3765_v31  ;;  %2950 = vmatprep.subr.bf16.mxu0 %v2949_v60  ;;  %v2010_v16 = vsel %vm6670_vm6, %v3766_v50, %v3776_v20  ;;  %v1978_v32 = vsel %vm6665_vm5, %v3771_v42, %v3780_v11 }
 0x4a2   :  { %v2951_v57 = vpack.c.bf16 %v2008_v9, %v1975_v18  ;;  %v3784_v40 = vpop.permute.xlu0 %3783  ;;  %v5856_v23 = vpop.permute.xlu1 %2000  ;;  %v2999_v31 = vpack.c.bf16 %v2010_v16, %v1977_v49  ;;  %vm6673_vm7 = vcmask 687104   ;;  %vm6674_vm4 = vcmask 556032  }
 0x4a3   :  { %v2011_v33 = vsel %vm6666_vm1, %v3776_v20, %v5856_v23  ;;  %v3786_v50 = vunpack.i.h.bf16 %v3784_v40  ;;  %v3785_v60 = vunpack.i.l.bf16 %v3784_v40  ;;  %vm6677_vm6 = vmmov %vm6673_vm7 }
 0x4a4   :  { %v2997_v59 = vpack.c.bf16 %v2011_v33, %v1978_v32  ;;  %3973 = vrot.lane.b32.xlu0 %v5769_v46, %s6474_s18  ;;  %3968 = vrot.lane.b32.xlu1 %v5769_v46, %s6476_s30  ;;  %vm6678_vm5 = vmmov %vm6674_vm4 }
 0x4a5   :  { %2952 = vmatpush1.bf16.msra.mxu0 %v2951_v57  ;;  %v2042_v0 = vsel %vm6673_vm7, %v3785_v60, %v3786_v50  ;;  %vm6679_vm1 = vmmov %vm6674_vm4 }
 0x4a6   :  { %v5866_v18 = vpop.permute.xlu0 %3793  ;;  %v3789_v9 = vpop.permute.xlu1 %3788  ;;  %2998 = vmatprep.subr.bf16.mxu1 %v2997_v59  ;;  %vm6680_vm12 = vmmov %vm6677_vm6 }
 0x4a7   :  { %6672 = vst [vmem:[#allocation9_spill] sm:$0xff] %v5866_v18  ;;  %v3791_v11 = vunpack.i.h.bf16 %v3789_v9  ;;  %v3790_v24 = vunpack.i.l.bf16 %v3789_v9  ;;  %3000 = vmatpush1.bf16.msra.mxu1 %v2999_v31  ;;  %v6442_v32 = vunpack.i.l.bf16 %v5866_v18  ;;  %v3796_v42 = vunpack.i.h.bf16 %v5866_v18  ;;  %vm6681_vm7 = vmmov %vm6679_vm1 }
 0x4a8   :  { %2204 = vrot.lane.b32.xlu0 %v5555_v22, %s6474_s18  ;;  %2171 = vrot.lane.b32.xlu1 %v5555_v22, %s6476_s30 }
 0x4a9   :  { %v2075_v40 = vsel %vm6674_vm4, %v3790_v24, %v3791_v11  ;;  %v2041_v33 = vsel %vm6677_vm6, %v6442_v32, %v3785_v60  ;;  %vm6682_vm4 = vmmov %vm6677_vm6  ;;  %vm6696_vm6 = vcmask 375808  }
 0x4aa   :  { %v5875_v57 = vpop.permute.xlu0 %2033  ;;  %v5877_v16 = vpop.permute.xlu1 %3798  ;;  %v2953_v49 = vpack.c.bf16 %v2075_v40, %v2042_v0  ;;  %v2043_v53 = vsel %vm6682_vm4, %v3786_v50, %v3796_v42 }
 0x4ab   :  { %6675 = vst [vmem:[#allocation19_spill] sm:$0xff] %v5877_v16  ;;  %v3801_v59 = vunpack.i.h.bf16 %v5877_v16  ;;  %v6443_v20 = vunpack.i.l.bf16 %v5877_v16  ;;  %v2044_v10 = vsel %vm6680_vm12, %v3796_v42, %v5875_v57 }
 0x4ac   :  { %3983 = vrot.lane.b32.xlu0 %v5769_v46, %s4049_s22  ;;  %3978 = vrot.lane.b32.xlu1 %v5769_v46, %s6676_s25 }
 0x4ad   :  { %v2074_v31 = vsel %vm6678_vm5, %v6443_v20, %v3790_v24  ;;  %2954 = vmatprep.subr.bf16.mxu0 %v2953_v49  ;;  %v2076_v9 = vsel %vm6679_vm1, %v3791_v11, %v3801_v59  ;;  %vm6697_vm5 = vcmask 367616   ;;  %vm6699_vm1 = vmmov %vm6696_vm6 }
 0x4ae   :  { %v2955_v0 = vpack.c.bf16 %v2074_v31, %v2041_v33  ;;  %v3804_v40 = vpop.permute.xlu0 %3803  ;;  %v5893_v61 = vpop.permute.xlu1 %2066  ;;  %v3003_v24 = vpack.c.bf16 %v2076_v9, %v2043_v53  ;;  %vm6700_vm12 = vmmov %vm6697_vm5 }
 0x4af   :  { %v2077_v34 = vsel %vm6681_vm7, %v3801_v59, %v5893_v61  ;;  %v3806_v11 = vunpack.i.h.bf16 %v3804_v40  ;;  %v3805_v49 = vunpack.i.l.bf16 %v3804_v40  ;;  %vm6701_vm7 = vmmov %vm6697_vm5 }
 0x4b0   :  { %v3001_v60 = vpack.c.bf16 %v2077_v34, %v2044_v10  ;;  %2270 = vrot.lane.b32.xlu0 %v5555_v22, %s4049_s22  ;;  %2237 = vrot.lane.b32.xlu1 %v5555_v22, %s6676_s25  ;;  %vm6702_vm4 = vmmov %vm6699_vm1 }
 0x4b1   :  { %2956 = vmatpush1.bf16.msra.mxu0 %v2955_v0  ;;  %v2108_v53 = vsel %vm525_vm9, %v3805_v49, %v3806_v11 }
 0x4b2   :  { %v5904_v33 = vpop.permute.xlu0 %3813  ;;  %v3809_v31 = vpop.permute.xlu1 %3808  ;;  %3002 = vmatprep.subr.bf16.mxu1 %v3001_v60 }
 0x4b3   :  { %6683 = vst [vmem:[#allocation12_spill] sm:$0xff] %v5904_v33  ;;  %v3811_v32 = vunpack.i.h.bf16 %v3809_v31  ;;  %v3810_v20 = vunpack.i.l.bf16 %v3809_v31  ;;  %3004 = vmatpush1.bf16.msra.mxu1 %v3003_v24  ;;  %v6447_v34 = vunpack.i.l.bf16 %v5904_v33  ;;  %v3816_v40 = vunpack.i.h.bf16 %v5904_v33 }
 0x4b4   :  { %3993 = vrot.lane.b32.xlu0 %v5769_v46, %s6625_s3  ;;  %3988 = vrot.lane.b32.xlu1 %v5769_v46, %s6623_s0 }
 0x4b5   :  { %v2141_v10 = vsel %vm559_vm11, %v3810_v20, %v3811_v32  ;;  %v2107_v46 = vsel %vm525_vm9, %v6447_v34, %v3805_v49  ;;  %v2109_v33 = vsel %vm525_vm9, %v3806_v11, %v3816_v40 }
 0x4b6   :  { %v5913_v50 = vpop.permute.xlu0 %2099  ;;  %v5915_v59 = vpop.permute.xlu1 %3818  ;;  %v2957_v42 = vpack.c.bf16 %v2141_v10, %v2108_v53 }
 0x4b7   :  { %6684 = vst [vmem:[#allocation20_spill] sm:$0xff] %v5913_v50  ;;  %6685 = vst [vmem:[#allocation16_spill] sm:$0xff] %v5915_v59  ;;  %v3821_v9 = vunpack.i.h.bf16 %v5915_v59  ;;  %v6448_v0 = vunpack.i.l.bf16 %v5915_v59  ;;  %v2110_v18 = vsel %vm525_vm9, %v3816_v40, %v5913_v50 }
 0x4b8   :  { %2336 = vrot.lane.b32.xlu0 %v5555_v22, %s6625_s3  ;;  %2303 = vrot.lane.b32.xlu1 %v5555_v22, %s6623_s0 }
 0x4b9   :  { %v2140_v60 = vsel %vm559_vm11, %v6448_v0, %v3810_v20  ;;  %2958 = vmatprep.subr.bf16.mxu0 %v2957_v42  ;;  %v2142_v24 = vsel %vm559_vm11, %v3811_v32, %v3821_v9 }
 0x4ba   :  { %v2959_v31 = vpack.c.bf16 %v2140_v60, %v2107_v46  ;;  %v3824_v53 = vpop.permute.xlu0 %3823  ;;  %v5931_v10 = vpop.permute.xlu1 %2132  ;;  %v3007_v32 = vpack.c.bf16 %v2142_v24, %v2109_v33  ;;  %v2390_v46 = vld [vmem:[%s6298_s8] sm:$0xff] }
 0x4bb   :  { %6686 = vst [vmem:[#allocation14_spill] sm:$0xff] %v5931_v10  ;;  %v2143_v16 = vsel %vm559_vm11, %v3821_v9, %v5931_v10  ;;  %v3826_v20 = vunpack.i.h.bf16 %v3824_v53  ;;  %v3825_v42 = vunpack.i.l.bf16 %v3824_v53 }
 0x4bc   :  { %v3005_v49 = vpack.c.bf16 %v2143_v16, %v2110_v18  ;;  %2367 = vrot.lane.b32.xlu0 %v5559_v1, %s4054_s24  ;;  %2365 = vrot.lane.b32.xlu1 %v5386_v26, %s4054_s24 }
 0x4bd   :  { %2960 = vmatpush1.bf16.msra.mxu0 %v2959_v31  ;;  %v2174_v33 = vsel %vm586_vm8, %v3825_v42, %v3826_v20 }
 0x4be   :  { %v5945_v60 = vpop.permute.xlu0 %3833  ;;  %v3829_v9 = vpop.permute.xlu1 %3828  ;;  %3006 = vmatprep.subr.bf16.mxu1 %v3005_v49 }
 0x4bf   :  { %6687 = vst [vmem:[#allocation15_spill] sm:$0xff] %v5945_v60  ;;  %v3831_v11 = vunpack.i.h.bf16 %v3829_v9  ;;  %v3830_v18 = vunpack.i.l.bf16 %v3829_v9  ;;  %3008 = vmatpush1.bf16.msra.mxu1 %v3007_v32  ;;  %v6453_v16 = vunpack.i.l.bf16 %v5945_v60  ;;  %v3836_v32 = vunpack.i.h.bf16 %v5945_v60 }
 0x4c0   :  { %2393 = vperm.xlu0 %3591, %v2390_v46   ;;  %2369 = vrot.lane.b32.xlu1 %v5555_v22, %s4054_s24 }
 0x4c1   :  { %v2207_v40 = vsel %vm620_vm10, %v3830_v18, %v3831_v11  ;;  %v2173_v46 = vsel %vm586_vm8, %v6453_v16, %v3825_v42  ;;  %v2175_v60 = vsel %vm586_vm8, %v3826_v20, %v3836_v32 }
 0x4c2   :  { %v5952_v24 = vpop.permute.xlu0 %2165  ;;  %v5954_v31 = vpop.permute.xlu1 %3838  ;;  %v2961_v53 = vpack.c.bf16 %v2207_v40, %v2174_v33 }
 0x4c3   :  { %6688 = vst [vmem:[#allocation21_spill] sm:$0xff] %v5952_v24  ;;  %6689 = vst [vmem:[#allocation18_spill] sm:$0xff] %v5954_v31  ;;  %v3841_v49 = vunpack.i.h.bf16 %v5954_v31  ;;  %v6455_v9 = vunpack.i.l.bf16 %v5954_v31  ;;  %v2176_v40 = vsel %vm586_vm8, %v3836_v32, %v5952_v24 }
 0x4c4   :  { %2962 = vmatprep.subr.bf16.mxu0 %v2961_v53 }
 0x4c5   :  { %v2206_v34 = vsel %vm620_vm10, %v6455_v9, %v3830_v18  ;;  %v2208_v0 = vsel %vm620_vm10, %v3831_v11, %v3841_v49 }
 0x4c6   :  { %v2963_v59 = vpack.c.bf16 %v2206_v34, %v2173_v46  ;;  %v3844_v50 = vpop.permute.xlu0 %3843  ;;  %v5966_v33 = vpop.permute.xlu1 %2198  ;;  %v3011_v42 = vpack.c.bf16 %v2208_v0, %v2175_v60 }
 0x4c7   :  { %6690 = vst [vmem:[#allocation22_spill] sm:$0xff] %v5966_v33  ;;  %v2209_v53 = vsel %vm620_vm10, %v3841_v49, %v5966_v33  ;;  %v3846_v16 = vunpack.i.h.bf16 %v3844_v50  ;;  %v3845_v31 = vunpack.i.l.bf16 %v3844_v50 }
 0x4c8   :  { %v3009_v10 = vpack.c.bf16 %v2209_v53, %v2176_v40  ;;  %2964 = vmatpush1.bf16.msra.mxu0 %v2963_v59 }
 0x4c9   :  { %v2240_v24 = vsel %vm647_vm14, %v3845_v31, %v3846_v16 }
 0x4ca   :  { %v5973_v18 = vpop.permute.xlu0 %3853  ;;  %v3849_v11 = vpop.permute.xlu1 %3848  ;;  %3010 = vmatprep.subr.bf16.mxu1 %v3009_v10 }
 0x4cb   :  { %6691 = vst [vmem:[#allocation24_spill] sm:$0xff] %v5973_v18  ;;  %v3851_v34 = vunpack.i.h.bf16 %v3849_v11  ;;  %v3850_v46 = vunpack.i.l.bf16 %v3849_v11  ;;  %3012 = vmatpush1.bf16.msra.mxu1 %v3011_v42  ;;  %v6459_v9 = vunpack.i.l.bf16 %v5973_v18  ;;  %v3856_v10 = vunpack.i.h.bf16 %v5973_v18 }
 0x4cd   :  { %v2273_v49 = vsel %vm681_vm15, %v3850_v46, %v3851_v34  ;;  %v2239_v60 = vsel %vm647_vm14, %v6459_v9, %v3845_v31 }
 0x4ce   :  { %v5978_v33 = vpop.permute.xlu0 %2231  ;;  %v5980_v20 = vpop.permute.xlu1 %3858  ;;  %v2965_v59 = vpack.c.bf16 %v2273_v49, %v2240_v24 }
 0x4cf   :  { %6692 = vst [vmem:[#allocation23_spill] sm:$0xff] %v5978_v33  ;;  %6693 = vst [vmem:[#allocation25_spill] sm:$0xff] %v5980_v20  ;;  %v3861_v50 = vunpack.i.h.bf16 %v5980_v20  ;;  %v6461_v0 = vunpack.i.l.bf16 %v5980_v20  ;;  %v2242_v11 = vsel %vm647_vm14, %v3856_v10, %v5978_v33 }
 0x4d0   :  { %2966 = vmatprep.subr.bf16.mxu0 %v2965_v59  ;;  %v2241_v59 = vsel %vm647_vm14, %v3846_v16, %v3856_v10 }
 0x4d1   :  { %v2272_v32 = vsel %vm681_vm15, %v6461_v0, %v3850_v46  ;;  %v2274_v40 = vsel %vm681_vm15, %v3851_v34, %v3861_v50 }
 0x4d2   :  { %v2967_v53 = vpack.c.bf16 %v2272_v32, %v2239_v60  ;;  %v3864_v42 = vpop.permute.xlu0 %3863  ;;  %v5992_v24 = vpop.permute.xlu1 %2264  ;;  %v3015_v31 = vpack.c.bf16 %v2274_v40, %v2241_v59 }
 0x4d3   :  { %6694 = vst [vmem:[#allocation26_spill] sm:$0xff] %v5992_v24  ;;  %v2275_v49 = vsel %vm681_vm15, %v3861_v50, %v5992_v24  ;;  %v3866_v9 = vunpack.i.h.bf16 %v3864_v42  ;;  %v3865_v20 = vunpack.i.l.bf16 %v3864_v42 }
 0x4d4   :  { %v3013_v18 = vpack.c.bf16 %v2275_v49, %v2242_v11  ;;  %2968 = vmatpush1.bf16.msra.mxu0 %v2967_v53 }
 0x4d5   :  { %v2306_v33 = vsel %vm6696_vm6, %v3865_v20, %v3866_v9  ;;  %vm6703_vm6 = vmmov %vm6697_vm5 }
 0x4d6   :  { %v5999_v46 = vpop.permute.xlu0 %3873  ;;  %v3869_v34 = vpop.permute.xlu1 %3868  ;;  %3014 = vmatprep.subr.bf16.mxu1 %v3013_v18 }
 0x4d7   :  { %6695 = vst [vmem:[#allocation27_spill] sm:$0xff] %v5999_v46  ;;  %v3871_v60 = vunpack.i.h.bf16 %v3869_v34  ;;  %v3870_v32 = vunpack.i.l.bf16 %v3869_v34  ;;  %3016 = vmatpush1.bf16.msra.mxu1 %v3015_v31  ;;  %v6465_v0 = vunpack.i.l.bf16 %v5999_v46  ;;  %v3876_v18 = vunpack.i.h.bf16 %v5999_v46 }
 0x4d9   :  { %v2339_v50 = vsel %vm6697_vm5, %v3870_v32, %v3871_v60  ;;  %v2305_v42 = vsel %vm6699_vm1, %v6465_v0, %v3865_v20  ;;  %vm6704_vm5 = vmmov %vm6699_vm1  ;;  %v3606_v0 = vunpack.i.h.bf16 %v5505_v56  ;;  %vm6709_vm1 = vcmask 1022976  }
 0x4da   :  { %v6004_v24 = vpop.permute.xlu0 %2297  ;;  %v6006_v16 = vpop.permute.xlu1 %3878  ;;  %v2969_v10 = vpack.c.bf16 %v2339_v50, %v2306_v33 }
 0x4db   :  { %6698 = vst [vmem:[#allocation28_spill] sm:$0xff] %v6006_v16  ;;  %v3881_v40 = vunpack.i.h.bf16 %v6006_v16  ;;  %v6466_v53 = vunpack.i.l.bf16 %v6006_v16  ;;  %v2308_v34 = vsel %vm6702_vm4, %v3876_v18, %v6004_v24  ;;  %v6705_v16 = vunpack.i.l.bf16 %v5505_v56 }
 0x4dc   :  { %2970 = vmatprep.subr.bf16.mxu0 %v2969_v10  ;;  %v2307_v10 = vsel %vm6704_vm5, %v3866_v9, %v3876_v18 }
 0x4dd   :  { %v2338_v11 = vsel %vm6700_vm12, %v6466_v53, %v3870_v32  ;;  %v2340_v49 = vsel %vm6701_vm7, %v3871_v60, %v3881_v40  ;;  %vm6712_vm12 = vmmov %vm6709_vm1  ;;  %vm6717_vm7 = vcmask 1014784  }
 0x4de   :  { %v2971_v59 = vpack.c.bf16 %v2338_v11, %v2305_v42  ;;  %v3884_v31 = vpop.permute.xlu0 %3883  ;;  %v6018_v33 = vpop.permute.xlu1 %2330  ;;  %v3019_v32 = vpack.c.bf16 %v2340_v49, %v2307_v10  ;;  %v6036_v49 = vld [vmem:[%s6297_s7] sm:$0xff]  ;;  %vm6719_vm4 = vmmov %vm6717_vm7 }
 0x4df   :  { %v2341_v50 = vsel %vm6703_vm6, %v3881_v40, %v6018_v33  ;;  %v3885_v46 = vunpack.i.l.bf16 %v3884_v31  ;;  %v1616_v40 = vsel %vm71_vm0, %v6705_v16, %v3606_v0  ;;  %v3886_v10 = vunpack.i.h.bf16 %v3884_v31  ;;  %vm6725_vm5 = vmmov %vm6719_vm4 }
 0x4e0   :  { %v3017_v20 = vpack.c.bf16 %v2341_v50, %v2308_v34  ;;  %2972 = vmatpush1.bf16.msra.mxu0 %v2971_v59  ;;  %v3023_v50 = vpack.c.bf16 %v1616_v40, %v5382_v36  ;;  %v6708_v36 = vunpack.i.h.bf16 %v5551_v28  ;;  %vm6720_vm6 = vcmask 883712  }
 0x4e1   :  { %v1617_v11 = vsel %vm71_vm0, %v3606_v0, %v3885_v46 }
 0x4e2   :  { %v2360_v53 = vpop.permute.xlu0 %2359  ;;  %v2358_v60 = vpop.permute.xlu1 %2357  ;;  %3018 = vmatprep.subr.bf16.mxu1 %v3017_v20  ;;  %v3021_v34 = vpack.c.bf16 %v1617_v11, %v5386_v26  ;;  %v6710_v11 = vunpack.i.l.bf16 %v5492_v44 }
 0x4e3   :  { %3020 = vmatpush1.bf16.msra.mxu1 %v3019_v32  ;;  %v2372_v42 = vsel %vm769_vm13, %v2358_v60, %v2360_v53 }
 0x4e4   :  { %2448 = vmatprep.subr.mxu0 %v2372_v42  ;;  %v1628_v40 = vsel %vm71_vm0, %v3886_v10, %v6710_v11 }
 0x4e5   :  { %v3069_v44 = vpack.c.bf16 %v1628_v40, %v5555_v22 }
 0x4e6   :  { %v3889_v9 = vpop.permute.xlu0 %3888  ;;  %v6031_v18 = vpop.permute.xlu1 %2355 }
 0x4e7   :  { %6706 = vst [vmem:[#allocation29_spill] sm:$0xff] %v6031_v18  ;;  %v2371_v59 = vsel %vm769_vm13, %v6031_v18, %v2358_v60  ;;  %v3890_v56 = vunpack.i.l.bf16 %v3889_v9  ;;  %v3891_v42 = vunpack.i.h.bf16 %v3889_v9  ;;  %v6707_v60 = vunpack.i.h.bf16 %v5530_v30 }
 0x4e8   :  { %2449 = vmatpush1.msra.mxu0 %v2371_v59  ;;  %v1618_v59 = vsel %vm71_vm0, %v3885_v46, %v3886_v10  ;;  %v6711_v30 = vunpack.i.l.bf16 %v5532_v14  ;;  %vm6713_vm0 = vmmov %vm6709_vm1  ;;  %v6715_v14 = vunpack.i.l.bf16 %v5519_v55  ;;  %v6716_v55 = vunpack.i.h.bf16 %v5607_v38 }
 0x4e9   :  { %2465 = vmatmul.mubr.f32.vlgmr.msra.gmra.mrb[4].mxu0 %v6036_v49  ;;  %3022 = vmatprep.subr.bf16.mxu0 %v3021_v34  ;;  %v1650_v26 = vsel %vm98_vm2, %v6707_v60, %v3890_v56  ;;  %v3071_v46 = vpack.c.bf16 %v1618_v59, %v5559_v1  ;;  %v1651_v22 = vsel %vm98_vm2, %v3890_v56, %v3891_v42 }
 0x4ea   :  { %v2362_v0 = vpop.permute.xlu0 %2361  ;;  %v3894_v16 = vpop.permute.xlu1 %3893  ;;  %3024 = vmatpush1.bf16.msra.mxu0 %v3023_v50  ;;  %2827 = vmatprep.mubr.msk.f32.mxu0 %vm2396_vm3, %v5585_v63 }
 0x4eb   :  { %v3896_v20 = vunpack.i.h.bf16 %v3894_v16  ;;  %v3895_v32 = vunpack.i.l.bf16 %v3894_v16  ;;  %v2373_v28 = vsel %vm769_vm13, %v2360_v53, %v2362_v0 }
 0x4ed   :  { %v1683_v31 = vsel %vm6709_vm1, %v6708_v36, %v3895_v32  ;;  %v1694_v16 = vsel %vm6712_vm12, %v3896_v20, %v6711_v30  ;;  %v1684_v10 = vsel %vm6713_vm0, %v3895_v32, %v3896_v20  ;;  %v6718_v32 = vunpack.i.l.bf16 %v5587_v19 }
 0x4ee   :  { %v3899_v34 = vpop.permute.xlu0 %3898  ;;  %v6055_v50 = vpop.permute.xlu1 %2363  ;;  %v3025_v18 = vpack.c.bf16 %v1683_v31, %v1650_v26  ;;  %v6714_v26 = vpack.c.bf16 %v5579_v25, %v5566_v41  ;;  %v1661_v31 = vsel %vm98_vm2, %v3891_v42, %v6715_v14  ;;  %v3075_v41 = vpack.c.bf16 %v1684_v10, %v1651_v22  ;;  %vm6722_vm2 = vmmov %vm6720_vm6 }
 0x4ef   :  { %v2374_v9 = vsel %vm769_vm13, %v2362_v0, %v6055_v50  ;;  %v3901_v60 = vunpack.i.h.bf16 %v3899_v34  ;;  %v3900_v36 = vunpack.i.l.bf16 %v3899_v34  ;;  %v6721_v42 = vunpack.i.h.bf16 %v5628_v13 }
 0x4f0   :  { %2519 = vmatprep.subr.mxu1 %v2374_v9  ;;  %3026 = vmatprep.subr.bf16.mxu0 %v3025_v18  ;;  %v3073_v18 = vpack.c.bf16 %v1694_v16, %v1661_v31  ;;  %v6726_v13 = vunpack.i.h.bf16 %v5663_v39  ;;  %vm6727_vm1 = vcmask 875520   ;;  %vm6728_vm12 = vcmask 867328  }
 0x4f1   :  { %2520 = vmatpush1.msra.mxu1 %v2373_v28  ;;  %3028 = vmatpush1.bf16.msra.mxu0 %v6714_v26  ;;  %v1716_v20 = vsel %vm6717_vm7, %v6716_v55, %v3900_v36  ;;  %v1727_v40 = vsel %vm6719_vm4, %v3901_v60, %v6718_v32  ;;  %vm6731_vm0 = vmmov %vm6728_vm12  ;;  %v6734_v22 = vunpack.i.l.bf16 %v5665_v4  ;;  %v6739_v4 = vpack.c.bf16 %v5704_v15, %v5681_v17 }
 0x4f2   :  { %v3909_v53 = vpop.permute.xlu0 %3908  ;;  %v3904_v0 = vpop.permute.xlu1 %3903  ;;  %2536 = vmatmul.mubr.f32.vlgmr.msra.gmra.mrb[4].mxu1 %v6036_v49  ;;  %3070 = vmatprep.subr.bf16.mxu1 %v3069_v44  ;;  %v1717_v44 = vsel %vm6725_vm5, %v3900_v36, %v3901_v60  ;;  %v6730_v60 = vunpack.i.h.bf16 %v5689_v29  ;;  %vm6733_vm7 = vmmov %vm6727_vm1 }
 0x4f3   :  { %v3906_v1 = vunpack.i.h.bf16 %v3904_v0  ;;  %v3905_v11 = vunpack.i.l.bf16 %v3904_v0  ;;  %3072 = vmatpush1.bf16.msra.mxu1 %v3071_v46  ;;  %2828 = vmatprep.mubr.msk.f32.mxu1 %vm2396_vm3, %v5585_v63  ;;  %v3910_v25 = vunpack.i.l.bf16 %v3909_v53  ;;  %v3911_v59 = vunpack.i.h.bf16 %v3909_v53  ;;  %vm6724_vm3 = vmmov %vm6722_vm2 }
 0x4f4   :  { %3074 = vmatprep.subr.bf16.mxu1 %v3073_v18  ;;  %v6723_v63 = vunpack.i.l.bf16 %v5609_v27  ;;  %v6729_v53 = vpack.c.bf16 %v5648_v8, %v5635_v3  ;;  %v6732_v0 = vunpack.i.l.bf16 %v5651_v7  ;;  %vm6735_vm4 = vmmov %vm6731_vm0  ;;  %v6737_v7 = vunpack.i.h.bf16 %v5719_v58 }
 0x4f5   :  { %v1750_v56 = vsel %vm6720_vm6, %v3905_v11, %v3906_v1  ;;  %v1749_v34 = vsel %vm6722_vm2, %v6721_v42, %v3905_v11  ;;  %v1782_v27 = vsel %vm6727_vm1, %v6726_v13, %v3910_v25  ;;  %vm6736_vm6 = vmmov %vm6727_vm1  ;;  %vm6738_vm2 = vcmask 859136  }
 0x4f6   :  { %v1760_v9 = vsel %vm6724_vm3, %v3906_v1, %v6723_v63  ;;  %v3919_v30 = vpop.permute.xlu0 %3918  ;;  %v3914_v16 = vpop.permute.xlu1 %3913  ;;  %v3029_v38 = vpack.c.bf16 %v1749_v34, %v1716_v20  ;;  %v3079_v10 = vpack.c.bf16 %v1750_v56, %v1717_v44  ;;  %v1793_v18 = vsel %vm6733_vm7, %v3911_v59, %v6732_v0  ;;  %vm6743_vm5 = vmmov %vm6738_vm2 }
 0x4f7   :  { %v3077_v28 = vpack.c.bf16 %v1760_v9, %v1727_v40  ;;  %v3916_v19 = vunpack.i.h.bf16 %v3914_v16  ;;  %v3915_v46 = vunpack.i.l.bf16 %v3914_v16  ;;  %3076 = vmatpush1.bf16.msra.mxu1 %v3075_v41  ;;  %v3921_v26 = vunpack.i.h.bf16 %v3919_v30 }
 0x4f8   :  { %v3920_v14 = vunpack.i.l.bf16 %v3919_v30  ;;  %3030 = vmatprep.subr.bf16.mxu0 %v3029_v38  ;;  %v1783_v20 = vsel %vm6736_vm6, %v3910_v25, %v3911_v59  ;;  %v6740_v56 = vunpack.i.h.bf16 %v5745_v6  ;;  %vm6741_vm3 = vcmask 850944  }
 0x4f9   :  { %3078 = vmatprep.subr.bf16.mxu1 %v3077_v28  ;;  %v1816_v31 = vsel %vm6728_vm12, %v3915_v46, %v3916_v19  ;;  %3032 = vmatpush1.bf16.msra.mxu0 %v6729_v53  ;;  %v1815_v36 = vsel %vm6731_vm0, %v6730_v60, %v3915_v46  ;;  %v1826_v39 = vsel %vm6735_vm4, %v3916_v19, %v6734_v22  ;;  %v6742_v25 = vunpack.i.l.bf16 %v5709_v43  ;;  %vm6745_vm1 = vmmov %vm6741_vm3 }
 0x4fa   :  { %v3929_v1 = vpop.permute.xlu0 %3928  ;;  %v3924_v11 = vpop.permute.xlu1 %3923  ;;  %v3033_v41 = vpack.c.bf16 %v1815_v36, %v1782_v27  ;;  %v3081_v55 = vpack.c.bf16 %v1826_v39, %v1793_v18  ;;  %v3083_v29 = vpack.c.bf16 %v1816_v31, %v1783_v20  ;;  %v1848_v32 = vsel %vm6738_vm2, %v6737_v7, %v3920_v14  ;;  %vm6746_vm12 = vmmov %vm6745_vm1 }
 0x4fb   :  { %v3926_v3 = vunpack.i.h.bf16 %v3924_v11  ;;  %v3925_v8 = vunpack.i.l.bf16 %v3924_v11  ;;  %3080 = vmatpush1.bf16.msra.mxu1 %v3079_v10  ;;  %v3930_v40 = vunpack.i.l.bf16 %v3929_v1  ;;  %v1859_v59 = vsel %vm6743_vm5, %v3921_v26, %v6742_v25  ;;  %vm6747_vm0 = vmmov %vm6738_vm2 }
 0x4fc   :  { %3034 = vmatprep.subr.bf16.mxu0 %v3033_v41  ;;  %3082 = vmatprep.subr.bf16.mxu1 %v3081_v55  ;;  %v6744_v34 = vunpack.i.l.bf16 %v5721_v2  ;;  %v3931_v58 = vunpack.i.h.bf16 %v3929_v1  ;;  %v1849_v6 = vsel %vm6747_vm0, %v3920_v14, %v3921_v26  ;;  %vm6748_vm7 = vcmask 711680  }
 0x4fd   :  { %3036 = vmatpush1.bf16.msra.mxu0 %v6739_v4  ;;  %v1881_v42 = vsel %vm6741_vm3, %v6740_v56, %v3925_v8  ;;  %v1882_v9 = vsel %vm6746_vm12, %v3925_v8, %v3926_v3  ;;  %v6749_v46 = vpack.c.bf16 %v5760_v52, %v5737_v62  ;;  %v6750_v10 = vunpack.i.h.bf16 %v5779_v45  ;;  %vm6753_vm6 = vmmov %vm6748_vm7 }
 0x4fe   :  { %v1892_v63 = vsel %vm6745_vm1, %v3926_v3, %v6744_v34  ;;  %v3939_v30 = vpop.permute.xlu0 %3938  ;;  %v3934_v16 = vpop.permute.xlu1 %3933  ;;  %v3037_v38 = vpack.c.bf16 %v1881_v42, %v1848_v32  ;;  %v3087_v19 = vpack.c.bf16 %v1882_v9, %v1849_v6  ;;  %vm6751_vm4 = vcmask 719872   ;;  %vm6758_vm5 = vmmov %vm6753_vm6 }
 0x4ff   :  { %v3085_v17 = vpack.c.bf16 %v1892_v63, %v1859_v59  ;;  %v3936_v15 = vunpack.i.h.bf16 %v3934_v16  ;;  %v3935_v28 = vunpack.i.l.bf16 %v3934_v16  ;;  %3084 = vmatpush1.bf16.msra.mxu1 %v3083_v29  ;;  %v3941_v44 = vunpack.i.h.bf16 %v3939_v30  ;;  %vm6754_vm2 = vmmov %vm6751_vm4 }
 0x500   :  { %v3940_v43 = vunpack.i.l.bf16 %v3939_v30  ;;  %3038 = vmatprep.subr.bf16.mxu0 %v3037_v38  ;;  %v1914_v13 = vsel %vm6751_vm4, %v6750_v10, %v3930_v40  ;;  %v6752_v27 = vunpack.i.h.bf16 %v5803_v35  ;;  %v1915_v26 = vsel %vm6754_vm2, %v3930_v40, %v3931_v58  ;;  %vm6756_vm3 = vmmov %vm6754_vm2  ;;  %v6775_v30 = vld [vmem:[#allocation19_spill] sm:$0xff] }
 0x501   :  { %3086 = vmatprep.subr.bf16.mxu1 %v3085_v17  ;;  %v1948_v2 = vsel %vm6748_vm7, %v3935_v28, %v3936_v15  ;;  %3040 = vmatpush1.bf16.msra.mxu0 %v6749_v46  ;;  %v6755_v36 = vunpack.i.l.bf16 %v5765_v48  ;;  %v6757_v62 = vunpack.i.l.bf16 %v5781_v37  ;;  %v6759_v45 = vunpack.i.l.bf16 %v5833_v51  ;;  %v6779_v17 = vld [vmem:[#allocation9_spill] sm:$0xff] }
 0x502   :  { %v1947_v31 = vsel %vm6753_vm6, %v6752_v27, %v3935_v28  ;;  %v2007_v14 = vpop.permute.xlu0 %2006  ;;  %v3944_v53 = vpop.permute.xlu1 %3943  ;;  %vm6760_vm1 = vcmask 695296   ;;  %v3091_v1 = vpack.c.bf16 %v1948_v2, %v1915_v26  ;;  %v6761_v11 = vunpack.i.l.bf16 %v5821_v47 }
 0x503   :  { %v3041_v60 = vpack.c.bf16 %v1947_v31, %v1914_v13  ;;  %v1925_v0 = vsel %vm6756_vm3, %v3931_v58, %v6755_v36  ;;  %v1958_v52 = vsel %vm6758_vm5, %v3936_v15, %v6757_v62  ;;  %v2024_v18 = vsel %vm6760_vm1, %v2007_v14, %v6759_v45  ;;  %3088 = vmatpush1.bf16.msra.mxu1 %v3087_v19  ;;  %vm6765_vm7 = vmmov %vm6760_vm1  ;;  %v6782_v13 = vld [vmem:[#allocation14_spill] sm:$0xff]  ;;  %v6783_v31 = vld [vmem:[#allocation20_spill] sm:$0xff] }
 0x504   :  { %v3946_v35 = vunpack.i.h.bf16 %v3944_v53  ;;  %v3945_v22 = vunpack.i.l.bf16 %v3944_v53  ;;  %v3089_v39 = vpack.c.bf16 %v1958_v52, %v1925_v0  ;;  %vm6762_vm12 = vcmask 703488   ;;  %vm6766_vm4 = vmmov %vm6760_vm1  ;;  %v6784_v45 = vld [vmem:[#allocation16_spill] sm:$0xff] }
 0x505   :  { %v1991_v41 = vsel %vm6762_vm12, %v3941_v44, %v6761_v11  ;;  %3042 = vmatprep.subr.bf16.mxu0 %v3041_v60  ;;  %v6763_v48 = vunpack.i.h.bf16 %v5831_v12  ;;  %vm6764_vm0 = vmmov %vm6762_vm12  ;;  %v6767_v20 = vpack.c.bf16 %v5816_v5, %v5797_v54  ;;  %vm6770_vm3 = vcmask 556032  }
 0x506   :  { %v2014_v55 = vsel %vm6765_vm7, %v3946_v35, %v2007_v14  ;;  %v2012_v51 = vsel %vm6766_vm4, %v5856_v23, %v3945_v22  ;;  %3090 = vmatprep.subr.bf16.mxu1 %v3089_v39  ;;  %vm6768_vm6 = vmmov %vm6760_vm1  ;;  %v3093_v8 = vpack.c.bf16 %v2024_v18, %v1991_v41  ;;  %v3954_v12 = vpop.permute.xlu0 %3953  ;;  %v3949_v7 = vpop.permute.xlu1 %3948  ;;  %vm6771_vm5 = vcmask 687104   ;;  %v6786_v39 = vld [vmem:[#allocation12_spill] sm:$0xff] }
 0x507   :  { %v1980_v37 = vsel %vm6764_vm0, %v6763_v48, %v3940_v43  ;;  %3044 = vmatpush1.bf16.msra.mxu0 %v6767_v20  ;;  %v2013_v3 = vsel %vm6768_vm6, %v3945_v22, %v3946_v35  ;;  %vm6769_vm2 = vmmov %vm6764_vm0  ;;  %v3047_v29 = vpack.c.bf16 %v2012_v51, %v5850_v21  ;;  %v3956_v40 = vunpack.i.h.bf16 %v3954_v12  ;;  %3092 = vmatpush1.bf16.msra.mxu1 %v3091_v1 }
 0x508   :  { %v1981_v47 = vsel %vm6769_vm2, %v3940_v43, %v3941_v44  ;;  %v3045_v32 = vpack.c.bf16 %v2013_v3, %v1980_v37  ;;  %v3955_v4 = vunpack.i.l.bf16 %v3954_v12  ;;  %v3951_v56 = vunpack.i.h.bf16 %v3949_v7  ;;  %3094 = vmatprep.subr.bf16.mxu1 %v3093_v8  ;;  %vm6772_vm1 = vmmov %vm6771_vm5  ;;  %v6788_v8 = vld [vmem:[#allocation22_spill] sm:$0xff]  ;;  %v6789_v12 = vld [vmem:[#allocation21_spill] sm:$0xff] }
 0x509   :  { %v3950_v42 = vunpack.i.l.bf16 %v3949_v7  ;;  %v3095_v23 = vpack.c.bf16 %v2014_v55, %v1981_v47  ;;  %vm6773_vm12 = vmmov %vm6770_vm3  ;;  %v6776_v16 = vunpack.i.l.bf16 %v6775_v30  ;;  %v6780_v15 = vunpack.i.l.bf16 %v6779_v17 }
 0x50a   :  { %3046 = vmatprep.subr.bf16.mxu0 %v3045_v32  ;;  %v2078_v54 = vsel %vm6770_vm3, %v5893_v61, %v3955_v4  ;;  %v2079_v25 = vsel %vm6773_vm12, %v3955_v4, %v3956_v40  ;;  %v2073_v34 = vpop.permute.xlu0 %2072  ;;  %v2040_v63 = vpop.permute.xlu1 %2039  ;;  %vm6774_vm0 = vmmov %vm6770_vm3  ;;  %v6785_v18 = vunpack.i.l.bf16 %v6784_v45  ;;  %v6787_v1 = vunpack.i.l.bf16 %v6786_v39 }
 0x50b   :  { %v2045_v5 = vsel %vm6771_vm5, %v5875_v57, %v3950_v42  ;;  %3048 = vmatpush1.bf16.msra.mxu0 %v3047_v29  ;;  %v2046_v21 = vsel %vm6772_vm1, %v3950_v42, %v3951_v56  ;;  %v2080_v9 = vsel %vm6774_vm0, %v3956_v40, %v2073_v34  ;;  %vm6777_vm7 = vmmov %vm6774_vm0  ;;  %3096 = vmatpush1.bf16.msra.mxu1 %v3095_v23 }
 0x50c   :  { %v3051_v59 = vpack.c.bf16 %v2078_v54, %v2045_v5  ;;  %v3049_v58 = vpack.c.bf16 %v2079_v25, %v2046_v21  ;;  %v2090_v38 = vsel %vm6777_vm7, %v2073_v34, %v6776_v16  ;;  %vm6778_vm4 = vmmov %vm6772_vm1  ;;  %v6790_v5 = vld [vmem:[#allocation18_spill] sm:$0xff]  ;;  %v6792_v34 = vld [vmem:[#allocation15_spill] sm:$0xff] }
 0x50d   :  { %v2047_v61 = vsel %vm6778_vm4, %v3951_v56, %v2040_v63  ;;  %vm6781_vm6 = vmmov %vm6772_vm1  ;;  %v6791_v21 = vunpack.i.l.bf16 %v6790_v5 }
 0x50e   :  { %v2057_v57 = vsel %vm6781_vm6, %v2040_v63, %v6780_v15  ;;  %v3099_v6 = vpack.c.bf16 %v2080_v9, %v2047_v61  ;;  %3050 = vmatprep.subr.bf16.mxu0 %v3049_v58  ;;  %v3964_v44 = vpop.permute.xlu0 %3963  ;;  %v3959_v43 = vpop.permute.xlu1 %3958  ;;  %v6793_v63 = vunpack.i.l.bf16 %v6792_v34 }
 0x50f   :  { %v3097_v28 = vpack.c.bf16 %v2090_v38, %v2057_v57  ;;  %3052 = vmatpush1.bf16.msra.mxu0 %v3051_v59  ;;  %v3966_v19 = vunpack.i.h.bf16 %v3964_v44  ;;  %v3965_v2 = vunpack.i.l.bf16 %v3964_v44  ;;  %v3961_v46 = vunpack.i.h.bf16 %v3959_v43  ;;  %v6795_v44 = vld [vmem:[#allocation23_spill] sm:$0xff] }
 0x510   :  { %v3960_v10 = vunpack.i.l.bf16 %v3959_v43 }
 0x511   :  { %3098 = vmatprep.subr.bf16.mxu1 %v3097_v28  ;;  %v2144_v27 = vsel %vm559_vm11, %v6782_v13, %v3965_v2  ;;  %v2145_v53 = vsel %vm559_vm11, %v3965_v2, %v3966_v19  ;;  %v6794_v28 = vld [vmem:[#allocation26_spill] sm:$0xff] }
 0x512   :  { %3100 = vmatpush1.bf16.msra.mxu1 %v3099_v6  ;;  %v2111_v26 = vsel %vm525_vm9, %v6783_v31, %v3960_v10  ;;  %v2112_v14 = vsel %vm525_vm9, %v3960_v10, %v3961_v46  ;;  %v2139_v36 = vpop.permute.xlu0 %2138  ;;  %v2106_v0 = vpop.permute.xlu1 %2105 }
 0x513   :  { %v3055_v60 = vpack.c.bf16 %v2144_v27, %v2111_v26  ;;  %v3053_v62 = vpack.c.bf16 %v2145_v53, %v2112_v14  ;;  %v2146_v52 = vsel %vm559_vm11, %v3966_v19, %v2139_v36  ;;  %v2156_v35 = vsel %vm559_vm11, %v2139_v36, %v6785_v18  ;;  %v6796_v26 = vld [vmem:[#allocation25_spill] sm:$0xff]  ;;  %v6798_v36 = vld [vmem:[#allocation24_spill] sm:$0xff] }
 0x514   :  { %v2113_v22 = vsel %vm525_vm9, %v3961_v46, %v2106_v0  ;;  %v2123_v11 = vsel %vm525_vm9, %v2106_v0, %v6787_v1  ;;  %v6797_v14 = vunpack.i.l.bf16 %v6796_v26  ;;  %v6799_v0 = vunpack.i.l.bf16 %v6798_v36 }
 0x515   :  { %v3101_v41 = vpack.c.bf16 %v2156_v35, %v2123_v11  ;;  %v3103_v48 = vpack.c.bf16 %v2146_v52, %v2113_v22  ;;  %3054 = vmatprep.subr.bf16.mxu0 %v3053_v62  ;;  %vm6801_vm9 = vcmask 375808  }
 0x516   :  { %3056 = vmatpush1.bf16.msra.mxu0 %v3055_v60  ;;  %v3974_v37 = vpop.permute.xlu0 %3973  ;;  %v3969_v55 = vpop.permute.xlu1 %3968  ;;  %vm6808_vm2 = vmmov %vm6801_vm9 }
 0x517   :  { %3102 = vmatprep.subr.bf16.mxu1 %v3101_v41  ;;  %v3976_v51 = vunpack.i.h.bf16 %v3974_v37  ;;  %v3975_v20 = vunpack.i.l.bf16 %v3974_v37  ;;  %v3971_v3 = vunpack.i.h.bf16 %v3969_v55  ;;  %v3970_v47 = vunpack.i.l.bf16 %v3969_v55  ;;  %vm6811_vm3 = vmmov %vm6808_vm2 }
 0x518   :  { %3104 = vmatpush1.bf16.msra.mxu1 %v3103_v48 }
 0x519   :  { %v2210_v29 = vsel %vm620_vm10, %v6788_v8, %v3975_v20  ;;  %v2177_v7 = vsel %vm586_vm8, %v6789_v12, %v3970_v47  ;;  %v2178_v32 = vsel %vm586_vm8, %v3970_v47, %v3971_v3  ;;  %v2211_v40 = vsel %vm620_vm10, %v3975_v20, %v3976_v51 }
 0x51a   :  { %v3059_v4 = vpack.c.bf16 %v2210_v29, %v2177_v7  ;;  %v2205_v56 = vpop.permute.xlu0 %2204  ;;  %v2172_v42 = vpop.permute.xlu1 %2171  ;;  %v3057_v23 = vpack.c.bf16 %v2211_v40, %v2178_v32  ;;  %v6805_v29 = vld [vmem:[#allocation28_spill] sm:$0xff] }
 0x51b   :  { %v2212_v54 = vsel %vm620_vm10, %v3976_v51, %v2205_v56  ;;  %v2222_v25 = vsel %vm620_vm10, %v2205_v56, %v6791_v21  ;;  %v2179_v59 = vsel %vm586_vm8, %v3971_v3, %v2172_v42  ;;  %v2189_v58 = vsel %vm586_vm8, %v2172_v42, %v6793_v63  ;;  %vm6802_vm10 = vmmov %vm6801_vm9 }
 0x51c   :  { %v3105_v9 = vpack.c.bf16 %v2222_v25, %v2189_v58  ;;  %v3107_v30 = vpack.c.bf16 %v2212_v54, %v2179_v59  ;;  %3058 = vmatprep.subr.bf16.mxu0 %v3057_v23  ;;  %vm6800_vm8 = vcmask 367616   ;;  %v6806_v12 = vunpack.i.l.bf16 %v6805_v29  ;;  %v6812_v59 = vld [vmem:[#allocation29_spill] sm:$0xff] }
 0x51d   :  { %3060 = vmatpush1.bf16.msra.mxu0 %v3059_v4  ;;  %vm6803_vm11 = vmmov %vm6800_vm8 }
 0x51e   :  { %v3984_v16 = vpop.permute.xlu0 %3983  ;;  %v3979_v38 = vpop.permute.xlu1 %3978  ;;  %3106 = vmatprep.subr.bf16.mxu1 %v3105_v9 }
 0x51f   :  { %v3986_v61 = vunpack.i.h.bf16 %v3984_v16  ;;  %v3985_v17 = vunpack.i.l.bf16 %v3984_v16  ;;  %v3981_v15 = vunpack.i.h.bf16 %v3979_v38  ;;  %v3980_v57 = vunpack.i.l.bf16 %v3979_v38  ;;  %3108 = vmatpush1.bf16.msra.mxu1 %v3107_v30 }
 0x521   :  { %v2276_v6 = vsel %vm681_vm15, %v6794_v28, %v3985_v17  ;;  %v2243_v43 = vsel %vm647_vm14, %v6795_v44, %v3980_v57  ;;  %v2244_v19 = vsel %vm647_vm14, %v3980_v57, %v3981_v15  ;;  %v2277_v2 = vsel %vm681_vm15, %v3985_v17, %v3986_v61  ;;  %v6813_v17 = vld [vmem:[#allocation5_spill] sm:$0xff]  ;;  %v6814_v57 = vld [vmem:[#allocation11_spill] sm:$0xff] }
 0x522   :  { %v3063_v46 = vpack.c.bf16 %v2276_v6, %v2243_v43  ;;  %v2271_v10 = vpop.permute.xlu0 %2270  ;;  %v2238_v13 = vpop.permute.xlu1 %2237  ;;  %v3061_v27 = vpack.c.bf16 %v2277_v2, %v2244_v19  ;;  %v6815_v6 = vld [vmem:[#allocation17_spill] sm:$0xff] }
 0x523   :  { %v2278_v31 = vsel %vm681_vm15, %v3986_v61, %v2271_v10  ;;  %v2288_v53 = vsel %vm681_vm15, %v2271_v10, %v6797_v14  ;;  %v2245_v60 = vsel %vm647_vm14, %v3981_v15, %v2238_v13  ;;  %v2255_v62 = vsel %vm647_vm14, %v2238_v13, %v6799_v0  ;;  %vm6804_vm14 = vmmov %vm6800_vm8  ;;  %v6816_v10 = vld [vmem:[#allocation10_spill] sm:$0xff] }
 0x524   :  { %v3109_v52 = vpack.c.bf16 %v2288_v53, %v2255_v62  ;;  %v3111_v45 = vpack.c.bf16 %v2278_v31, %v2245_v60  ;;  %3062 = vmatprep.subr.bf16.mxu0 %v3061_v27  ;;  %vm6807_vm15 = vmmov %vm6800_vm8 }
 0x525   :  { %3064 = vmatpush1.bf16.msra.mxu0 %v3063_v46 }
 0x526   :  { %v3994_v18 = vpop.permute.xlu0 %3993  ;;  %v3989_v35 = vpop.permute.xlu1 %3988  ;;  %3110 = vmatprep.subr.bf16.mxu1 %v3109_v52  ;;  %v6817_v52 = vld [vmem:[#allocation8_spill] sm:$0xff] }
 0x527   :  { %v3996_v22 = vunpack.i.h.bf16 %v3994_v18  ;;  %v3995_v39 = vunpack.i.l.bf16 %v3994_v18  ;;  %v3991_v1 = vunpack.i.h.bf16 %v3989_v35  ;;  %v3990_v11 = vunpack.i.l.bf16 %v3989_v35  ;;  %3112 = vmatpush1.bf16.msra.mxu1 %v3111_v45  ;;  %v6818_v18 = vld [vmem:[#allocation6_spill] sm:$0xff] }
 0x529   :  { %v2342_v41 = vsel %vm6800_vm8, %v6018_v33, %v3995_v39  ;;  %v2309_v48 = vsel %vm6801_vm9, %v6004_v24, %v3990_v11  ;;  %v2310_v37 = vsel %vm6802_vm10, %v3990_v11, %v3991_v1  ;;  %v2343_v55 = vsel %vm6803_vm11, %v3995_v39, %v3996_v22  ;;  %v6809_v33 = vld [vmem:[#allocation27_spill] sm:$0xff] }
 0x52a   :  { %v3067_v51 = vpack.c.bf16 %v2342_v41, %v2309_v48  ;;  %v2337_v20 = vpop.permute.xlu0 %2336  ;;  %v2304_v3 = vpop.permute.xlu1 %2303  ;;  %v3065_v47 = vpack.c.bf16 %v2343_v55, %v2310_v37  ;;  %v6810_v40 = vunpack.i.l.bf16 %v6809_v33 }
 0x52b   :  { %v2344_v8 = vsel %vm6804_vm14, %v3996_v22, %v2337_v20  ;;  %v2354_v7 = vsel %vm6807_vm15, %v2337_v20, %v6806_v12  ;;  %v2311_v32 = vsel %vm6808_vm2, %v3991_v1, %v2304_v3 }
 0x52c   :  { %v2321_v24 = vsel %vm6811_vm3, %v2304_v3, %v6810_v40  ;;  %v3115_v56 = vpack.c.bf16 %v2344_v8, %v2311_v32  ;;  %3066 = vmatprep.subr.bf16.mxu0 %v3065_v47  ;;  %v6819_v3 = vld [vmem:[#allocation13_spill] sm:$0xff]  ;;  %v6820_v8 = vld [vmem:[#allocation7_spill] sm:$0xff] }
 0x52d   :  { %v3113_v4 = vpack.c.bf16 %v2354_v7, %v2321_v24  ;;  %3068 = vmatpush1.bf16.msra.mxu0 %v3067_v51 }
 0x52e   :  { %v2368_v42 = vpop.permute.xlu0 %2367  ;;  %v2366_v23 = vpop.permute.xlu1 %2365 }
 0x52f   :  { %3114 = vmatprep.subr.bf16.mxu1 %v3113_v4  ;;  %v2375_v54 = vsel %vm769_vm13, %v6055_v50, %v2366_v23  ;;  %v2376_v5 = vsel %vm769_vm13, %v2366_v23, %v2368_v42 }
 0x530   :  { %3116 = vmatpush1.bf16.msra.mxu1 %v3115_v56  ;;  %2590 = vmatprep.subr.mxu0 %v2376_v5  ;;  %v2747_v56 = vld [vmem:[%s6300_s10] sm:$0xff] }
 0x531   :  { %2591 = vmatpush1.msra.mxu0 %v2375_v54 }
 0x532   :  { %v2370_v21 = vpop.permute.xlu1 %2369  ;;  %2607 = vmatmul.mubr.f32.vlgmr.msra.gmra.mrb[6].mxu0 %v6036_v49 }
 0x533   :  { %v2377_v25 = vsel %vm769_vm13, %v2368_v42, %v2370_v21  ;;  %v2387_v34 = vsel %vm769_vm13, %v2370_v21, %v6812_v59  ;;  %v2769_v42 = vld [vmem:[%s6301_s11] sm:$0xff] }
 0x534   :  { %2661 = vmatprep.subr.mxu1 %v2387_v34 }
 0x535   :  { %2662 = vmatpush1.msra.mxu1 %v2377_v25 }
 0x536   :  { %2678 = vmatmul.mubr.f32.vlgmr.msra.gmra.mrb[6].mxu1 %v6036_v49 }
 0x53f   :  { %v2394_v30 = vpop.permute.xlu0 %2393 }
 0x5bc   :  { %v2466_v63 = vpop.f32.mrb[4].mxu0 }
 0x5bd   :  { %v2468_v58 = vpop.f32.mrb[5].mxu0  ;;  %v6237_v16 = vadd.f32 %v2466_v63, %v2394_v30  ;;  %v2732_v63 = vld [vmem:[%s6299_s9] sm:$0xff]  ;;  %s4057_s9 = smov [#allocation2]  }
 0x5be   :  { %v6239_v38 = vadd.f32 %v2468_v58, %v2394_v30  ;;  %s2805_s10 = sshll.u32 %s4057_s9, 4  ;;  %s2806_s10 = int_to_ptr.vmem [resolvable:$true] %s2805_s10 }
 0x5bf   :  { %v2684_v15 = vmul.f32 %v6237_v16, %v6813_v17  ;;  %s4006_s11 = scalar_lea.vmem %s2806_s10, 1024  ;;  %p4011_p1 = scmp.lt.s32.totalorder %s2806_s10, %s2806_s10 }
 0x5c0   :  { %v2685_v28 = vmul.f32 %v6239_v38, %v6814_v57  ;;  %p4007_p0 = scmp.ne.s32.totalorder %s2806_s10, %s4006_s11  ;;  %p4012_p2 = scmp.lt.s32.totalorder %s4006_s11, %s4006_s11 }
 0x5c1   :  { %v2702_v43 = vmul.f32 %v2684_v15, %v2684_v15 }
 0x5c2   :  { %v2703_v19 = vmul.f32 %v2685_v28, %v2685_v28  ;;  %v2692_v2 = vadd.f32 %v2685_v28, %v2684_v15  ;;  %p4013_p3 = por %p4012_p2, %p4011_p1 }
 0x5c4   :  { %v2710_v27 = vadd.f32 %v2703_v19, %v2702_v43  ;;  %p4014_p4 = pnand %p4013_p3, %p4007_p0 }
 0x5c5   :  { %v2537_v50 = vpop.f32.mrb[4].mxu1 }
 0x5c6   :  { %v2539_v9 = vpop.f32.mrb[5].mxu1  ;;  %v6241_v61 = vadd.f32 %v2537_v50, %v2394_v30 }
 0x5c7   :  { %v6249_v44 = vadd.f32 %v2539_v9, %v2394_v30 }
 0x5c8   :  { %v2686_v49 = vmul.f32 %v6241_v61, %v6815_v6 }
 0x5c9   :  { %v2687_v13 = vmul.f32 %v6249_v44, %v6816_v10 }
 0x5ca   :  { %v2704_v46 = vmul.f32 %v2686_v49, %v2686_v49  ;;  %v2693_v31 = vadd.f32 %v2692_v2, %v2686_v49 }
 0x5cb   :  { %v2705_v53 = vmul.f32 %v2687_v13, %v2687_v13 }
 0x5cc   :  { %v2711_v14 = vadd.f32 %v2710_v27, %v2704_v46  ;;  %v2694_v62 = vadd.f32 %v2693_v31, %v2687_v13 }
 0x5ce   :  { %v2712_v39 = vadd.f32 %v2711_v14, %v2705_v53 }
 0x605   :  { %v2608_v26 = vpop.f32.mrb[6].mxu0 }
 0x606   :  { %v2609_v60 = vadd.f32 %v2608_v26, %v2394_v30  ;;  %v2610_v36 = vpop.f32.mrb[7].mxu0 }
 0x607   :  { %v2611_v0 = vadd.f32 %v2610_v36, %v2394_v30 }
 0x608   :  { %v2688_v45 = vmul.f32 %v2609_v60, %v6817_v52 }
 0x609   :  { %v2689_v35 = vmul.f32 %v2611_v0, %v6818_v18  ;;  %v2679_v22 = vpop.f32.mrb[6].mxu1 }
 0x60a   :  { %v2695_v1 = vadd.f32 %v2694_v62, %v2688_v45  ;;  %v2706_v11 = vmul.f32 %v2688_v45, %v2688_v45  ;;  %v2680_v41 = vadd.f32 %v2679_v22, %v2394_v30  ;;  %v2681_v48 = vpop.f32.mrb[7].mxu1 }
 0x60b   :  { %v2707_v37 = vmul.f32 %v2689_v35, %v2689_v35  ;;  %v2682_v55 = vadd.f32 %v2681_v48, %v2394_v30 }
 0x60c   :  { %v2713_v51 = vadd.f32 %v2712_v39, %v2706_v11  ;;  %v2696_v20 = vadd.f32 %v2695_v1, %v2689_v35  ;;  %v2690_v47 = vmul.f32 %v2680_v41, %v6819_v3 }
 0x60d   :  { %v2691_v29 = vmul.f32 %v2682_v55, %v6820_v8 }
 0x60e   :  { %v2714_v12 = vadd.f32 %v2713_v51, %v2707_v37  ;;  %v2697_v7 = vadd.f32 %v2696_v20, %v2690_v47  ;;  %v2708_v32 = vmul.f32 %v2690_v47, %v2690_v47 }
 0x60f   :  { %v2709_v33 = vmul.f32 %v2691_v29, %v2691_v29 }
 0x610   :  { %v2698_v40 = vadd.f32 %v2697_v7, %v2691_v29  ;;  %v2715_v24 = vadd.f32 %v2714_v12, %v2708_v32 }
 0x612   :  { %2699 = vadd.xlane.f32.xlu1 %v2698_v40  ;;  %v2716_v4 = vadd.f32 %v2715_v24, %v2709_v33 }
 0x614   :  { %2717 = vadd.xlane.f32.xlu0 %v2716_v4 }
 0x623   :  { %2750 = vperm.xlu1 %3590, %v2747_v56  }
 0x627   :  { %2772 = vperm.xlu1 %3590, %v2769_v42  }
 0x69f   :  { %v2700_v23 = vpop.xlane.xlu1 %2699 }
 0x6a0   :  { %v2701_v54 = vmul.f32 0.001953125, %v2700_v23 }
 0x6a1   :  { %v2718_v5 = vpop.xlane.xlu0 %2717 }
 0x6a2   :  { %v2719_v21 = vmul.f32 0.001953125, %v2718_v5  ;;  %v2720_v25 = vmul.f32 %v2701_v54, %v2701_v54  ;;  %v2724_v9 = vsub.f32 %v6237_v16, %v2701_v54  ;;  %v2725_v30 = vsub.f32 %v6239_v38, %v2701_v54 }
 0x6a3   :  { %v2726_v17 = vsub.f32 %v6241_v61, %v2701_v54  ;;  %v2727_v15 = vsub.f32 %v6249_v44, %v2701_v54  ;;  %v2751_v57 = vpop.permute.xlu1 %2750  ;;  %v2728_v28 = vsub.f32 %v2609_v60, %v2701_v54  ;;  %v2729_v6 = vsub.f32 %v2611_v0, %v2701_v54 }
 0x6a4   :  { %v2721_v59 = vsub.f32 %v2719_v21, %v2720_v25  ;;  %v2730_v49 = vsub.f32 %v2680_v41, %v2701_v54  ;;  %v2731_v43 = vsub.f32 %v2682_v55, %v2701_v54 }
 0x6a6   :  { %v2722_v34 = vadd.f32 1e-05, %v2721_v59 }
 0x6a7   :  { %v2773_v0 = vpop.permute.xlu1 %2772 }
 0x6a8   :  { %4003 = vrsqrt.f32 %v2722_v34 }
 0x6b2   :  { %v4004_v58 = vpop.eup %4003 }
 0x6b3   :  { %v2733_v50 = vmul.f32 %v4004_v58, %v2732_v63 }
 0x6b5   :  { %2736 = vperm.xlu0 %3591, %v2733_v50  }
 0x734   :  { %v2737_v19 = vpop.permute.xlu0 %2736 }
 0x735   :  { %v2739_v2 = vmul.f32 %v2737_v19, %v2724_v9  ;;  %v2740_v46 = vmul.f32 %v2737_v19, %v2725_v30  ;;  %v2741_v10 = vmul.f32 %v2737_v19, %v2726_v17  ;;  %v2742_v13 = vmul.f32 %v2737_v19, %v2727_v15 }
 0x736   :  { %v2743_v27 = vmul.f32 %v2737_v19, %v2728_v28  ;;  %v2744_v31 = vmul.f32 %v2737_v19, %v2729_v6  ;;  %v2745_v26 = vmul.f32 %v2737_v19, %v2730_v49  ;;  %v2746_v16 = vmul.f32 %v2737_v19, %v2731_v43 }
 0x737   :  { %v2753_v14 = vadd.f32 %v2751_v57, %v2739_v2  ;;  %v2754_v38 = vadd.f32 %v2751_v57, %v2740_v46  ;;  %v2755_v53 = vadd.f32 %v2751_v57, %v2741_v10  ;;  %v2756_v61 = vadd.f32 %v2751_v57, %v2742_v13 }
 0x738   :  { %v2757_v36 = vadd.f32 %v2751_v57, %v2743_v27  ;;  %v2758_v44 = vadd.f32 %v2751_v57, %v2744_v31  ;;  %v2759_v62 = vadd.f32 %v2751_v57, %v2745_v26  ;;  %v2760_v60 = vadd.f32 %v2751_v57, %v2746_v16 }
 0x739   :  { %vm2761_vm13 = vcmp.ge.f32.partialorder %v2753_v14, 0.0  ;;  %vm2762_vm5 = vcmp.ge.f32.partialorder %v2754_v38, 0.0  ;;  %vm2763_vm1 = vcmp.ge.f32.partialorder %v2755_v53, 0.0  ;;  %vm2764_vm12 = vcmp.ge.f32.partialorder %v2756_v61, 0.0 }
 0x73a   :  { %vm2765_vm0 = vcmp.ge.f32.partialorder %v2757_v36, 0.0  ;;  %vm2766_vm7 = vcmp.ge.f32.partialorder %v2758_v44, 0.0  ;;  %vm2767_vm4 = vcmp.ge.f32.partialorder %v2759_v62, 0.0  ;;  %vm2768_vm6 = vcmp.ge.f32.partialorder %v2760_v60, 0.0 }
 0x73b   :  { %v2775_v52 = vmul.f32 %v2773_v0, %v2753_v14  ;;  %v2776_v45 = vmul.f32 %v2773_v0, %v2754_v38  ;;  %v2777_v18 = vmul.f32 %v2773_v0, %v2755_v53  ;;  %v2778_v35 = vmul.f32 %v2773_v0, %v2756_v61 }
 0x73c   :  { %v2779_v22 = vmul.f32 %v2773_v0, %v2757_v36  ;;  %v2780_v39 = vmul.f32 %v2773_v0, %v2758_v44  ;;  %v2781_v1 = vmul.f32 %v2773_v0, %v2759_v62  ;;  %v2782_v11 = vmul.f32 %v2773_v0, %v2760_v60 }
 0x73d   :  { %v2783_v41 = vsel %vm2761_vm13, %v2753_v14, %v2775_v52  ;;  %v2784_v48 = vsel %vm2762_vm5, %v2754_v38, %v2776_v45  ;;  %v2785_v37 = vsel %vm2763_vm1, %v2755_v53, %v2777_v18  ;;  %v2786_v55 = vsel %vm2764_vm12, %v2756_v61, %v2778_v35 }
 0x73e   :  { %v2787_v51 = vsel %vm2765_vm0, %v2757_v36, %v2779_v22  ;;  %v2788_v20 = vsel %vm2766_vm7, %v2758_v44, %v2780_v39  ;;  %v2789_v3 = vsel %vm2767_vm4, %v2759_v62, %v2781_v1  ;;  %v2790_v47 = vsel %vm2768_vm6, %v2760_v60, %v2782_v11  ;;  %2791 = vst [vmem:[#allocation2] sm:$0xff] %v2783_v41 }
 0x73f   :  { %2792 = vst [vmem:[#allocation2 + $0x8] sm:$0xff] %v2784_v48  ;;  %2793 = vst [vmem:[#allocation2 + $0x10] sm:$0xff] %v2785_v37 }
 0x740   :  { %2794 = vst [vmem:[#allocation2 + $0x18] sm:$0xff] %v2786_v55  ;;  %2795 = vst [vmem:[#allocation2 + $0x20] sm:$0xff] %v2787_v51 }
 0x741   :  { %2796 = vst [vmem:[#allocation2 + $0x28] sm:$0xff] %v2788_v20  ;;  %2797 = vst [vmem:[#allocation2 + $0x30] sm:$0xff] %v2789_v3 }
 0x742   :  { %2798 = vst [vmem:[#allocation2 + $0x38] sm:$0xff] %v2790_v47 }
 0x743   :  { %4017 = shalt.err (!%p4014_p4)
}
 0x744   :  { %s4018_s20 = scalar_lea.hbm %s6302_s12, 1024 }
 0x745   :  { %p4019_p5 = scmp.ne.s32.totalorder %s6302_s12, %s4018_s20  ;;  %p4022_p6 = scmp.lt.u32.totalorder %s4018_s20, %s6302_s12 }
 0x747   :  { %p4024_p7 = pnand %p4022_p6, %p4019_p5 }
 0x749   :  { %4027 = shalt.err (!%p4024_p7)
}
 0x74a   :  { %2808 = dma.vmem_to_hbm [thread:$0]  %s2806_s10, 1024, %s6302_s12, [#allocation3]  }
 0x74b   :  { %4028 = dma.done.wait [#allocation3], 1024  }
 0x74c   :  { %4029 = vsyncadd [#allocation3], 4294966272 }
 0x74d   :  { %2812 = vsyncpa [#allocation3], 1 }

</bundles_post_ra>
